<compile_context>
chip_gen: v6e
topology: v6e:2x2x1
jax: 0.10.0
libtpu: 0.0.40
codegen_flags: <defaults>
</compile_context>

<pallas_src>
import jax
import jax.numpy as jnp
from jax.experimental import pallas as pl
from jax.experimental.pallas import tpu as pltpu


K = 49          # Conv1d kernel size
_HALO = 128     # per-tile input halo (>= K - 1, keeps every window 128-aligned)

_PROBE_CACHE = {}


# ----------------------------------------------------------------------------
# Feature probes (run once, tiny kernels): keep the fast plan when supported,
# fall back gracefully otherwise.
# ----------------------------------------------------------------------------
def _probe_roll_semantics(compute_dtype):
    """Detects the (direction, stride-sign) convention of strided pltpu.roll.

    Runs a tiny kernel mirroring the real im2col build (leading-dim broadcast
    -> strided roll along lanes -> slice -> sublane-merging reshape) and
    decodes the convention from the result.  Returns (eps, sigma) such that
    rolled[j, :, p] == x[:, (p + eps * (shift + sigma * j)) % width], or None
    if strided roll is unavailable / behaves unexpectedly (the conv kernel
    then uses the per-tap copy loop instead).
    """
    taps, c, width, tile = 4, 4, 256, 128

    def probe_kernel(o_ref):
        row = jax.lax.broadcasted_iota(jnp.float32, (c, width), 1)
        xb = jnp.broadcast_to(row.astype(compute_dtype)[None], (taps, c, width))
        rolled = pltpu.roll(xb, 1, 2, stride=1, stride_axis=0)
        o_ref[...] = rolled[:, :, :tile].reshape(taps * c, tile).astype(jnp.float32)

    try:
        out = pl.pallas_call(
            probe_kernel,
            out_shape=jax.ShapeDtypeStruct((taps * c, tile), jnp.float32),
        )()
        out = jax.block_until_ready(out)
        v0, v1 = int(out[0, 0]), int(out[c, 0])
    except Exception:
        return None
    if v0 == width - 1:
        eps = -1
    elif v0 == 1:
        eps = 1
    else:
        return None
    if v1 == (width - 2 if eps == -1 else 2):
        sigma = 1
    elif v1 == 0:
        sigma = -1
    else:
        return None
    return eps, sigma


def _probe_single_buffering():
    """True iff pipeline_mode=pl.Buffered(1) is accepted and functional."""
    def probe_kernel(a_ref, b_ref, o_ref):
        o_ref[...] = a_ref[...] + b_ref[...]

    try:
        const_spec = pl.BlockSpec((8, 128), lambda i: (0, 0),
                                  pipeline_mode=pl.Buffered(1))
        out = pl.pallas_call(
            probe_kernel,
            out_shape=jax.ShapeDtypeStruct((16, 128), jnp.float32),
            grid_spec=pltpu.PrefetchScalarGridSpec(
                num_scalar_prefetch=0,
                grid=(2,),
                in_specs=[pl.BlockSpec((8, 128), lambda i: (i, 0)), const_spec],
                out_specs=pl.BlockSpec((8, 128), lambda i: (i, 0))),
        )(jnp.zeros((16, 128), jnp.float32), jnp.ones((8, 128), jnp.float32))
        out = jax.block_until_ready(out)
        return bool(jnp.all(out == 1.0))
    except Exception:
        return False


def _roll_semantics(compute_dtype):
    key = ("roll", jnp.dtype(compute_dtype).name)
    if key not in _PROBE_CACHE:
        _PROBE_CACHE[key] = _probe_roll_semantics(compute_dtype)
    return _PROBE_CACHE[key]


def _single_buffering_ok():
    if "sbuf" not in _PROBE_CACHE:
        _PROBE_CACHE["sbuf"] = _probe_single_buffering()
    return _PROBE_CACHE["sbuf"]


# ----------------------------------------------------------------------------
# Planning helpers.
# ----------------------------------------------------------------------------
def _round_up(v, m):
    return -(-v // m) * m


def _pick_cprime(cin, sub, packed):
    """Channel count per im2col tap.

    packed=True: smallest divisor of the sublane tile >= cin (or the next
    multiple of the sublane tile) -> rows are packed as K*cprime with minimal
    zero fill.  packed=False: legacy per-tap padding to a full sublane tile.
    """
    if not packed or cin >= sub:
        return _round_up(cin, sub)
    for d in range(cin, sub + 1):
        if sub % d == 0:
            return d
    return sub


def _vmem_plan():
    """(is_128MiB_VMEM_part, scoped-VMEM cap in bytes) for the local TPU."""
    try:
        kind = jax.devices()[0].device_kind.lower()
    except Exception:
        kind = ""
    big = any(tag in kind for tag in ("v2", "v3", "v4", "v5", "v6"))
    return big, (100 << 20) if big else (48 << 20)


def _pick_tile(l_out, cprime, cout, itemsize, out_itemsize, cap, target):
    """Largest 128-aligned L tile whose (double-buffered) VMEM plan fits cap."""
    lmax = _round_up(l_out, 128)
    cands = sorted({min(t, lmax) for t in (target, 1024, 512, 256, 128)
                    if t <= target}, reverse=True)
    need = 0
    for tl in cands:
        n_lt = -(-l_out // tl)
        l_pad = n_lt * tl + _HALO
        win = tl + _HALO
        need = (2 * cprime * l_pad * itemsize           # x slab (double-buffered)
                + 2 * cout * K * cprime * itemsize      # im2col weights
                + 2 * cout * 4                          # folded bias
                + 2 * cout * tl * out_itemsize          # output tile
                + K * cprime * tl * itemsize            # im2col patches / scratch
                + 3 * K * cprime * win * itemsize       # roll-path temporaries
                + (2 << 20))                            # headroom
        if need <= cap:
            return tl, need
    # TODO(synk): halo-tile x along L with a manual double-buffered DMA
    # (memory_space=pl.ANY) and/or add an "arbitrary" contraction grid axis over
    # tap groups so VMEM stops scaling with sequence length and K*cin*cout.
    return cands[-1], need


def _roll_params(eps_dir, sigma, halo):
    """(shift, slice_offset, tap order) realizing all K left-shifts via 1 roll."""
    if eps_dir == -1:                          # jnp.roll convention
        if sigma == 1:
            return halo - (K - 1), halo, list(range(K - 1, -1, -1))
        return halo, halo, list(range(K))
    if sigma == 1:
        return 0, 0, list(range(K))
    return K - 1, 0, list(range(K - 1, -1, -1))


# ----------------------------------------------------------------------------
# Kernel.
# ----------------------------------------------------------------------------
def _make_kernel(*, cprime, tile_l, win, use_roll, roll_shift, roll_off):
    r_rows = K * cprime

    def kernel(x_ref, w_ref, bias_ref, o_ref, *scratch):
        # x_ref:    (1, cprime, l_pad)  compute dtype (NCL layout, whole batch row)
        # w_ref:    (cout, K*cprime)    compute dtype (packed im2col weights, BN folded)
        # bias_ref: (cout, 1)           f32 folded conv-bias + BN shift
        # o_ref:    (1, cout, tile_l)   lane-dense output tile
        start = pl.multiple_of(pl.program_id(1) * tile_l, 128)
        xw = x_ref[0, :, pl.ds(start, win)]                       # (cprime, win)

        if use_roll:
            # One strided XLU pass produces all K lane shifts at once; row
            # block j of the patch matrix holds the tap the wrapper assigned to
            # it (weights are reordered to match).
            xb = jnp.broadcast_to(xw[None], (K, cprime, win))
            rolled = pltpu.roll(xb, roll_shift, 2, stride=1, stride_axis=0)
            patches = rolled[:, :, roll_off:roll_off + tile_l].reshape(
                r_rows, tile_l)
            acc = jnp.dot(w_ref[...], patches,
                          preferred_element_type=jnp.float32)     # (cout, tile_l)
        else:
            # Fallback: per-tap shifted copies into the packed VMEM scratch.
            x2_ref = scratch[0]
            for k in range(K):
                x2_ref[k * cprime:(k + 1) * cprime, :] = xw[:, k:k + tile_l]
            acc = jnp.dot(w_ref[...], x2_ref[...],
                          preferred_element_type=jnp.float32)

        y = acc + bias_ref[...]                 # conv bias + eval-BN, pre-folded
        o_ref[0] = jnp.maximum(y, 0.0).astype(o_ref.dtype)   # ReLU, wide store

    return kernel


def _run_one(x_ncl, w_f, bias, roll_info, packed, single_buf,
             compute_dtype, out_dtype, max_tile_l):
    n, cin, l = x_ncl.shape
    cout = w_f.shape[0]
    l_out = l - K + 1
    use_roll = roll_info is not None

    itemsize = jnp.dtype(compute_dtype).itemsize
    out_itemsize = jnp.dtype(out_dtype).itemsize
    sub = 8 * (4 // itemsize)                   # sublane tile (8 f32 / 16 bf16)
    cprime = _pick_cprime(cin, sub, packed)
    r_rows = K * cprime

    big_vmem, cap = _vmem_plan()
    target = max_tile_l if max_tile_l is not None else (1024 if big_vmem else 512)
    tile_l, need = _pick_tile(l_out, cprime, cout, itemsize, out_itemsize,
                              cap, target)

    n_lt = -(-l_out // tile_l)
    lp_out = n_lt * tile_l
    l_pad = lp_out + _HALO
    win = tile_l + _HALO

    if use_roll:
        eps_dir, sigma = roll_info
        roll_shift, roll_off, taps = _roll_params(eps_dir, sigma, _HALO)
        realized = [(roll_off + eps_dir * (roll_shift + sigma * j)) % win
                    for j in range(K)]
        if realized != taps:                    # guards the roll model; never expected
            raise ValueError("strided-roll tap mapping mismatch")
    else:
        roll_shift, roll_off, taps = 0, 0, list(range(K))

    # Input prep: one fused cast + zero-pad pass, PyTorch NCL layout kept as-is.
    x_p = jnp.pad(x_ncl.astype(compute_dtype),
                  ((0, 0), (0, cprime - cin), (0, l_pad - l)))

    # Weights -> packed im2col order (tap-major, channel-minor), taps ordered to
    # match the in-kernel build; BN scale already folded (in f32) by the caller.
    w_pad = jnp.pad(w_f, ((0, 0), (0, cprime - cin), (0, 0)))    # (cout, cprime, K)
    w_ord = w_pad[:, :, jnp.asarray(taps, dtype=jnp.int32)]
    w2 = jnp.transpose(w_ord, (0, 2, 1)).reshape(cout, r_rows).astype(compute_dtype)

    vmem_limit = int(min(max(need + (4 << 20), 32 << 20), cap))

    cost = pl.CostEstimate(
        flops=2 * n * lp_out * K * cin * cout,
        transcendentals=0,
        bytes_accessed=(n * cprime * l_pad * itemsize
                        + cout * r_rows * itemsize
                        + n * cout * lp_out * out_itemsize))

    def const_spec(shape):
        # Grid-invariant operands: single-buffer them when supported so the
        # second (never used) VMEM copy is not allocated.
        if single_buf:
            return pl.BlockSpec(shape, lambda b, i: (0, 0),
                                pipeline_mode=pl.Buffered(1))
        return pl.BlockSpec(shape, lambda b, i: (0, 0))

    scratch_shapes = ([] if use_roll
                      else [pltpu.VMEM((r_rows, tile_l), compute_dtype)])

    out = pl.pallas_call(
        _make_kernel(cprime=cprime, tile_l=tile_l, win=win, use_roll=use_roll,
                     roll_shift=roll_shift, roll_off=roll_off),
        out_shape=jax.ShapeDtypeStruct((n, cout, lp_out), out_dtype),
        grid_spec=pltpu.PrefetchScalarGridSpec(
            num_scalar_prefetch=0,
            grid=(n, n_lt),
            in_specs=[
                pl.BlockSpec((1, cprime, l_pad), lambda b, i: (b, 0, 0)),
                const_spec((cout, r_rows)),
                const_spec((cout, 1)),
            ],
            out_specs=pl.BlockSpec((1, cout, tile_l), lambda b, i: (b, 0, i)),
            scratch_shapes=scratch_shapes),
        compiler_params=pltpu.CompilerParams(
            dimension_semantics=("parallel", "parallel"),
            vmem_limit_bytes=vmem_limit),
        cost_estimate=cost,
    )(x_p, w2, bias)
    return out


# ----------------------------------------------------------------------------
# Public wrapper.
# ----------------------------------------------------------------------------
def glob_conv_49_forward(x_ncl, w_conv, b_conv, gamma, beta,
                         running_mean, running_var, eps=1e-5,
                         compute_dtype=jnp.bfloat16, max_tile_l=None,
                         out_dtype=jnp.float32, trim_output=True):
    """Forward pass matching glob_Conv_49 (eval-mode BatchNorm).

    x_ncl:  (N, cin, L)     PyTorch NCL layout, consumed as-is (no transposes)
    w_conv: (cout, cin, K)  PyTorch Conv1d weight layout
    b_conv, gamma, beta, running_mean, running_var: (cout,)
    Returns (N, cout, L - K + 1) in `out_dtype` (pass jnp.bfloat16 to halve the
    output HBM stream when the consumer tolerates it).
    """
    n, cin, l = x_ncl.shape
    cout = w_conv.shape[0]
    l_out = l - K + 1
    if l_out < 1:
        raise ValueError("sequence too short for kernel_size=49")
    if max_tile_l is not None and (max_tile_l % 128 != 0 or max_tile_l < 128):
        raise ValueError("max_tile_l must be a positive multiple of 128")

    # Fold conv bias + eval-mode BatchNorm into the weights (in f32, before the
    # compute-dtype cast) and a single per-channel bias.
    inv_std = jax.lax.rsqrt(running_var.astype(jnp.float32) + eps)
    scale = gamma.astype(jnp.float32) * inv_std                        # (cout,)
    w_f = w_conv.astype(jnp.float32) * scale[:, None, None]            # (cout, cin, K)
    bias = (scale * (b_conv.astype(jnp.float32)
                     - running_mean.astype(jnp.float32))
            + beta.astype(jnp.float32)).reshape(cout, 1)

    roll_info = _roll_semantics(compute_dtype)
    single_buf = _single_buffering_ok()

    # Configuration cascade: best plan first; each later entry drops one
    # optional feature; the last one is the layout proven on all generations.
    attempts = []
    if roll_info is not None:
        attempts.append((roll_info, True, single_buf))
    attempts.append((None, True, single_buf))
    attempts.append((None, False, False))

    out, last_err = None, None
    for r_info, packed, sbuf in attempts:
        try:
            out = _run_one(x_ncl, w_f, bias, r_info, packed, sbuf,
                           compute_dtype, out_dtype, max_tile_l)
            break
        except Exception as err:        # fall back to the next (simpler) plan
            last_err = err
    if out is None:
        raise last_err

    if trim_output and out.shape[-1] != l_out:
        # TODO(synk): optionally mask the last tile's store in-kernel (or let
        # the caller keep the padded slab) to avoid this extra HBM copy when
        # Lout is not a multiple of 128 and the op is memory-bound.
        out = out[:, :, :l_out]
    return out


def _reference(x_ncl, w_conv, b_conv, gamma, beta, rm, rv, eps=1e-5):
    """Pure-JAX f32 reference (valid 1-D conv, eval BN, ReLU)."""
    y = jax.lax.conv_general_dilated(
        x_ncl.astype(jnp.float32), w_conv.astype(jnp.float32),
        window_strides=(1,), padding="VALID",
        dimension_numbers=("NCH", "OIH", "NCH"))
    y = y + b_conv.reshape(1, -1, 1)
    y = (y - rm.reshape(1, -1, 1)) * jax.lax.rsqrt(rv.reshape(1, -1, 1) + eps)
    y = y * gamma.reshape(1, -1, 1) + beta.reshape(1, -1, 1)
    return jnp.maximum(y, 0.0)


if __name__ == "__main__":
    root = jax.random.PRNGKey(0)

    test_configs = (
        # (N, cin, cout, L, extra kwargs)
        (2, 4, 8, 176, {}),                                             # one 128-wide tile
        (1, 6, 16, 304, dict(max_tile_l=128, out_dtype=jnp.bfloat16)),  # 2 tiles, padded cin, bf16 out
    )

    for idx, (n, cin, cout, l, kwargs) in enumerate(test_configs):
        keys = jax.random.split(jax.random.fold_in(root, idx), 7)
        x = jax.random.normal(keys[0], (n, cin, l), dtype=jnp.float32)
        w_conv = 0.1 * jax.random.normal(keys[1], (cout, cin, K), dtype=jnp.float32)
        b_conv = 0.1 * jax.random.normal(keys[2], (cout,), dtype=jnp.float32)
        gamma = 1.0 + 0.1 * jax.random.normal(keys[3], (cout,), dtype=jnp.float32)
        beta = 0.1 * jax.random.normal(keys[4], (cout,), dtype=jnp.float32)
        running_mean = 0.1 * jax.random.normal(keys[5], (cout,), dtype=jnp.float32)
        running_var = 1.0 + 0.2 * jax.random.uniform(keys[6], (cout,),
                                                     dtype=jnp.float32)

        out = glob_conv_49_forward(x, w_conv, b_conv, gamma, beta,
                                   running_mean, running_var, **kwargs)
        out = jax.block_until_ready(out)

        ref = _reference(x, w_conv, b_conv, gamma, beta,
                         running_mean, running_var)
        assert out.shape == ref.shape, (out.shape, ref.shape)
        out_f32 = out.astype(jnp.float32)
        max_err = float(jnp.max(jnp.abs(out_f32 - ref)))
        # bf16 inputs with f32 MXU accumulation -> loosened tolerance vs f32 ref.
        assert jnp.allclose(out_f32, ref, atol=7.5e-2, rtol=5e-2), max_err

    print("KERNEL_OK")
</pallas_src>

<mosaic_0001>
module attributes {stable_mosaic.version = 11 : i64} {
  func.func @probe_kernel(%arg0: i32, %arg1: memref<8x128xf32, #tpu.memory_space<vmem>>, %arg2: memref<8x128xf32, #tpu.memory_space<vmem>>, %arg3: memref<8x128xf32, #tpu.memory_space<vmem>>) attributes {dimension_semantics = [#tpu.dimension_semantics<arbitrary>], iteration_bounds = array<i64: 2>, scalar_prefetch = 0 : i64, scratch_operands = 0 : i64, tpu.core_type = #tpu.core_type<tc>, window_params = [{transform_indices = @transform_0, window_bounds = array<i64: 8, 128>}, {pipeline_mode = #tpu.pipeline_mode<synchronous>, transform_indices = @transform_1, window_bounds = array<i64: 8, 128>}, {transform_indices = @transform_2, window_bounds = array<i64: 8, 128>}]} {
    %c0 = arith.constant 0 : index
    %c0_0 = arith.constant 0 : index
    %0 = vector.load %arg1[%c0, %c0_0] : memref<8x128xf32, #tpu.memory_space<vmem>>, vector<8x128xf32>
    %c0_1 = arith.constant 0 : index
    %c0_2 = arith.constant 0 : index
    %1 = vector.load %arg2[%c0_1, %c0_2] : memref<8x128xf32, #tpu.memory_space<vmem>>, vector<8x128xf32>
    %2 = arith.addf %0, %1 : vector<8x128xf32>
    %c0_3 = arith.constant 0 : index
    %c0_4 = arith.constant 0 : index
    %3 = vector.load %arg3[%c0_3, %c0_4] : memref<8x128xf32, #tpu.memory_space<vmem>>, vector<8x128xf32>
    tpu.vector_store %arg3[%c0_3, %c0_4], %2 {strides = array<i32>} : memref<8x128xf32, #tpu.memory_space<vmem>>, vector<8x128xf32>,
    return
  }
  func.func @transform_0(%arg0: i32) -> (i32, i32) {
    %c0_i32 = arith.constant 0 : i32
    %c0_i32_0 = arith.constant 0 : i32
    return %arg0, %c0_i32 : i32, i32
  }
  func.func @transform_1(%arg0: i32) -> (i32, i32) {
    %c0_i32 = arith.constant 0 : i32
    %c0_i32_0 = arith.constant 0 : i32
    %c0_i32_1 = arith.constant 0 : i32
    return %c0_i32, %c0_i32_0 : i32, i32
  }
  func.func @transform_2(%arg0: i32) -> (i32, i32) {
    %c0_i32 = arith.constant 0 : i32
    %c0_i32_0 = arith.constant 0 : i32
    return %arg0, %c0_i32 : i32, i32
  }
}

module attributes {stable_mosaic.version = 11 : i64} {
  func.func @kernel(%arg0: i32, %arg1: i32, %arg2: memref<1x4x256xbf16, #tpu.memory_space<vmem>>, %arg3: memref<8x196xbf16, #tpu.memory_space<vmem>>, %arg4: memref<8x1xf32, #tpu.memory_space<vmem>>, %arg5: memref<1x8x128xf32, #tpu.memory_space<vmem>>, %arg6: memref<196x128xbf16, #tpu.memory_space<vmem>>) attributes {dimension_semantics = [#tpu.dimension_semantics<parallel>, #tpu.dimension_semantics<parallel>], iteration_bounds = array<i64: 2, 1>, scalar_prefetch = 0 : i64, scratch_operands = 1 : i64, tpu.core_type = #tpu.core_type<tc>, window_params = [{transform_indices = @transform_0, window_bounds = array<i64: 1, 4, 256>}, {pipeline_mode = #tpu.pipeline_mode<synchronous>, transform_indices = @transform_1, window_bounds = array<i64: 8, 196>}, {pipeline_mode = #tpu.pipeline_mode<synchronous>, transform_indices = @transform_2, window_bounds = array<i64: 8, 1>}, {transform_indices = @transform_3, window_bounds = array<i64: 1, 8, 128>}]} {
    %c128_i32 = arith.constant 128 : i32
    %0 = arith.muli %arg1, %c128_i32 : i32
    %1 = tpu.assume_multiple %0, 128 : i32
    %c0 = arith.constant 0 : index
    %c0_0 = arith.constant 0 : index
    %2 = arith.index_cast %1 : i32 to index
    %3 = vector.load %arg2[%c0, %c0_0, %2] : memref<1x4x256xbf16, #tpu.memory_space<vmem>>, vector<1x4x256xbf16>
    %4 = vector.shape_cast %3 : vector<1x4x256xbf16> to vector<4x256xbf16>
    %5 = vector.extract_strided_slice %4 {offsets = [0, 0], sizes = [4, 128], strides = [1, 1]} : vector<4x256xbf16> to vector<4x128xbf16>
    %c0_1 = arith.constant 0 : index
    %c0_2 = arith.constant 0 : index
    %6 = vector.load %arg6[%c0_1, %c0_2] : memref<196x128xbf16, #tpu.memory_space<vmem>>, vector<4x128xbf16>
    tpu.vector_store %arg6[%c0_1, %c0_2], %5 {strides = array<i32>} : memref<196x128xbf16, #tpu.memory_space<vmem>>, vector<4x128xbf16>,
    %7 = vector.extract_strided_slice %4 {offsets = [0, 1], sizes = [4, 128], strides = [1, 1]} : vector<4x256xbf16> to vector<4x128xbf16>
    %c4 = arith.constant 4 : index
    %c0_3 = arith.constant 0 : index
    %8 = vector.load %arg6[%c4, %c0_3] : memref<196x128xbf16, #tpu.memory_space<vmem>>, vector<4x128xbf16>
    tpu.vector_store %arg6[%c4, %c0_3], %7 {strides = array<i32>} : memref<196x128xbf16, #tpu.memory_space<vmem>>, vector<4x128xbf16>,
    %9 = vector.extract_strided_slice %4 {offsets = [0, 2], sizes = [4, 128], strides = [1, 1]} : vector<4x256xbf16> to vector<4x128xbf16>
    %c8 = arith.constant 8 : index
    %c0_4 = arith.constant 0 : index
    %10 = vector.load %arg6[%c8, %c0_4] : memref<196x128xbf16, #tpu.memory_space<vmem>>, vector<4x128xbf16>
    tpu.vector_store %arg6[%c8, %c0_4], %9 {strides = array<i32>} : memref<196x128xbf16, #tpu.memory_space<vmem>>, vector<4x128xbf16>,
    %11 = vector.extract_strided_slice %4 {offsets = [0, 3], sizes = [4, 128], strides = [1, 1]} : vector<4x256xbf16> to vector<4x128xbf16>
    %c12 = arith.constant 12 : index
    %c0_5 = arith.constant 0 : index
    %12 = vector.load %arg6[%c12, %c0_5] : memref<196x128xbf16, #tpu.memory_space<vmem>>, vector<4x128xbf16>
    tpu.vector_store %arg6[%c12, %c0_5], %11 {strides = array<i32>} : memref<196x128xbf16, #tpu.memory_space<vmem>>, vector<4x128xbf16>,
    %13 = vector.extract_strided_slice %4 {offsets = [0, 4], sizes = [4, 128], strides = [1, 1]} : vector<4x256xbf16> to vector<4x128xbf16>
    %c16 = arith.constant 16 : index
    %c0_6 = arith.constant 0 : index
    %14 = vector.load %arg6[%c16, %c0_6] : memref<196x128xbf16, #tpu.memory_space<vmem>>, vector<4x128xbf16>
    tpu.vector_store %arg6[%c16, %c0_6], %13 {strides = array<i32>} : memref<196x128xbf16, #tpu.memory_space<vmem>>, vector<4x128xbf16>,
    %15 = vector.extract_strided_slice %4 {offsets = [0, 5], sizes = [4, 128], strides = [1, 1]} : vector<4x256xbf16> to vector<4x128xbf16>
    %c20 = arith.constant 20 : index
    %c0_7 = arith.constant 0 : index
    %16 = vector.load %arg6[%c20, %c0_7] : memref<196x128xbf16, #tpu.memory_space<vmem>>, vector<4x128xbf16>
    tpu.vector_store %arg6[%c20, %c0_7], %15 {strides = array<i32>} : memref<196x128xbf16, #tpu.memory_space<vmem>>, vector<4x128xbf16>,
    %17 = vector.extract_strided_slice %4 {offsets = [0, 6], sizes = [4, 128], strides = [1, 1]} : vector<4x256xbf16> to vector<4x128xbf16>
    %c24 = arith.constant 24 : index
    %c0_8 = arith.constant 0 : index
    %18 = vector.load %arg6[%c24, %c0_8] : memref<196x128xbf16, #tpu.memory_space<vmem>>, vector<4x128xbf16>
    tpu.vector_store %arg6[%c24, %c0_8], %17 {strides = array<i32>} : memref<196x128xbf16, #tpu.memory_space<vmem>>, vector<4x128xbf16>,
    %19 = vector.extract_strided_slice %4 {offsets = [0, 7], sizes = [4, 128], strides = [1, 1]} : vector<4x256xbf16> to vector<4x128xbf16>
    %c28 = arith.constant 28 : index
    %c0_9 = arith.constant 0 : index
    %20 = vector.load %arg6[%c28, %c0_9] : memref<196x128xbf16, #tpu.memory_space<vmem>>, vector<4x128xbf16>
    tpu.vector_store %arg6[%c28, %c0_9], %19 {strides = array<i32>} : memref<196x128xbf16, #tpu.memory_space<vmem>>, vector<4x128xbf16>,
    %21 = vector.extract_strided_slice %4 {offsets = [0, 8], sizes = [4, 128], strides = [1, 1]} : vector<4x256xbf16> to vector<4x128xbf16>
    %c32 = arith.constant 32 : index
    %c0_10 = arith.constant 0 : index
    %22 = vector.load %arg6[%c32, %c0_10] : memref<196x128xbf16, #tpu.memory_space<vmem>>, vector<4x128xbf16>
    tpu.vector_store %arg6[%c32, %c0_10], %21 {strides = array<i32>} : memref<196x128xbf16, #tpu.memory_space<vmem>>, vector<4x128xbf16>,
    %23 = vector.extract_strided_slice %4 {offsets = [0, 9], sizes = [4, 128], strides = [1, 1]} : vector<4x256xbf16> to vector<4x128xbf16>
    %c36 = arith.constant 36 : index
    %c0_11 = arith.constant 0 : index
    %24 = vector.load %arg6[%c36, %c0_11] : memref<196x128xbf16, #tpu.memory_space<vmem>>, vector<4x128xbf16>
    tpu.vector_store %arg6[%c36, %c0_11], %23 {strides = array<i32>} : memref<196x128xbf16, #tpu.memory_space<vmem>>, vector<4x128xbf16>,
    %25 = vector.extract_strided_slice %4 {offsets = [0, 10], sizes = [4, 128], strides = [1, 1]} : vector<4x256xbf16> to vector<4x128xbf16>
    %c40 = arith.constant 40 : index
    %c0_12 = arith.constant 0 : index
    %26 = vector.load %arg6[%c40, %c0_12] : memref<196x128xbf16, #tpu.memory_space<vmem>>, vector<4x128xbf16>
    tpu.vector_store %arg6[%c40, %c0_12], %25 {strides = array<i32>} : memref<196x128xbf16, #tpu.memory_space<vmem>>, vector<4x128xbf16>,
    %27 = vector.extract_strided_slice %4 {offsets = [0, 11], sizes = [4, 128], strides = [1, 1]} : vector<4x256xbf16> to vector<4x128xbf16>
    %c44 = arith.constant 44 : index
    %c0_13 = arith.constant 0 : index
    %28 = vector.load %arg6[%c44, %c0_13] : memref<196x128xbf16, #tpu.memory_space<vmem>>, vector<4x128xbf16>
    tpu.vector_store %arg6[%c44, %c0_13], %27 {strides = array<i32>} : memref<196x128xbf16, #tpu.memory_space<vmem>>, vector<4x128xbf16>,
    %29 = vector.extract_strided_slice %4 {offsets = [0, 12], sizes = [4, 128], strides = [1, 1]} : vector<4x256xbf16> to vector<4x128xbf16>
    %c48 = arith.constant 48 : index
    %c0_14 = arith.constant 0 : index
    %30 = vector.load %arg6[%c48, %c0_14] : memref<196x128xbf16, #tpu.memory_space<vmem>>, vector<4x128xbf16>
    tpu.vector_store %arg6[%c48, %c0_14], %29 {strides = array<i32>} : memref<196x128xbf16, #tpu.memory_space<vmem>>, vector<4x128xbf16>,
    %31 = vector.extract_strided_slice %4 {offsets = [0, 13], sizes = [4, 128], strides = [1, 1]} : vector<4x256xbf16> to vector<4x128xbf16>
    %c52 = arith.constant 52 : index
    %c0_15 = arith.constant 0 : index
    %32 = vector.load %arg6[%c52, %c0_15] : memref<196x128xbf16, #tpu.memory_space<vmem>>, vector<4x128xbf16>
    tpu.vector_store %arg6[%c52, %c0_15], %31 {strides = array<i32>} : memref<196x128xbf16, #tpu.memory_space<vmem>>, vector<4x128xbf16>,
    %33 = vector.extract_strided_slice %4 {offsets = [0, 14], sizes = [4, 128], strides = [1, 1]} : vector<4x256xbf16> to vector<4x128xbf16>
    %c56 = arith.constant 56 : index
    %c0_16 = arith.constant 0 : index
    %34 = vector.load %arg6[%c56, %c0_16] : memref<196x128xbf16, #tpu.memory_space<vmem>>, vector<4x128xbf16>
    tpu.vector_store %arg6[%c56, %c0_16], %33 {strides = array<i32>} : memref<196x128xbf16, #tpu.memory_space<vmem>>, vector<4x128xbf16>,
    %35 = vector.extract_strided_slice %4 {offsets = [0, 15], sizes = [4, 128], strides = [1, 1]} : vector<4x256xbf16> to vector<4x128xbf16>
    %c60 = arith.constant 60 : index
    %c0_17 = arith.constant 0 : index
    %36 = vector.load %arg6[%c60, %c0_17] : memref<196x128xbf16, #tpu.memory_space<vmem>>, vector<4x128xbf16>
    tpu.vector_store %arg6[%c60, %c0_17], %35 {strides = array<i32>} : memref<196x128xbf16, #tpu.memory_space<vmem>>, vector<4x128xbf16>,
    %37 = vector.extract_strided_slice %4 {offsets = [0, 16], sizes = [4, 128], strides = [1, 1]} : vector<4x256xbf16> to vector<4x128xbf16>
    %c64 = arith.constant 64 : index
    %c0_18 = arith.constant 0 : index
    %38 = vector.load %arg6[%c64, %c0_18] : memref<196x128xbf16, #tpu.memory_space<vmem>>, vector<4x128xbf16>
    tpu.vector_store %arg6[%c64, %c0_18], %37 {strides = array<i32>} : memref<196x128xbf16, #tpu.memory_space<vmem>>, vector<4x128xbf16>,
    %39 = vector.extract_strided_slice %4 {offsets = [0, 17], sizes = [4, 128], strides = [1, 1]} : vector<4x256xbf16> to vector<4x128xbf16>
    %c68 = arith.constant 68 : index
    %c0_19 = arith.constant 0 : index
    %40 = vector.load %arg6[%c68, %c0_19] : memref<196x128xbf16, #tpu.memory_space<vmem>>, vector<4x128xbf16>
    tpu.vector_store %arg6[%c68, %c0_19], %39 {strides = array<i32>} : memref<196x128xbf16, #tpu.memory_space<vmem>>, vector<4x128xbf16>,
    %41 = vector.extract_strided_slice %4 {offsets = [0, 18], sizes = [4, 128], strides = [1, 1]} : vector<4x256xbf16> to vector<4x128xbf16>
    %c72 = arith.constant 72 : index
    %c0_20 = arith.constant 0 : index
    %42 = vector.load %arg6[%c72, %c0_20] : memref<196x128xbf16, #tpu.memory_space<vmem>>, vector<4x128xbf16>
    tpu.vector_store %arg6[%c72, %c0_20], %41 {strides = array<i32>} : memref<196x128xbf16, #tpu.memory_space<vmem>>, vector<4x128xbf16>,
    %43 = vector.extract_strided_slice %4 {offsets = [0, 19], sizes = [4, 128], strides = [1, 1]} : vector<4x256xbf16> to vector<4x128xbf16>
    %c76 = arith.constant 76 : index
    %c0_21 = arith.constant 0 : index
    %44 = vector.load %arg6[%c76, %c0_21] : memref<196x128xbf16, #tpu.memory_space<vmem>>, vector<4x128xbf16>
    tpu.vector_store %arg6[%c76, %c0_21], %43 {strides = array<i32>} : memref<196x128xbf16, #tpu.memory_space<vmem>>, vector<4x128xbf16>,
    %45 = vector.extract_strided_slice %4 {offsets = [0, 20], sizes = [4, 128], strides = [1, 1]} : vector<4x256xbf16> to vector<4x128xbf16>
    %c80 = arith.constant 80 : index
    %c0_22 = arith.constant 0 : index
    %46 = vector.load %arg6[%c80, %c0_22] : memref<196x128xbf16, #tpu.memory_space<vmem>>, vector<4x128xbf16>
    tpu.vector_store %arg6[%c80, %c0_22], %45 {strides = array<i32>} : memref<196x128xbf16, #tpu.memory_space<vmem>>, vector<4x128xbf16>,
    %47 = vector.extract_strided_slice %4 {offsets = [0, 21], sizes = [4, 128], strides = [1, 1]} : vector<4x256xbf16> to vector<4x128xbf16>
    %c84 = arith.constant 84 : index
    %c0_23 = arith.constant 0 : index
    %48 = vector.load %arg6[%c84, %c0_23] : memref<196x128xbf16, #tpu.memory_space<vmem>>, vector<4x128xbf16>
    tpu.vector_store %arg6[%c84, %c0_23], %47 {strides = array<i32>} : memref<196x128xbf16, #tpu.memory_space<vmem>>, vector<4x128xbf16>,
    %49 = vector.extract_strided_slice %4 {offsets = [0, 22], sizes = [4, 128], strides = [1, 1]} : vector<4x256xbf16> to vector<4x128xbf16>
    %c88 = arith.constant 88 : index
    %c0_24 = arith.constant 0 : index
    %50 = vector.load %arg6[%c88, %c0_24] : memref<196x128xbf16, #tpu.memory_space<vmem>>, vector<4x128xbf16>
    tpu.vector_store %arg6[%c88, %c0_24], %49 {strides = array<i32>} : memref<196x128xbf16, #tpu.memory_space<vmem>>, vector<4x128xbf16>,
    %51 = vector.extract_strided_slice %4 {offsets = [0, 23], sizes = [4, 128], strides = [1, 1]} : vector<4x256xbf16> to vector<4x128xbf16>
    %c92 = arith.constant 92 : index
    %c0_25 = arith.constant 0 : index
    %52 = vector.load %arg6[%c92, %c0_25] : memref<196x128xbf16, #tpu.memory_space<vmem>>, vector<4x128xbf16>
    tpu.vector_store %arg6[%c92, %c0_25], %51 {strides = array<i32>} : memref<196x128xbf16, #tpu.memory_space<vmem>>, vector<4x128xbf16>,
    %53 = vector.extract_strided_slice %4 {offsets = [0, 24], sizes = [4, 128], strides = [1, 1]} : vector<4x256xbf16> to vector<4x128xbf16>
    %c96 = arith.constant 96 : index
    %c0_26 = arith.constant 0 : index
    %54 = vector.load %arg6[%c96, %c0_26] : memref<196x128xbf16, #tpu.memory_space<vmem>>, vector<4x128xbf16>
    tpu.vector_store %arg6[%c96, %c0_26], %53 {strides = array<i32>} : memref<196x128xbf16, #tpu.memory_space<vmem>>, vector<4x128xbf16>,
    %55 = vector.extract_strided_slice %4 {offsets = [0, 25], sizes = [4, 128], strides = [1, 1]} : vector<4x256xbf16> to vector<4x128xbf16>
    %c100 = arith.constant 100 : index
    %c0_27 = arith.constant 0 : index
    %56 = vector.load %arg6[%c100, %c0_27] : memref<196x128xbf16, #tpu.memory_space<vmem>>, vector<4x128xbf16>
    tpu.vector_store %arg6[%c100, %c0_27], %55 {strides = array<i32>} : memref<196x128xbf16, #tpu.memory_space<vmem>>, vector<4x128xbf16>,
    %57 = vector.extract_strided_slice %4 {offsets = [0, 26], sizes = [4, 128], strides = [1, 1]} : vector<4x256xbf16> to vector<4x128xbf16>
    %c104 = arith.constant 104 : index
    %c0_28 = arith.constant 0 : index
    %58 = vector.load %arg6[%c104, %c0_28] : memref<196x128xbf16, #tpu.memory_space<vmem>>, vector<4x128xbf16>
    tpu.vector_store %arg6[%c104, %c0_28], %57 {strides = array<i32>} : memref<196x128xbf16, #tpu.memory_space<vmem>>, vector<4x128xbf16>,
    %59 = vector.extract_strided_slice %4 {offsets = [0, 27], sizes = [4, 128], strides = [1, 1]} : vector<4x256xbf16> to vector<4x128xbf16>
    %c108 = arith.constant 108 : index
    %c0_29 = arith.constant 0 : index
    %60 = vector.load %arg6[%c108, %c0_29] : memref<196x128xbf16, #tpu.memory_space<vmem>>, vector<4x128xbf16>
    tpu.vector_store %arg6[%c108, %c0_29], %59 {strides = array<i32>} : memref<196x128xbf16, #tpu.memory_space<vmem>>, vector<4x128xbf16>,
    %61 = vector.extract_strided_slice %4 {offsets = [0, 28], sizes = [4, 128], strides = [1, 1]} : vector<4x256xbf16> to vector<4x128xbf16>
    %c112 = arith.constant 112 : index
    %c0_30 = arith.constant 0 : index
    %62 = vector.load %arg6[%c112, %c0_30] : memref<196x128xbf16, #tpu.memory_space<vmem>>, vector<4x128xbf16>
    tpu.vector_store %arg6[%c112, %c0_30], %61 {strides = array<i32>} : memref<196x128xbf16, #tpu.memory_space<vmem>>, vector<4x128xbf16>,
    %63 = vector.extract_strided_slice %4 {offsets = [0, 29], sizes = [4, 128], strides = [1, 1]} : vector<4x256xbf16> to vector<4x128xbf16>
    %c116 = arith.constant 116 : index
    %c0_31 = arith.constant 0 : index
    %64 = vector.load %arg6[%c116, %c0_31] : memref<196x128xbf16, #tpu.memory_space<vmem>>, vector<4x128xbf16>
    tpu.vector_store %arg6[%c116, %c0_31], %63 {strides = array<i32>} : memref<196x128xbf16, #tpu.memory_space<vmem>>, vector<4x128xbf16>,
    %65 = vector.extract_strided_slice %4 {offsets = [0, 30], sizes = [4, 128], strides = [1, 1]} : vector<4x256xbf16> to vector<4x128xbf16>
    %c120 = arith.constant 120 : index
    %c0_32 = arith.constant 0 : index
    %66 = vector.load %arg6[%c120, %c0_32] : memref<196x128xbf16, #tpu.memory_space<vmem>>, vector<4x128xbf16>
    tpu.vector_store %arg6[%c120, %c0_32], %65 {strides = array<i32>} : memref<196x128xbf16, #tpu.memory_space<vmem>>, vector<4x128xbf16>,
    %67 = vector.extract_strided_slice %4 {offsets = [0, 31], sizes = [4, 128], strides = [1, 1]} : vector<4x256xbf16> to vector<4x128xbf16>
    %c124 = arith.constant 124 : index
    %c0_33 = arith.constant 0 : index
    %68 = vector.load %arg6[%c124, %c0_33] : memref<196x128xbf16, #tpu.memory_space<vmem>>, vector<4x128xbf16>
    tpu.vector_store %arg6[%c124, %c0_33], %67 {strides = array<i32>} : memref<196x128xbf16, #tpu.memory_space<vmem>>, vector<4x128xbf16>,
    %69 = vector.extract_strided_slice %4 {offsets = [0, 32], sizes = [4, 128], strides = [1, 1]} : vector<4x256xbf16> to vector<4x128xbf16>
    %c128 = arith.constant 128 : index
    %c0_34 = arith.constant 0 : index
    %70 = vector.load %arg6[%c128, %c0_34] : memref<196x128xbf16, #tpu.memory_space<vmem>>, vector<4x128xbf16>
    tpu.vector_store %arg6[%c128, %c0_34], %69 {strides = array<i32>} : memref<196x128xbf16, #tpu.memory_space<vmem>>, vector<4x128xbf16>,
    %71 = vector.extract_strided_slice %4 {offsets = [0, 33], sizes = [4, 128], strides = [1, 1]} : vector<4x256xbf16> to vector<4x128xbf16>
    %c132 = arith.constant 132 : index
    %c0_35 = arith.constant 0 : index
    %72 = vector.load %arg6[%c132, %c0_35] : memref<196x128xbf16, #tpu.memory_space<vmem>>, vector<4x128xbf16>
    tpu.vector_store %arg6[%c132, %c0_35], %71 {strides = array<i32>} : memref<196x128xbf16, #tpu.memory_space<vmem>>, vector<4x128xbf16>,
    %73 = vector.extract_strided_slice %4 {offsets = [0, 34], sizes = [4, 128], strides = [1, 1]} : vector<4x256xbf16> to vector<4x128xbf16>
    %c136 = arith.constant 136 : index
    %c0_36 = arith.constant 0 : index
    %74 = vector.load %arg6[%c136, %c0_36] : memref<196x128xbf16, #tpu.memory_space<vmem>>, vector<4x128xbf16>
    tpu.vector_store %arg6[%c136, %c0_36], %73 {strides = array<i32>} : memref<196x128xbf16, #tpu.memory_space<vmem>>, vector<4x128xbf16>,
    %75 = vector.extract_strided_slice %4 {offsets = [0, 35], sizes = [4, 128], strides = [1, 1]} : vector<4x256xbf16> to vector<4x128xbf16>
    %c140 = arith.constant 140 : index
    %c0_37 = arith.constant 0 : index
    %76 = vector.load %arg6[%c140, %c0_37] : memref<196x128xbf16, #tpu.memory_space<vmem>>, vector<4x128xbf16>
    tpu.vector_store %arg6[%c140, %c0_37], %75 {strides = array<i32>} : memref<196x128xbf16, #tpu.memory_space<vmem>>, vector<4x128xbf16>,
    %77 = vector.extract_strided_slice %4 {offsets = [0, 36], sizes = [4, 128], strides = [1, 1]} : vector<4x256xbf16> to vector<4x128xbf16>
    %c144 = arith.constant 144 : index
    %c0_38 = arith.constant 0 : index
    %78 = vector.load %arg6[%c144, %c0_38] : memref<196x128xbf16, #tpu.memory_space<vmem>>, vector<4x128xbf16>
    tpu.vector_store %arg6[%c144, %c0_38], %77 {strides = array<i32>} : memref<196x128xbf16, #tpu.memory_space<vmem>>, vector<4x128xbf16>,
    %79 = vector.extract_strided_slice %4 {offsets = [0, 37], sizes = [4, 128], strides = [1, 1]} : vector<4x256xbf16> to vector<4x128xbf16>
    %c148 = arith.constant 148 : index
    %c0_39 = arith.constant 0 : index
    %80 = vector.load %arg6[%c148, %c0_39] : memref<196x128xbf16, #tpu.memory_space<vmem>>, vector<4x128xbf16>
    tpu.vector_store %arg6[%c148, %c0_39], %79 {strides = array<i32>} : memref<196x128xbf16, #tpu.memory_space<vmem>>, vector<4x128xbf16>,
    %81 = vector.extract_strided_slice %4 {offsets = [0, 38], sizes = [4, 128], strides = [1, 1]} : vector<4x256xbf16> to vector<4x128xbf16>
    %c152 = arith.constant 152 : index
    %c0_40 = arith.constant 0 : index
    %82 = vector.load %arg6[%c152, %c0_40] : memref<196x128xbf16, #tpu.memory_space<vmem>>, vector<4x128xbf16>
    tpu.vector_store %arg6[%c152, %c0_40], %81 {strides = array<i32>} : memref<196x128xbf16, #tpu.memory_space<vmem>>, vector<4x128xbf16>,
    %83 = vector.extract_strided_slice %4 {offsets = [0, 39], sizes = [4, 128], strides = [1, 1]} : vector<4x256xbf16> to vector<4x128xbf16>
    %c156 = arith.constant 156 : index
    %c0_41 = arith.constant 0 : index
    %84 = vector.load %arg6[%c156, %c0_41] : memref<196x128xbf16, #tpu.memory_space<vmem>>, vector<4x128xbf16>
    tpu.vector_store %arg6[%c156, %c0_41], %83 {strides = array<i32>} : memref<196x128xbf16, #tpu.memory_space<vmem>>, vector<4x128xbf16>,
    %85 = vector.extract_strided_slice %4 {offsets = [0, 40], sizes = [4, 128], strides = [1, 1]} : vector<4x256xbf16> to vector<4x128xbf16>
    %c160 = arith.constant 160 : index
    %c0_42 = arith.constant 0 : index
    %86 = vector.load %arg6[%c160, %c0_42] : memref<196x128xbf16, #tpu.memory_space<vmem>>, vector<4x128xbf16>
    tpu.vector_store %arg6[%c160, %c0_42], %85 {strides = array<i32>} : memref<196x128xbf16, #tpu.memory_space<vmem>>, vector<4x128xbf16>,
    %87 = vector.extract_strided_slice %4 {offsets = [0, 41], sizes = [4, 128], strides = [1, 1]} : vector<4x256xbf16> to vector<4x128xbf16>
    %c164 = arith.constant 164 : index
    %c0_43 = arith.constant 0 : index
    %88 = vector.load %arg6[%c164, %c0_43] : memref<196x128xbf16, #tpu.memory_space<vmem>>, vector<4x128xbf16>
    tpu.vector_store %arg6[%c164, %c0_43], %87 {strides = array<i32>} : memref<196x128xbf16, #tpu.memory_space<vmem>>, vector<4x128xbf16>,
    %89 = vector.extract_strided_slice %4 {offsets = [0, 42], sizes = [4, 128], strides = [1, 1]} : vector<4x256xbf16> to vector<4x128xbf16>
    %c168 = arith.constant 168 : index
    %c0_44 = arith.constant 0 : index
    %90 = vector.load %arg6[%c168, %c0_44] : memref<196x128xbf16, #tpu.memory_space<vmem>>, vector<4x128xbf16>
    tpu.vector_store %arg6[%c168, %c0_44], %89 {strides = array<i32>} : memref<196x128xbf16, #tpu.memory_space<vmem>>, vector<4x128xbf16>,
    %91 = vector.extract_strided_slice %4 {offsets = [0, 43], sizes = [4, 128], strides = [1, 1]} : vector<4x256xbf16> to vector<4x128xbf16>
    %c172 = arith.constant 172 : index
    %c0_45 = arith.constant 0 : index
    %92 = vector.load %arg6[%c172, %c0_45] : memref<196x128xbf16, #tpu.memory_space<vmem>>, vector<4x128xbf16>
    tpu.vector_store %arg6[%c172, %c0_45], %91 {strides = array<i32>} : memref<196x128xbf16, #tpu.memory_space<vmem>>, vector<4x128xbf16>,
    %93 = vector.extract_strided_slice %4 {offsets = [0, 44], sizes = [4, 128], strides = [1, 1]} : vector<4x256xbf16> to vector<4x128xbf16>
    %c176 = arith.constant 176 : index
    %c0_46 = arith.constant 0 : index
    %94 = vector.load %arg6[%c176, %c0_46] : memref<196x128xbf16, #tpu.memory_space<vmem>>, vector<4x128xbf16>
    tpu.vector_store %arg6[%c176, %c0_46], %93 {strides = array<i32>} : memref<196x128xbf16, #tpu.memory_space<vmem>>, vector<4x128xbf16>,
    %95 = vector.extract_strided_slice %4 {offsets = [0, 45], sizes = [4, 128], strides = [1, 1]} : vector<4x256xbf16> to vector<4x128xbf16>
    %c180 = arith.constant 180 : index
    %c0_47 = arith.constant 0 : index
    %96 = vector.load %arg6[%c180, %c0_47] : memref<196x128xbf16, #tpu.memory_space<vmem>>, vector<4x128xbf16>
    tpu.vector_store %arg6[%c180, %c0_47], %95 {strides = array<i32>} : memref<196x128xbf16, #tpu.memory_space<vmem>>, vector<4x128xbf16>,
    %97 = vector.extract_strided_slice %4 {offsets = [0, 46], sizes = [4, 128], strides = [1, 1]} : vector<4x256xbf16> to vector<4x128xbf16>
    %c184 = arith.constant 184 : index
    %c0_48 = arith.constant 0 : index
    %98 = vector.load %arg6[%c184, %c0_48] : memref<196x128xbf16, #tpu.memory_space<vmem>>, vector<4x128xbf16>
    tpu.vector_store %arg6[%c184, %c0_48], %97 {strides = array<i32>} : memref<196x128xbf16, #tpu.memory_space<vmem>>, vector<4x128xbf16>,
    %99 = vector.extract_strided_slice %4 {offsets = [0, 47], sizes = [4, 128], strides = [1, 1]} : vector<4x256xbf16> to vector<4x128xbf16>
    %c188 = arith.constant 188 : index
    %c0_49 = arith.constant 0 : index
    %100 = vector.load %arg6[%c188, %c0_49] : memref<196x128xbf16, #tpu.memory_space<vmem>>, vector<4x128xbf16>
    tpu.vector_store %arg6[%c188, %c0_49], %99 {strides = array<i32>} : memref<196x128xbf16, #tpu.memory_space<vmem>>, vector<4x128xbf16>,
    %101 = vector.extract_strided_slice %4 {offsets = [0, 48], sizes = [4, 128], strides = [1, 1]} : vector<4x256xbf16> to vector<4x128xbf16>
    %c192 = arith.constant 192 : index
    %c0_50 = arith.constant 0 : index
    %102 = vector.load %arg6[%c192, %c0_50] : memref<196x128xbf16, #tpu.memory_space<vmem>>, vector<4x128xbf16>
    tpu.vector_store %arg6[%c192, %c0_50], %101 {strides = array<i32>} : memref<196x128xbf16, #tpu.memory_space<vmem>>, vector<4x128xbf16>,
    %c0_51 = arith.constant 0 : index
    %c0_52 = arith.constant 0 : index
    %103 = vector.load %arg3[%c0_51, %c0_52] : memref<8x196xbf16, #tpu.memory_space<vmem>>, vector<8x196xbf16>
    %c0_53 = arith.constant 0 : index
    %c0_54 = arith.constant 0 : index
    %104 = vector.load %arg6[%c0_53, %c0_54] : memref<196x128xbf16, #tpu.memory_space<vmem>>, vector<196x128xbf16>
    %cst = arith.constant dense<0.000000e+00> : vector<8x128xf32>
    %105 = tpu.matmul %103, %104, %cst {dimension_numbers = #tpu.dot_dimension_numbers<[1], [0], [0], [1], [0, 0, 1, 1], [], []>} : vector<8x196xbf16>, vector<196x128xbf16>, vector<8x128xf32> -> vector<8x128xf32>
    %c0_55 = arith.constant 0 : index
    %c0_56 = arith.constant 0 : index
    %106 = vector.load %arg4[%c0_55, %c0_56] : memref<8x1xf32, #tpu.memory_space<vmem>>, vector<8x1xf32>
    %107 = vector.broadcast %106 : vector<8x1xf32> to vector<8x128xf32>
    %108 = arith.addf %105, %107 : vector<8x128xf32>
    %cst_57 = arith.constant 0.000000e+00 : f32
    %109 = vector.broadcast %cst_57 : f32 to vector<8x128xf32>
    %110 = arith.maximumf %108, %109 : vector<8x128xf32>
    %c0_58 = arith.constant 0 : index
    %c0_59 = arith.constant 0 : index
    %c0_60 = arith.constant 0 : index
    %111 = vector.load %arg5[%c0_58, %c0_59, %c0_60] : memref<1x8x128xf32, #tpu.memory_space<vmem>>, vector<1x8x128xf32>
    %112 = vector.shape_cast %111 : vector<1x8x128xf32> to vector<8x128xf32>
    %113 = vector.shape_cast %110 : vector<8x128xf32> to vector<1x8x128xf32>
    tpu.vector_store %arg5[%c0_58, %c0_59, %c0_60], %113 {strides = array<i32>} : memref<1x8x128xf32, #tpu.memory_space<vmem>>, vector<1x8x128xf32>,
    return
  }
  func.func @transform_0(%arg0: i32, %arg1: i32) -> (i32, i32, i32) {
    %c0_i32 = arith.constant 0 : i32
    %c0_i32_0 = arith.constant 0 : i32
    %c0_i32_1 = arith.constant 0 : i32
    return %arg0, %c0_i32, %c0_i32_0 : i32, i32, i32
  }
  func.func @transform_1(%arg0: i32, %arg1: i32) -> (i32, i32) {
    %c0_i32 = arith.constant 0 : i32
    %c0_i32_0 = arith.constant 0 : i32
    %c0_i32_1 = arith.constant 0 : i32
    return %c0_i32, %c0_i32_0 : i32, i32
  }
  func.func @transform_2(%arg0: i32, %arg1: i32) -> (i32, i32) {
    %c0_i32 = arith.constant 0 : i32
    %c0_i32_0 = arith.constant 0 : i32
    %c0_i32_1 = arith.constant 0 : i32
    return %c0_i32, %c0_i32_0 : i32, i32
  }
  func.func @transform_3(%arg0: i32, %arg1: i32) -> (i32, i32, i32) {
    %c0_i32 = arith.constant 0 : i32
    %c0_i32_0 = arith.constant 0 : i32
    return %arg0, %c0_i32, %arg1 : i32, i32, i32
  }
}

module attributes {stable_mosaic.version = 11 : i64} {
  func.func @kernel(%arg0: i32, %arg1: i32, %arg2: memref<1x16x256xbf16, #tpu.memory_space<vmem>>, %arg3: memref<8x784xbf16, #tpu.memory_space<vmem>>, %arg4: memref<8x1xf32, #tpu.memory_space<vmem>>, %arg5: memref<1x8x128xf32, #tpu.memory_space<vmem>>, %arg6: memref<784x128xbf16, #tpu.memory_space<vmem>>) attributes {dimension_semantics = [#tpu.dimension_semantics<parallel>, #tpu.dimension_semantics<parallel>], iteration_bounds = array<i64: 2, 1>, scalar_prefetch = 0 : i64, scratch_operands = 1 : i64, tpu.core_type = #tpu.core_type<tc>, window_params = [{transform_indices = @transform_0, window_bounds = array<i64: 1, 16, 256>}, {pipeline_mode = #tpu.pipeline_mode<synchronous>, transform_indices = @transform_1, window_bounds = array<i64: 8, 784>}, {pipeline_mode = #tpu.pipeline_mode<synchronous>, transform_indices = @transform_2, window_bounds = array<i64: 8, 1>}, {transform_indices = @transform_3, window_bounds = array<i64: 1, 8, 128>}]} {
    %c128_i32 = arith.constant 128 : i32
    %0 = arith.muli %arg1, %c128_i32 : i32
    %1 = tpu.assume_multiple %0, 128 : i32
    %c0 = arith.constant 0 : index
    %c0_0 = arith.constant 0 : index
    %2 = arith.index_cast %1 : i32 to index
    %3 = vector.load %arg2[%c0, %c0_0, %2] : memref<1x16x256xbf16, #tpu.memory_space<vmem>>, vector<1x16x256xbf16>
    %4 = vector.shape_cast %3 : vector<1x16x256xbf16> to vector<16x256xbf16>
    %5 = vector.extract_strided_slice %4 {offsets = [0, 0], sizes = [16, 128], strides = [1, 1]} : vector<16x256xbf16> to vector<16x128xbf16>
    %c0_1 = arith.constant 0 : index
    %c0_2 = arith.constant 0 : index
    %6 = vector.load %arg6[%c0_1, %c0_2] : memref<784x128xbf16, #tpu.memory_space<vmem>>, vector<16x128xbf16>
    tpu.vector_store %arg6[%c0_1, %c0_2], %5 {strides = array<i32>} : memref<784x128xbf16, #tpu.memory_space<vmem>>, vector<16x128xbf16>,
    %7 = vector.extract_strided_slice %4 {offsets = [0, 1], sizes = [16, 128], strides = [1, 1]} : vector<16x256xbf16> to vector<16x128xbf16>
    %c16 = arith.constant 16 : index
    %c0_3 = arith.constant 0 : index
    %8 = vector.load %arg6[%c16, %c0_3] : memref<784x128xbf16, #tpu.memory_space<vmem>>, vector<16x128xbf16>
    tpu.vector_store %arg6[%c16, %c0_3], %7 {strides = array<i32>} : memref<784x128xbf16, #tpu.memory_space<vmem>>, vector<16x128xbf16>,
    %9 = vector.extract_strided_slice %4 {offsets = [0, 2], sizes = [16, 128], strides = [1, 1]} : vector<16x256xbf16> to vector<16x128xbf16>
    %c32 = arith.constant 32 : index
    %c0_4 = arith.constant 0 : index
    %10 = vector.load %arg6[%c32, %c0_4] : memref<784x128xbf16, #tpu.memory_space<vmem>>, vector<16x128xbf16>
    tpu.vector_store %arg6[%c32, %c0_4], %9 {strides = array<i32>} : memref<784x128xbf16, #tpu.memory_space<vmem>>, vector<16x128xbf16>,
    %11 = vector.extract_strided_slice %4 {offsets = [0, 3], sizes = [16, 128], strides = [1, 1]} : vector<16x256xbf16> to vector<16x128xbf16>
    %c48 = arith.constant 48 : index
    %c0_5 = arith.constant 0 : index
    %12 = vector.load %arg6[%c48, %c0_5] : memref<784x128xbf16, #tpu.memory_space<vmem>>, vector<16x128xbf16>
    tpu.vector_store %arg6[%c48, %c0_5], %11 {strides = array<i32>} : memref<784x128xbf16, #tpu.memory_space<vmem>>, vector<16x128xbf16>,
    %13 = vector.extract_strided_slice %4 {offsets = [0, 4], sizes = [16, 128], strides = [1, 1]} : vector<16x256xbf16> to vector<16x128xbf16>
    %c64 = arith.constant 64 : index
    %c0_6 = arith.constant 0 : index
    %14 = vector.load %arg6[%c64, %c0_6] : memref<784x128xbf16, #tpu.memory_space<vmem>>, vector<16x128xbf16>
    tpu.vector_store %arg6[%c64, %c0_6], %13 {strides = array<i32>} : memref<784x128xbf16, #tpu.memory_space<vmem>>, vector<16x128xbf16>,
    %15 = vector.extract_strided_slice %4 {offsets = [0, 5], sizes = [16, 128], strides = [1, 1]} : vector<16x256xbf16> to vector<16x128xbf16>
    %c80 = arith.constant 80 : index
    %c0_7 = arith.constant 0 : index
    %16 = vector.load %arg6[%c80, %c0_7] : memref<784x128xbf16, #tpu.memory_space<vmem>>, vector<16x128xbf16>
    tpu.vector_store %arg6[%c80, %c0_7], %15 {strides = array<i32>} : memref<784x128xbf16, #tpu.memory_space<vmem>>, vector<16x128xbf16>,
    %17 = vector.extract_strided_slice %4 {offsets = [0, 6], sizes = [16, 128], strides = [1, 1]} : vector<16x256xbf16> to vector<16x128xbf16>
    %c96 = arith.constant 96 : index
    %c0_8 = arith.constant 0 : index
    %18 = vector.load %arg6[%c96, %c0_8] : memref<784x128xbf16, #tpu.memory_space<vmem>>, vector<16x128xbf16>
    tpu.vector_store %arg6[%c96, %c0_8], %17 {strides = array<i32>} : memref<784x128xbf16, #tpu.memory_space<vmem>>, vector<16x128xbf16>,
    %19 = vector.extract_strided_slice %4 {offsets = [0, 7], sizes = [16, 128], strides = [1, 1]} : vector<16x256xbf16> to vector<16x128xbf16>
    %c112 = arith.constant 112 : index
    %c0_9 = arith.constant 0 : index
    %20 = vector.load %arg6[%c112, %c0_9] : memref<784x128xbf16, #tpu.memory_space<vmem>>, vector<16x128xbf16>
    tpu.vector_store %arg6[%c112, %c0_9], %19 {strides = array<i32>} : memref<784x128xbf16, #tpu.memory_space<vmem>>, vector<16x128xbf16>,
    %21 = vector.extract_strided_slice %4 {offsets = [0, 8], sizes = [16, 128], strides = [1, 1]} : vector<16x256xbf16> to vector<16x128xbf16>
    %c128 = arith.constant 128 : index
    %c0_10 = arith.constant 0 : index
    %22 = vector.load %arg6[%c128, %c0_10] : memref<784x128xbf16, #tpu.memory_space<vmem>>, vector<16x128xbf16>
    tpu.vector_store %arg6[%c128, %c0_10], %21 {strides = array<i32>} : memref<784x128xbf16, #tpu.memory_space<vmem>>, vector<16x128xbf16>,
    %23 = vector.extract_strided_slice %4 {offsets = [0, 9], sizes = [16, 128], strides = [1, 1]} : vector<16x256xbf16> to vector<16x128xbf16>
    %c144 = arith.constant 144 : index
    %c0_11 = arith.constant 0 : index
    %24 = vector.load %arg6[%c144, %c0_11] : memref<784x128xbf16, #tpu.memory_space<vmem>>, vector<16x128xbf16>
    tpu.vector_store %arg6[%c144, %c0_11], %23 {strides = array<i32>} : memref<784x128xbf16, #tpu.memory_space<vmem>>, vector<16x128xbf16>,
    %25 = vector.extract_strided_slice %4 {offsets = [0, 10], sizes = [16, 128], strides = [1, 1]} : vector<16x256xbf16> to vector<16x128xbf16>
    %c160 = arith.constant 160 : index
    %c0_12 = arith.constant 0 : index
    %26 = vector.load %arg6[%c160, %c0_12] : memref<784x128xbf16, #tpu.memory_space<vmem>>, vector<16x128xbf16>
    tpu.vector_store %arg6[%c160, %c0_12], %25 {strides = array<i32>} : memref<784x128xbf16, #tpu.memory_space<vmem>>, vector<16x128xbf16>,
    %27 = vector.extract_strided_slice %4 {offsets = [0, 11], sizes = [16, 128], strides = [1, 1]} : vector<16x256xbf16> to vector<16x128xbf16>
    %c176 = arith.constant 176 : index
    %c0_13 = arith.constant 0 : index
    %28 = vector.load %arg6[%c176, %c0_13] : memref<784x128xbf16, #tpu.memory_space<vmem>>, vector<16x128xbf16>
    tpu.vector_store %arg6[%c176, %c0_13], %27 {strides = array<i32>} : memref<784x128xbf16, #tpu.memory_space<vmem>>, vector<16x128xbf16>,
    %29 = vector.extract_strided_slice %4 {offsets = [0, 12], sizes = [16, 128], strides = [1, 1]} : vector<16x256xbf16> to vector<16x128xbf16>
    %c192 = arith.constant 192 : index
    %c0_14 = arith.constant 0 : index
    %30 = vector.load %arg6[%c192, %c0_14] : memref<784x128xbf16, #tpu.memory_space<vmem>>, vector<16x128xbf16>
    tpu.vector_store %arg6[%c192, %c0_14], %29 {strides = array<i32>} : memref<784x128xbf16, #tpu.memory_space<vmem>>, vector<16x128xbf16>,
    %31 = vector.extract_strided_slice %4 {offsets = [0, 13], sizes = [16, 128], strides = [1, 1]} : vector<16x256xbf16> to vector<16x128xbf16>
    %c208 = arith.constant 208 : index
    %c0_15 = arith.constant 0 : index
    %32 = vector.load %arg6[%c208, %c0_15] : memref<784x128xbf16, #tpu.memory_space<vmem>>, vector<16x128xbf16>
    tpu.vector_store %arg6[%c208, %c0_15], %31 {strides = array<i32>} : memref<784x128xbf16, #tpu.memory_space<vmem>>, vector<16x128xbf16>,
    %33 = vector.extract_strided_slice %4 {offsets = [0, 14], sizes = [16, 128], strides = [1, 1]} : vector<16x256xbf16> to vector<16x128xbf16>
    %c224 = arith.constant 224 : index
    %c0_16 = arith.constant 0 : index
    %34 = vector.load %arg6[%c224, %c0_16] : memref<784x128xbf16, #tpu.memory_space<vmem>>, vector<16x128xbf16>
    tpu.vector_store %arg6[%c224, %c0_16], %33 {strides = array<i32>} : memref<784x128xbf16, #tpu.memory_space<vmem>>, vector<16x128xbf16>,
    %35 = vector.extract_strided_slice %4 {offsets = [0, 15], sizes = [16, 128], strides = [1, 1]} : vector<16x256xbf16> to vector<16x128xbf16>
    %c240 = arith.constant 240 : index
    %c0_17 = arith.constant 0 : index
    %36 = vector.load %arg6[%c240, %c0_17] : memref<784x128xbf16, #tpu.memory_space<vmem>>, vector<16x128xbf16>
    tpu.vector_store %arg6[%c240, %c0_17], %35 {strides = array<i32>} : memref<784x128xbf16, #tpu.memory_space<vmem>>, vector<16x128xbf16>,
    %37 = vector.extract_strided_slice %4 {offsets = [0, 16], sizes = [16, 128], strides = [1, 1]} : vector<16x256xbf16> to vector<16x128xbf16>
    %c256 = arith.constant 256 : index
    %c0_18 = arith.constant 0 : index
    %38 = vector.load %arg6[%c256, %c0_18] : memref<784x128xbf16, #tpu.memory_space<vmem>>, vector<16x128xbf16>
    tpu.vector_store %arg6[%c256, %c0_18], %37 {strides = array<i32>} : memref<784x128xbf16, #tpu.memory_space<vmem>>, vector<16x128xbf16>,
    %39 = vector.extract_strided_slice %4 {offsets = [0, 17], sizes = [16, 128], strides = [1, 1]} : vector<16x256xbf16> to vector<16x128xbf16>
    %c272 = arith.constant 272 : index
    %c0_19 = arith.constant 0 : index
    %40 = vector.load %arg6[%c272, %c0_19] : memref<784x128xbf16, #tpu.memory_space<vmem>>, vector<16x128xbf16>
    tpu.vector_store %arg6[%c272, %c0_19], %39 {strides = array<i32>} : memref<784x128xbf16, #tpu.memory_space<vmem>>, vector<16x128xbf16>,
    %41 = vector.extract_strided_slice %4 {offsets = [0, 18], sizes = [16, 128], strides = [1, 1]} : vector<16x256xbf16> to vector<16x128xbf16>
    %c288 = arith.constant 288 : index
    %c0_20 = arith.constant 0 : index
    %42 = vector.load %arg6[%c288, %c0_20] : memref<784x128xbf16, #tpu.memory_space<vmem>>, vector<16x128xbf16>
    tpu.vector_store %arg6[%c288, %c0_20], %41 {strides = array<i32>} : memref<784x128xbf16, #tpu.memory_space<vmem>>, vector<16x128xbf16>,
    %43 = vector.extract_strided_slice %4 {offsets = [0, 19], sizes = [16, 128], strides = [1, 1]} : vector<16x256xbf16> to vector<16x128xbf16>
    %c304 = arith.constant 304 : index
    %c0_21 = arith.constant 0 : index
    %44 = vector.load %arg6[%c304, %c0_21] : memref<784x128xbf16, #tpu.memory_space<vmem>>, vector<16x128xbf16>
    tpu.vector_store %arg6[%c304, %c0_21], %43 {strides = array<i32>} : memref<784x128xbf16, #tpu.memory_space<vmem>>, vector<16x128xbf16>,
    %45 = vector.extract_strided_slice %4 {offsets = [0, 20], sizes = [16, 128], strides = [1, 1]} : vector<16x256xbf16> to vector<16x128xbf16>
    %c320 = arith.constant 320 : index
    %c0_22 = arith.constant 0 : index
    %46 = vector.load %arg6[%c320, %c0_22] : memref<784x128xbf16, #tpu.memory_space<vmem>>, vector<16x128xbf16>
    tpu.vector_store %arg6[%c320, %c0_22], %45 {strides = array<i32>} : memref<784x128xbf16, #tpu.memory_space<vmem>>, vector<16x128xbf16>,
    %47 = vector.extract_strided_slice %4 {offsets = [0, 21], sizes = [16, 128], strides = [1, 1]} : vector<16x256xbf16> to vector<16x128xbf16>
    %c336 = arith.constant 336 : index
    %c0_23 = arith.constant 0 : index
    %48 = vector.load %arg6[%c336, %c0_23] : memref<784x128xbf16, #tpu.memory_space<vmem>>, vector<16x128xbf16>
    tpu.vector_store %arg6[%c336, %c0_23], %47 {strides = array<i32>} : memref<784x128xbf16, #tpu.memory_space<vmem>>, vector<16x128xbf16>,
    %49 = vector.extract_strided_slice %4 {offsets = [0, 22], sizes = [16, 128], strides = [1, 1]} : vector<16x256xbf16> to vector<16x128xbf16>
    %c352 = arith.constant 352 : index
    %c0_24 = arith.constant 0 : index
    %50 = vector.load %arg6[%c352, %c0_24] : memref<784x128xbf16, #tpu.memory_space<vmem>>, vector<16x128xbf16>
    tpu.vector_store %arg6[%c352, %c0_24], %49 {strides = array<i32>} : memref<784x128xbf16, #tpu.memory_space<vmem>>, vector<16x128xbf16>,
    %51 = vector.extract_strided_slice %4 {offsets = [0, 23], sizes = [16, 128], strides = [1, 1]} : vector<16x256xbf16> to vector<16x128xbf16>
    %c368 = arith.constant 368 : index
    %c0_25 = arith.constant 0 : index
    %52 = vector.load %arg6[%c368, %c0_25] : memref<784x128xbf16, #tpu.memory_space<vmem>>, vector<16x128xbf16>
    tpu.vector_store %arg6[%c368, %c0_25], %51 {strides = array<i32>} : memref<784x128xbf16, #tpu.memory_space<vmem>>, vector<16x128xbf16>,
    %53 = vector.extract_strided_slice %4 {offsets = [0, 24], sizes = [16, 128], strides = [1, 1]} : vector<16x256xbf16> to vector<16x128xbf16>
    %c384 = arith.constant 384 : index
    %c0_26 = arith.constant 0 : index
    %54 = vector.load %arg6[%c384, %c0_26] : memref<784x128xbf16, #tpu.memory_space<vmem>>, vector<16x128xbf16>
    tpu.vector_store %arg6[%c384, %c0_26], %53 {strides = array<i32>} : memref<784x128xbf16, #tpu.memory_space<vmem>>, vector<16x128xbf16>,
    %55 = vector.extract_strided_slice %4 {offsets = [0, 25], sizes = [16, 128], strides = [1, 1]} : vector<16x256xbf16> to vector<16x128xbf16>
    %c400 = arith.constant 400 : index
    %c0_27 = arith.constant 0 : index
    %56 = vector.load %arg6[%c400, %c0_27] : memref<784x128xbf16, #tpu.memory_space<vmem>>, vector<16x128xbf16>
    tpu.vector_store %arg6[%c400, %c0_27], %55 {strides = array<i32>} : memref<784x128xbf16, #tpu.memory_space<vmem>>, vector<16x128xbf16>,
    %57 = vector.extract_strided_slice %4 {offsets = [0, 26], sizes = [16, 128], strides = [1, 1]} : vector<16x256xbf16> to vector<16x128xbf16>
    %c416 = arith.constant 416 : index
    %c0_28 = arith.constant 0 : index
    %58 = vector.load %arg6[%c416, %c0_28] : memref<784x128xbf16, #tpu.memory_space<vmem>>, vector<16x128xbf16>
    tpu.vector_store %arg6[%c416, %c0_28], %57 {strides = array<i32>} : memref<784x128xbf16, #tpu.memory_space<vmem>>, vector<16x128xbf16>,
    %59 = vector.extract_strided_slice %4 {offsets = [0, 27], sizes = [16, 128], strides = [1, 1]} : vector<16x256xbf16> to vector<16x128xbf16>
    %c432 = arith.constant 432 : index
    %c0_29 = arith.constant 0 : index
    %60 = vector.load %arg6[%c432, %c0_29] : memref<784x128xbf16, #tpu.memory_space<vmem>>, vector<16x128xbf16>
    tpu.vector_store %arg6[%c432, %c0_29], %59 {strides = array<i32>} : memref<784x128xbf16, #tpu.memory_space<vmem>>, vector<16x128xbf16>,
    %61 = vector.extract_strided_slice %4 {offsets = [0, 28], sizes = [16, 128], strides = [1, 1]} : vector<16x256xbf16> to vector<16x128xbf16>
    %c448 = arith.constant 448 : index
    %c0_30 = arith.constant 0 : index
    %62 = vector.load %arg6[%c448, %c0_30] : memref<784x128xbf16, #tpu.memory_space<vmem>>, vector<16x128xbf16>
    tpu.vector_store %arg6[%c448, %c0_30], %61 {strides = array<i32>} : memref<784x128xbf16, #tpu.memory_space<vmem>>, vector<16x128xbf16>,
    %63 = vector.extract_strided_slice %4 {offsets = [0, 29], sizes = [16, 128], strides = [1, 1]} : vector<16x256xbf16> to vector<16x128xbf16>
    %c464 = arith.constant 464 : index
    %c0_31 = arith.constant 0 : index
    %64 = vector.load %arg6[%c464, %c0_31] : memref<784x128xbf16, #tpu.memory_space<vmem>>, vector<16x128xbf16>
    tpu.vector_store %arg6[%c464, %c0_31], %63 {strides = array<i32>} : memref<784x128xbf16, #tpu.memory_space<vmem>>, vector<16x128xbf16>,
    %65 = vector.extract_strided_slice %4 {offsets = [0, 30], sizes = [16, 128], strides = [1, 1]} : vector<16x256xbf16> to vector<16x128xbf16>
    %c480 = arith.constant 480 : index
    %c0_32 = arith.constant 0 : index
    %66 = vector.load %arg6[%c480, %c0_32] : memref<784x128xbf16, #tpu.memory_space<vmem>>, vector<16x128xbf16>
    tpu.vector_store %arg6[%c480, %c0_32], %65 {strides = array<i32>} : memref<784x128xbf16, #tpu.memory_space<vmem>>, vector<16x128xbf16>,
    %67 = vector.extract_strided_slice %4 {offsets = [0, 31], sizes = [16, 128], strides = [1, 1]} : vector<16x256xbf16> to vector<16x128xbf16>
    %c496 = arith.constant 496 : index
    %c0_33 = arith.constant 0 : index
    %68 = vector.load %arg6[%c496, %c0_33] : memref<784x128xbf16, #tpu.memory_space<vmem>>, vector<16x128xbf16>
    tpu.vector_store %arg6[%c496, %c0_33], %67 {strides = array<i32>} : memref<784x128xbf16, #tpu.memory_space<vmem>>, vector<16x128xbf16>,
    %69 = vector.extract_strided_slice %4 {offsets = [0, 32], sizes = [16, 128], strides = [1, 1]} : vector<16x256xbf16> to vector<16x128xbf16>
    %c512 = arith.constant 512 : index
    %c0_34 = arith.constant 0 : index
    %70 = vector.load %arg6[%c512, %c0_34] : memref<784x128xbf16, #tpu.memory_space<vmem>>, vector<16x128xbf16>
    tpu.vector_store %arg6[%c512, %c0_34], %69 {strides = array<i32>} : memref<784x128xbf16, #tpu.memory_space<vmem>>, vector<16x128xbf16>,
    %71 = vector.extract_strided_slice %4 {offsets = [0, 33], sizes = [16, 128], strides = [1, 1]} : vector<16x256xbf16> to vector<16x128xbf16>
    %c528 = arith.constant 528 : index
    %c0_35 = arith.constant 0 : index
    %72 = vector.load %arg6[%c528, %c0_35] : memref<784x128xbf16, #tpu.memory_space<vmem>>, vector<16x128xbf16>
    tpu.vector_store %arg6[%c528, %c0_35], %71 {strides = array<i32>} : memref<784x128xbf16, #tpu.memory_space<vmem>>, vector<16x128xbf16>,
    %73 = vector.extract_strided_slice %4 {offsets = [0, 34], sizes = [16, 128], strides = [1, 1]} : vector<16x256xbf16> to vector<16x128xbf16>
    %c544 = arith.constant 544 : index
    %c0_36 = arith.constant 0 : index
    %74 = vector.load %arg6[%c544, %c0_36] : memref<784x128xbf16, #tpu.memory_space<vmem>>, vector<16x128xbf16>
    tpu.vector_store %arg6[%c544, %c0_36], %73 {strides = array<i32>} : memref<784x128xbf16, #tpu.memory_space<vmem>>, vector<16x128xbf16>,
    %75 = vector.extract_strided_slice %4 {offsets = [0, 35], sizes = [16, 128], strides = [1, 1]} : vector<16x256xbf16> to vector<16x128xbf16>
    %c560 = arith.constant 560 : index
    %c0_37 = arith.constant 0 : index
    %76 = vector.load %arg6[%c560, %c0_37] : memref<784x128xbf16, #tpu.memory_space<vmem>>, vector<16x128xbf16>
    tpu.vector_store %arg6[%c560, %c0_37], %75 {strides = array<i32>} : memref<784x128xbf16, #tpu.memory_space<vmem>>, vector<16x128xbf16>,
    %77 = vector.extract_strided_slice %4 {offsets = [0, 36], sizes = [16, 128], strides = [1, 1]} : vector<16x256xbf16> to vector<16x128xbf16>
    %c576 = arith.constant 576 : index
    %c0_38 = arith.constant 0 : index
    %78 = vector.load %arg6[%c576, %c0_38] : memref<784x128xbf16, #tpu.memory_space<vmem>>, vector<16x128xbf16>
    tpu.vector_store %arg6[%c576, %c0_38], %77 {strides = array<i32>} : memref<784x128xbf16, #tpu.memory_space<vmem>>, vector<16x128xbf16>,
    %79 = vector.extract_strided_slice %4 {offsets = [0, 37], sizes = [16, 128], strides = [1, 1]} : vector<16x256xbf16> to vector<16x128xbf16>
    %c592 = arith.constant 592 : index
    %c0_39 = arith.constant 0 : index
    %80 = vector.load %arg6[%c592, %c0_39] : memref<784x128xbf16, #tpu.memory_space<vmem>>, vector<16x128xbf16>
    tpu.vector_store %arg6[%c592, %c0_39], %79 {strides = array<i32>} : memref<784x128xbf16, #tpu.memory_space<vmem>>, vector<16x128xbf16>,
    %81 = vector.extract_strided_slice %4 {offsets = [0, 38], sizes = [16, 128], strides = [1, 1]} : vector<16x256xbf16> to vector<16x128xbf16>
    %c608 = arith.constant 608 : index
    %c0_40 = arith.constant 0 : index
    %82 = vector.load %arg6[%c608, %c0_40] : memref<784x128xbf16, #tpu.memory_space<vmem>>, vector<16x128xbf16>
    tpu.vector_store %arg6[%c608, %c0_40], %81 {strides = array<i32>} : memref<784x128xbf16, #tpu.memory_space<vmem>>, vector<16x128xbf16>,
    %83 = vector.extract_strided_slice %4 {offsets = [0, 39], sizes = [16, 128], strides = [1, 1]} : vector<16x256xbf16> to vector<16x128xbf16>
    %c624 = arith.constant 624 : index
    %c0_41 = arith.constant 0 : index
    %84 = vector.load %arg6[%c624, %c0_41] : memref<784x128xbf16, #tpu.memory_space<vmem>>, vector<16x128xbf16>
    tpu.vector_store %arg6[%c624, %c0_41], %83 {strides = array<i32>} : memref<784x128xbf16, #tpu.memory_space<vmem>>, vector<16x128xbf16>,
    %85 = vector.extract_strided_slice %4 {offsets = [0, 40], sizes = [16, 128], strides = [1, 1]} : vector<16x256xbf16> to vector<16x128xbf16>
    %c640 = arith.constant 640 : index
    %c0_42 = arith.constant 0 : index
    %86 = vector.load %arg6[%c640, %c0_42] : memref<784x128xbf16, #tpu.memory_space<vmem>>, vector<16x128xbf16>
    tpu.vector_store %arg6[%c640, %c0_42], %85 {strides = array<i32>} : memref<784x128xbf16, #tpu.memory_space<vmem>>, vector<16x128xbf16>,
    %87 = vector.extract_strided_slice %4 {offsets = [0, 41], sizes = [16, 128], strides = [1, 1]} : vector<16x256xbf16> to vector<16x128xbf16>
    %c656 = arith.constant 656 : index
    %c0_43 = arith.constant 0 : index
    %88 = vector.load %arg6[%c656, %c0_43] : memref<784x128xbf16, #tpu.memory_space<vmem>>, vector<16x128xbf16>
    tpu.vector_store %arg6[%c656, %c0_43], %87 {strides = array<i32>} : memref<784x128xbf16, #tpu.memory_space<vmem>>, vector<16x128xbf16>,
    %89 = vector.extract_strided_slice %4 {offsets = [0, 42], sizes = [16, 128], strides = [1, 1]} : vector<16x256xbf16> to vector<16x128xbf16>
    %c672 = arith.constant 672 : index
    %c0_44 = arith.constant 0 : index
    %90 = vector.load %arg6[%c672, %c0_44] : memref<784x128xbf16, #tpu.memory_space<vmem>>, vector<16x128xbf16>
    tpu.vector_store %arg6[%c672, %c0_44], %89 {strides = array<i32>} : memref<784x128xbf16, #tpu.memory_space<vmem>>, vector<16x128xbf16>,
    %91 = vector.extract_strided_slice %4 {offsets = [0, 43], sizes = [16, 128], strides = [1, 1]} : vector<16x256xbf16> to vector<16x128xbf16>
    %c688 = arith.constant 688 : index
    %c0_45 = arith.constant 0 : index
    %92 = vector.load %arg6[%c688, %c0_45] : memref<784x128xbf16, #tpu.memory_space<vmem>>, vector<16x128xbf16>
    tpu.vector_store %arg6[%c688, %c0_45], %91 {strides = array<i32>} : memref<784x128xbf16, #tpu.memory_space<vmem>>, vector<16x128xbf16>,
    %93 = vector.extract_strided_slice %4 {offsets = [0, 44], sizes = [16, 128], strides = [1, 1]} : vector<16x256xbf16> to vector<16x128xbf16>
    %c704 = arith.constant 704 : index
    %c0_46 = arith.constant 0 : index
    %94 = vector.load %arg6[%c704, %c0_46] : memref<784x128xbf16, #tpu.memory_space<vmem>>, vector<16x128xbf16>
    tpu.vector_store %arg6[%c704, %c0_46], %93 {strides = array<i32>} : memref<784x128xbf16, #tpu.memory_space<vmem>>, vector<16x128xbf16>,
    %95 = vector.extract_strided_slice %4 {offsets = [0, 45], sizes = [16, 128], strides = [1, 1]} : vector<16x256xbf16> to vector<16x128xbf16>
    %c720 = arith.constant 720 : index
    %c0_47 = arith.constant 0 : index
    %96 = vector.load %arg6[%c720, %c0_47] : memref<784x128xbf16, #tpu.memory_space<vmem>>, vector<16x128xbf16>
    tpu.vector_store %arg6[%c720, %c0_47], %95 {strides = array<i32>} : memref<784x128xbf16, #tpu.memory_space<vmem>>, vector<16x128xbf16>,
    %97 = vector.extract_strided_slice %4 {offsets = [0, 46], sizes = [16, 128], strides = [1, 1]} : vector<16x256xbf16> to vector<16x128xbf16>
    %c736 = arith.constant 736 : index
    %c0_48 = arith.constant 0 : index
    %98 = vector.load %arg6[%c736, %c0_48] : memref<784x128xbf16, #tpu.memory_space<vmem>>, vector<16x128xbf16>
    tpu.vector_store %arg6[%c736, %c0_48], %97 {strides = array<i32>} : memref<784x128xbf16, #tpu.memory_space<vmem>>, vector<16x128xbf16>,
    %99 = vector.extract_strided_slice %4 {offsets = [0, 47], sizes = [16, 128], strides = [1, 1]} : vector<16x256xbf16> to vector<16x128xbf16>
    %c752 = arith.constant 752 : index
    %c0_49 = arith.constant 0 : index
    %100 = vector.load %arg6[%c752, %c0_49] : memref<784x128xbf16, #tpu.memory_space<vmem>>, vector<16x128xbf16>
    tpu.vector_store %arg6[%c752, %c0_49], %99 {strides = array<i32>} : memref<784x128xbf16, #tpu.memory_space<vmem>>, vector<16x128xbf16>,
    %101 = vector.extract_strided_slice %4 {offsets = [0, 48], sizes = [16, 128], strides = [1, 1]} : vector<16x256xbf16> to vector<16x128xbf16>
    %c768 = arith.constant 768 : index
    %c0_50 = arith.constant 0 : index
    %102 = vector.load %arg6[%c768, %c0_50] : memref<784x128xbf16, #tpu.memory_space<vmem>>, vector<16x128xbf16>
    tpu.vector_store %arg6[%c768, %c0_50], %101 {strides = array<i32>} : memref<784x128xbf16, #tpu.memory_space<vmem>>, vector<16x128xbf16>,
    %c0_51 = arith.constant 0 : index
    %c0_52 = arith.constant 0 : index
    %103 = vector.load %arg3[%c0_51, %c0_52] : memref<8x784xbf16, #tpu.memory_space<vmem>>, vector<8x784xbf16>
    %c0_53 = arith.constant 0 : index
    %c0_54 = arith.constant 0 : index
    %104 = vector.load %arg6[%c0_53, %c0_54] : memref<784x128xbf16, #tpu.memory_space<vmem>>, vector<784x128xbf16>
    %cst = arith.constant dense<0.000000e+00> : vector<8x128xf32>
    %105 = tpu.matmul %103, %104, %cst {dimension_numbers = #tpu.dot_dimension_numbers<[1], [0], [0], [1], [0, 0, 1, 1], [], []>} : vector<8x784xbf16>, vector<784x128xbf16>, vector<8x128xf32> -> vector<8x128xf32>
    %c0_55 = arith.constant 0 : index
    %c0_56 = arith.constant 0 : index
    %106 = vector.load %arg4[%c0_55, %c0_56] : memref<8x1xf32, #tpu.memory_space<vmem>>, vector<8x1xf32>
    %107 = vector.broadcast %106 : vector<8x1xf32> to vector<8x128xf32>
    %108 = arith.addf %105, %107 : vector<8x128xf32>
    %cst_57 = arith.constant 0.000000e+00 : f32
    %109 = vector.broadcast %cst_57 : f32 to vector<8x128xf32>
    %110 = arith.maximumf %108, %109 : vector<8x128xf32>
    %c0_58 = arith.constant 0 : index
    %c0_59 = arith.constant 0 : index
    %c0_60 = arith.constant 0 : index
    %111 = vector.load %arg5[%c0_58, %c0_59, %c0_60] : memref<1x8x128xf32, #tpu.memory_space<vmem>>, vector<1x8x128xf32>
    %112 = vector.shape_cast %111 : vector<1x8x128xf32> to vector<8x128xf32>
    %113 = vector.shape_cast %110 : vector<8x128xf32> to vector<1x8x128xf32>
    tpu.vector_store %arg5[%c0_58, %c0_59, %c0_60], %113 {strides = array<i32>} : memref<1x8x128xf32, #tpu.memory_space<vmem>>, vector<1x8x128xf32>,
    return
  }
  func.func @transform_0(%arg0: i32, %arg1: i32) -> (i32, i32, i32) {
    %c0_i32 = arith.constant 0 : i32
    %c0_i32_0 = arith.constant 0 : i32
    %c0_i32_1 = arith.constant 0 : i32
    return %arg0, %c0_i32, %c0_i32_0 : i32, i32, i32
  }
  func.func @transform_1(%arg0: i32, %arg1: i32) -> (i32, i32) {
    %c0_i32 = arith.constant 0 : i32
    %c0_i32_0 = arith.constant 0 : i32
    %c0_i32_1 = arith.constant 0 : i32
    return %c0_i32, %c0_i32_0 : i32, i32
  }
  func.func @transform_2(%arg0: i32, %arg1: i32) -> (i32, i32) {
    %c0_i32 = arith.constant 0 : i32
    %c0_i32_0 = arith.constant 0 : i32
    %c0_i32_1 = arith.constant 0 : i32
    return %c0_i32, %c0_i32_0 : i32, i32
  }
  func.func @transform_3(%arg0: i32, %arg1: i32) -> (i32, i32, i32) {
    %c0_i32 = arith.constant 0 : i32
    %c0_i32_0 = arith.constant 0 : i32
    return %arg0, %c0_i32, %arg1 : i32, i32, i32
  }
}

</mosaic_0001>

<bundles_post_ra>
// kernel: tpu_custom_call.1
= control target key start
LH: loop header
LB: loop body
LE: loop exit
PB: predicated region body
PF: predicated region fallthrough
CT: control target
= control target key end

     0   :  { %7 = vsyncpa [#allocation3], 0  ;;  %s649_s0 = inlined_call_operand.hbm [shape: f32[16,128], index: 0, kind: input, shape index: {}]   ;;  %s650_s1 = inlined_call_operand.hbm [shape: f32[8,128], index: 1, kind: input, shape index: {}]   ;;  %s651_s2 = inlined_call_operand.hbm [shape: f32[16,128], index: 2, kind: output, shape index: {}]  }
   0x1   :  { %9 = vsyncpa [#allocation3 + $0x1], 0 }
   0x2   :  { %10 = vsyncpa [#allocation6], 0 }
   0x3   :  { %11 = vsyncpa [#allocation4], 0 }
   0x4   :  { %13 = vsyncpa [#allocation4 + $0x1], 0  ;;  %s483_s9 = smov 0   ;;  %s485_s10 = smov 0  }
   0x5   :  { %s487_s11 = smov 0   ;;  %s489_s12 = smov 0  }
   0x6 LB: > { %s504_s13 = sadd.s32 4294967295, %s463_s12   ;;  %s270_s14 = sadd.s32 4294967294, %s463_s12   ;;  %s463_s12 = sphi %s489_s12, %s674_s12   ;;  %s459_s11 = sphi %s487_s11, %s673_s11   ;;  %s455_s10 = sphi %s485_s10, %s672_s10   ;;  %s451_s9 = sphi %s483_s9, %s671_s9  }
   0x7   : > { %p39_p0 = scmp.ne.s32.totalorder %s455_s10, %s451_s9  ;;  %p652_p1 = scmp.eq.s32.totalorder %s504_s13, 0 }
   0x8   : > { %p90_p3 = scmp.eq.s32.totalorder %s270_s14, 1  ;;  %p271_p5 = scmp.ge.s32.totalorder %s463_s12, 1 }
   0x9   : > { %p513_p4 = por %p652_p1, %p39_p0  ;;  %p97_p7 = scmp.lt.s32.totalorder %s463_s12, 3 }
   0xa   : > { %p518_p6 = por %p90_p3, %p39_p0  ;;  %s465_s18 = smov [#allocation5]  }
   0xb   : > { %s656_s15 = scalar_select %p513_p4, 1, 0 }
   0xc   : > { %s657_s16 = scalar_select %p518_p6, 1, 0 }
   0xd   : > { %p523_p8 = pnand %p271_p5, %p97_p7  ;;  %s110_s19 = sshll.u32 %s465_s18, 4  ;;  %s111_s19 = int_to_ptr.vmem [resolvable:$true] %s110_s19 }
   0xe   : > { %s531_s20 = sadd.s32 1, %s463_s12   ;;  %s26_s24 = sadd.s32 1, %s459_s11 }
   0xf   : > { %s658_s17 = scalar_select %p523_p8, 1, 0 }
  0x10   : > { %p292_p10 = pneg %p523_p8  ;;  %s23_s22 = ssub.s32 %s463_s12, %s531_s20 }
  0x11   : > { %p541_p12 = scmp.eq.s32.totalorder %s23_s22, 0  ;;  %p33_p13 = scmp.ne.s32.totalorder %s459_s11, %s455_s10 }
  0x12   : > { %p535_p11 = pnand %p292_p10, %p652_p1  ;;  %s352_s25 = scalar_lea.vmem %s111_s19, 128 }
  0x13   : > { %p353_p3 = scmp.ne.s32.totalorder %s111_s19, %s352_s25  ;;  %p360_p9 = scmp.lt.s32.totalorder %s111_s19, %s111_s19 }
  0x14   : > { %p343_p0 = pneg %p535_p11  ;;  %p361_p2 = scmp.lt.s32.totalorder %s352_s25, %s352_s25 }
  0x16   : > { %p355_p5 = pnand %p353_p3, %p343_p0  ;;  %p362_p10 = por %p361_p2, %p360_p9 }
  0x18   : > { %p356_p7 = pneg %p355_p5 }
  0x1a   : > { %p363_p1 = pnand %p362_p10, %p356_p7 }
  0x1c   : > { %366 = shalt.err (!%p363_p1)
}
  0x1d   : > { %295 = dma.hbm_to_vmem [thread:$0]  (!%p535_p11), %s650_s1, 128, %s111_s19, [#allocation6]  }
  0x1e   : > { %s558_s28 = scalar_select %p541_p12, %s459_s11, %s26_s24  }
  0x1f   : > { %p34_p1 = scmp.eq.s32.totalorder %s463_s12, 0  ;;  %p661_p2 = scmp.eq.s32.totalorder %s504_s13, 1 }
  0x20   : > { %p305_p0 = scmp.lt.s32.totalorder %s463_s12, 2  ;;  %s121_s30 = sand.u32 1, %s459_s11  }
  0x21   : > { %p566_p9 = por %p661_p2, %p33_p13  ;;  %p35_p3 = por %p34_p1, %p33_p13 }
  0x22   : > { %s274_s3 = sshll.u32 %s121_s30, 3  ;;  %s275_s4 = sshll.u32 %s463_s12, 7 }
  0x23   : > { %s662_s29 = scalar_select %p566_p9, 1, 0 }
  0x24   : > { %s579_s7 = scalar_lea.hbm %s649_s0, %s275_s4  ;;  %s125_s8 = scalar_lea.vmem [#allocation2], %s274_s3 }
  0x25   : > { %s132_s14 = sshll.u32 %s125_s8, 4  ;;  %p581_p11 = pnand %p305_p0, %p35_p3  ;;  %s133_s14 = int_to_ptr.vmem [resolvable:$true] %s132_s14 }
  0x26   : > { %s122_s19 = scalar_lea.sflag [#allocation3], %s121_s30  ;;  %s367_s21 = scalar_lea.hbm %s579_s7, 128 }
  0x27   : > { %p368_p12 = scmp.ne.s32.totalorder %s579_s7, %s367_s21  ;;  %p369_p13 = pneg %p581_p11 }
  0x28   : > { %s372_s24 = scalar_lea.hbm %s649_s0, 256  ;;  %p373_p10 = scmp.lt.s32.totalorder %s579_s7, %s649_s0 }
  0x29   : > { %p370_p5 = pnand %p369_p13, %p368_p12  ;;  %p374_p1 = scmp.lt.s32.totalorder %s372_s24, %s367_s21 }
  0x2b   : > { %p371_p7 = pneg %p370_p5  ;;  %p375_p2 = por %p374_p1, %p373_p10 }
  0x2d   : > { %p376_p0 = pnand %p375_p2, %p371_p7 }
  0x2f   : > { %379 = shalt.err (!%p376_p0)
}
  0x30   : > { %s380_s27 = scalar_lea.vmem %s133_s14, 128  ;;  %s466_s30 = smov [#allocation2]  }
  0x31   : > { %p381_p3 = scmp.ne.s32.totalorder %s133_s14, %s380_s27  ;;  %s385_s3 = sshll.u32 %s466_s30, 4  ;;  %s386_s3 = int_to_ptr.vmem [resolvable:$false] %s385_s3 }
  0x32   : > { %s387_s4 = scalar_lea.vmem %s386_s3, 256  ;;  %p388_p12 = scmp.lt.s32.totalorder %s133_s14, %s386_s3 }
  0x33   : > { %p383_p6 = pnand %p381_p3, %p369_p13  ;;  %p389_p5 = scmp.lt.s32.totalorder %s387_s4, %s380_s27 }
  0x35   : > { %p384_p9 = pneg %p383_p6  ;;  %p390_p4 = por %p389_p5, %p388_p12 }
  0x37   : > { %p391_p8 = pnand %p390_p4, %p384_p9 }
  0x39   : > { %394 = shalt.err (!%p391_p8)
}
  0x3a   : > { %299 = dma.hbm_to_vmem [thread:$0]  (!%p581_p11), %s579_s7, 128, %s133_s14, %s122_s19  }
  0x3b   : > { %p664_p7 = scmp.ne.s32.totalorder %s658_s17, 0 }
  0x3c   : > { %s602_s5 = sand.u32 (!%p664_p7), 1, %s455_s10   ;;  %p665_p6 = scmp.ne.s32.totalorder (!%p664_p7), %s656_s15, 0 }
  0x3d   : > { %141 = sbr.rel (%p664_p7) target bundleno = 95 (0x5f), region = 28  ;;  %s277_s6 = sshll.u32 (!%p664_p7), %s602_s5, 3 }
  0x3e   : > { %s144_s8 = scalar_lea.sflag (!%p664_p7), [#allocation3], %s602_s5  ;;  %s147_s21 = scalar_lea.vmem (!%p664_p7), [#allocation2], %s277_s6 }
  0x42   : > { %438 = dma.done.wait (%p665_p6), %s144_s8, 128  }
  0x43   : > { %440 = vsyncadd (%p665_p6), %s144_s8, 4294967168  ;;  %p666_p4 = scmp.eq.s32.totalorder %s504_s13, 0 }
  0x45   : > { %442 = dma.done.wait (%p666_p4), [#allocation6], 128   ;;  %p667_p8 = pmov %p666_p4 }
  0x46   : > { %s171_s17 = scalar_lea.vmem [#allocation7], %s277_s6  ;;  %s281_s14 = sshll.u32 %s504_s13, 7  ;;  %v172_v0 = vld [vmem:[%s147_s21] sm:$0xff]  ;;  %v173_v1 = vld [vmem:[#allocation5] sm:$0xff] }
  0x47   : > { %444 = vsyncadd (%p667_p8), [#allocation6], 4294967168  ;;  %s190_s7 = sshll.u32 %s171_s17, 4  ;;  %v174_v2 = vadd.f32 %v173_v1, %v172_v0  ;;  %s188_s15 = scalar_lea.hbm %s651_s2, %s281_s14  ;;  %s191_s7 = int_to_ptr.vmem [resolvable:$true] %s190_s7 }
  0x48   : > { %s177_s22 = scalar_lea.sflag [#allocation4], %s602_s5  ;;  %s395_s23 = scalar_lea.vmem %s191_s7, 128 }
  0x49   : > { %175 = vst [vmem:[%s171_s17] sm:$0xff] %v174_v2  ;;  %p396_p9 = scmp.ne.s32.totalorder %s191_s7, %s395_s23  ;;  %p668_p11 = scmp.ne.s32.totalorder %s662_s29, 0 }
  0x4a   : > { %s467_s24 = smov [#allocation7]  }
  0x4b   : > { %p397_p13 = pnand %p396_p9, %p668_p11  ;;  %s399_s25 = sshll.u32 %s467_s24, 4  ;;  %s400_s25 = int_to_ptr.vmem [resolvable:$false] %s399_s25 }
  0x4c   : > { %s401_s26 = scalar_lea.vmem %s400_s25, 256  ;;  %p402_p1 = scmp.lt.s32.totalorder %s191_s7, %s400_s25 }
  0x4d   : > { %p398_p10 = pneg %p397_p13  ;;  %p403_p2 = scmp.lt.s32.totalorder %s401_s26, %s395_s23 }
  0x4f   : > { %p404_p0 = por %p403_p2, %p402_p1 }
  0x51   : > { %p405_p3 = pnand %p404_p0, %p398_p10 }
  0x53   : > { %408 = shalt.err (!%p405_p3)
}
  0x54   : > { %s409_s13 = scalar_lea.hbm %s188_s15, 128  ;;  %s413_s3 = scalar_lea.hbm %s651_s2, 256 }
  0x55   : > { %p410_p12 = scmp.ne.s32.totalorder %s188_s15, %s409_s13  ;;  %p414_p6 = scmp.lt.s32.totalorder %s188_s15, %s651_s2 }
  0x56   : > { %p415_p4 = scmp.lt.s32.totalorder %s413_s3, %s409_s13 }
  0x57   : > { %p411_p5 = pnand %p410_p12, %p668_p11 }
  0x58   : > { %p416_p8 = por %p415_p4, %p414_p6 }
  0x59   : > { %p412_p7 = pneg %p411_p5 }
  0x5b   : > { %p417_p9 = pnand %p416_p8, %p412_p7 }
  0x5d   : > { %420 = shalt.err (!%p417_p9)
}
  0x5e   : > { %290 = dma.vmem_to_hbm [thread:$0]  (%p668_p11), %s191_s7, 128, %s188_s15, %s177_s22  }
  0x5f PF: > { %s202_s6 = sand.u32 1, %s451_s9   ;;  %p669_p13 = scmp.ne.s32.totalorder %s657_s16, 0 }
  0x60   : > { %p670_p10 = scmp.ge.s32.totalorder %s463_s12, 2  ;;  %s203_s8 = scalar_lea.sflag [#allocation4], %s202_s6 }
  0x62   : > { %p301_p1 = pnand %p670_p10, %p669_p13 }
  0x64   : > { %p302_p2 = pneg %p301_p1 }
  0x66   : > { %446 = dma.done.wait (%p302_p2), %s203_s8, 128  }
  0x67   : > { %448 = vsyncadd (%p302_p2), %s203_s8, 4294967168  ;;  %p16_p0 = scmp.ge.s32.totalorder %s531_s20, 4   ;;  %s671_s9 = smov %s455_s10 }
  0x68   : > { %s672_s10 = smov %s459_s11  ;;  %s673_s11 = smov %s558_s28 }
  0x69   : > { %s674_s12 = smov %s531_s20  ;;  %18 = sbr.rel (!%p16_p0) target bundleno = 6 (0x6), region = 77 }
  0x6e   :  { %208 = vsyncpa [#allocation3], 1 }
  0x6f   :  { %210 = vsyncpa [#allocation3 + $0x1], 1 }
  0x70   :  { %211 = vsyncpa [#allocation6], 1 }
  0x71   :  { %212 = vsyncpa [#allocation4], 1 }
  0x72   :  { %214 = vsyncpa [#allocation4 + $0x1], 1 }

// kernel: tpu_custom_call.1
= control target key start
LH: loop header
LB: loop body
LE: loop exit
PB: predicated region body
PF: predicated region fallthrough
CT: control target
= control target key end

     0   :  { %8 = vsyncpa [#allocation4], 0  ;;  %s1367_s0 = inlined_call_operand.vmem [shape: bf16[2,4,256], index: 0, kind: input, shape index: {}]   ;;  %s1368_s1 = inlined_call_operand.hbm [shape: bf16[8,196], index: 1, kind: input, shape index: {}]   ;;  %s1369_s2 = inlined_call_operand.vmem [shape: f32[8,1], index: 2, kind: input, shape index: {}]   ;;  %s1370_s3 = inlined_call_operand.hbm [shape: f32[2,8,128], index: 3, kind: output, shape index: {}]  }
   0x1   :  { %9 = vsyncpa [#allocation5], 0 }
   0x2   :  { %11 = vsyncpa [#allocation5 + $0x1], 0  ;;  %s1160_s12 = smov 0   ;;  %s1162_s13 = smov 0  }
   0x3   :  { %s1164_s14 = smov 0   ;;  %s1166_s15 = smov 0  }
   0x4   :  { %s1168_s16 = smov 0   ;;  %s1170_s17 = smov 0  }
   0x5 LB: > { %s816_s18 = sadd.s32 4294967295, %s1086_s17   ;;  %s817_s19 = sadd.s32 4294967294, %s1086_s17   ;;  %s1086_s17 = sphi %s1170_s17, %s17_s17   ;;  %s1082_s16 = sphi %s1168_s16, %s1379_s16   ;;  %s1078_s15 = sphi %s1166_s15, %s1378_s15   ;;  %s1074_s14 = sphi %s1164_s14, %s1377_s14   ;;  %s1070_s13 = sphi %s1162_s13, %s1376_s13   ;;  %s1066_s12 = sphi %s1160_s12, %s1375_s12  }
   0x6   : > { %s29_s20 = sadd.s32 1, %s1082_s16  ;;  %s106_s21 = sadd.s32 1, %s1074_s14 }
   0x7   : > { %p31_p0 = scmp.ge.s32.totalorder %s29_s20, 2  ;;  %p116_p1 = scmp.ne.s32.totalorder %s1074_s14, %s1070_s13 }
   0x8   : > { %p117_p2 = scmp.eq.s32.totalorder %s816_s18, 1  ;;  %p122_p3 = scmp.ne.s32.totalorder %s1070_s13, %s1066_s12 }
   0x9   : > { %s1381_s20 = smov (%p31_p0, %s29_s20), 0  ;;  %p123_p5 = scmp.eq.s32.totalorder %s817_s19, 1 }
   0xa   : > { %p1200_p4 = por %p117_p2, %p116_p1  ;;  %s101_s23 = ssub.s32 %s1082_s16, %s1381_s20 }
   0xb   : > { %p818_p6 = scmp.ge.s32.totalorder %s1086_s17, 1  ;;  %p104_p7 = scmp.eq.s32.totalorder %s101_s23, 0 }
   0xc   : > { %p1207_p8 = por %p123_p5, %p122_p3  ;;  %p130_p9 = scmp.lt.s32.totalorder %s1086_s17, 3 }
   0xd   : > { %s1213_s25 = scalar_select %p104_p7, %s1074_s14, %s106_s21  }
   0xe   : > { %p1215_p10 = pnand %p818_p6, %p130_p9  ;;  %p1219_p11 = scmp.eq.s32.totalorder %s816_s18, 0 }
   0xf   : > { %s1088_s28 = smov [#allocation3]  }
  0x10   : > { %p853_p12 = pneg %p1215_p10  ;;  %s143_s29 = sshll.u32 %s1088_s28, 4  ;;  %s144_s29 = int_to_ptr.vmem [resolvable:$true] %s143_s29 }
  0x11   : > { %s991_s30 = scalar_lea.vmem %s144_s29, 128  ;;  %p999_p5 = scmp.lt.s32.totalorder %s144_s29, %s144_s29 }
  0x12   : > { %p854_p13 = pnand %p1219_p11, %p853_p12  ;;  %p992_p1 = scmp.ne.s32.totalorder %s144_s29, %s991_s30 }
  0x13   : > { %p1000_p6 = scmp.lt.s32.totalorder %s991_s30, %s991_s30 }
  0x14   : > { %p982_p0 = pneg %p854_p13 }
  0x15   : > { %p1001_p7 = por %p1000_p6, %p999_p5 }
  0x16   : > { %p994_p2 = pnand %p992_p1, %p982_p0 }
  0x18   : > { %p995_p3 = pneg %p994_p2 }
  0x1a   : > { %p1002_p9 = pnand %p1001_p7, %p995_p3 }
  0x1c   : > { %1005 = shalt.err (!%p1002_p9)
}
  0x1d   : > { %856 = dma.hbm_to_vmem [thread:$0]  (!%p854_p13), %s1368_s1, 128, %s144_s29, [#allocation4]  }
  0x1e   : > { %167 = sbr.rel (%p1215_p10) target bundleno = 477 (0x1dd), region = 32 }
  0x23   : > { %1057 = dma.done.wait (%p1219_p11), [#allocation4], 128  }
  0x24   : > { %1059 = vsyncadd (%p1219_p11), [#allocation4], 4294967168  ;;  %p191_p12 = scmp.lt.s32.totalorder %s1078_s15, 1  ;;  %v209_v0 = vlaneseq  ;;  %v1089_v1 = vmov 1983009808   ;;  %s1090_s11 = smov 98  }
  0x25   : > { %v207_v2 = vunpack.c.l.s4 %v1089_v1  ;;  %s1091_s18 = smov 100   ;;  %s1092_s19 = smov 104   ;;  %v1096_v10 = vmov 0   ;;  %v1293_v11 = vld [vmem:[#allocation3] sm:$0xff]  ;;  %vm669_vm0 = vcmask 556032   ;;  %vm426_vm1 = vcmask 801792  }
  0x26   : > { %s192_s6 = scalar_select %p191_p12, %s1078_s15, 1  ;;  %v210_v3 = vshrl.u32 %v209_v0, 7  ;;  %677 = vmatprep.subr.bf16.mxu0 %v1096_v10  ;;  %963 = vset.pattern.permute.xlu0 %v1096_v10  ;;  %v827_v12 = vcombine.high %v1293_v11, %v1293_v11  ;;  %v582_v13 = vld [vmem:[%s1369_s2] sm:$0xff]  ;;  %vm412_vm2 = vcmask 818176   ;;  %vm384_vm3 = vcmask 850944  }
  0x27   : > { %v208_v4 = vunpack.c.0.s8 %v207_v2  ;;  %s1093_s21 = smov 97   ;;  %s1094_s23 = smov 102   ;;  %vm433_vm4 = vcmask 793600   ;;  %vm398_vm5 = vcmask 834560   ;;  %vm391_vm6 = vcmask 842752  }
  0x28   : > { %s846_s7 = sshll.u32 %s192_s6, 2  ;;  %s1095_s26 = smov 103   ;;  %841 = vmatprep.mubr.msk.bf16.mxu0 %vm669_vm0, %v827_v12  ;;  %vm405_vm7 = vcmask 826368   ;;  %vm419_vm8 = vcmask 809984   ;;  %vm363_vm9 = vcmask 875520   ;;  %vm356_vm10 = vcmask 883712  }
  0x29   : > { %s195_s10 = scalar_lea.vmem %s1367_s0, %s846_s7  ;;  %v211_v5 = vsub.s32 %v208_v4, %v210_v3  ;;  %s1097_s27 = smov 101   ;;  %vm377_vm11 = vcmask 859136   ;;  %vm370_vm12 = vcmask 867328   ;;  %vm335_vm13 = vcmask 908288  }
  0x2a   : > { %v202_v6 = vld [vmem:[%s195_s10] sm:$0xf]  ;;  %s1098_s28 = smov 99   ;;  %s1099_s29 = smov 107   ;;  %vm328_vm14 = vcmask 916480   ;;  %vm349_vm15 = vcmask 891904  }
  0x2b   : > { %v1241_v7 = vrot.slane %v202_v6, %v211_v5  ;;  %203 = vst [vmem:[#allocation2] sm:$0x3] %v202_v6  ;;  %v205_v8 = vcombine.low %v202_v6, %v202_v6  ;;  %s1100_s30 = smov 108   ;;  %s1101_s4 = smov 105   ;;  %vm342_vm0 = vcmask 900096  }
  0x2c   : > { %s1102_s5 = smov 106   ;;  %s1103_s6 = smov 111  }
  0x2d   : > { %423 = vrot.lane.b32.xlu1 %v1241_v7, %s1090_s11  ;;  %409 = vrot.lane.b32.xlu0 %v1241_v7, %s1091_s18  ;;  %v1245_v9 = vrot.slane %v205_v8, %v211_v5  ;;  %s1104_s7 = smov 112   ;;  %s1105_s8 = smov 109  }
  0x2e   : > { %s1106_s9 = smov 110   ;;  %s1107_s10 = smov 115  }
  0x2f   : > { %s1108_s11 = smov 116   ;;  %s1109_s18 = smov 113  }
  0x31   : > { %381 = vrot.lane.b32.xlu0 %v1241_v7, %s1092_s19  ;;  %430 = vrot.lane.b32.xlu1 %v1245_v9, %s1093_s21  ;;  %s1110_s19 = smov 114   ;;  %s1111_s21 = smov 119  }
  0x35   : > { %395 = vrot.lane.b32.xlu0 %v1241_v7, %s1094_s23  ;;  %388 = vrot.lane.b32.xlu1 %v1245_v9, %s1095_s26  ;;  %s1112_s23 = smov 120   ;;  %s1113_s26 = smov 117  }
  0x39   : > { %402 = vrot.lane.b32.xlu1 %v1245_v9, %s1097_s27  ;;  %416 = vrot.lane.b32.xlu0 %v1245_v9, %s1098_s28  ;;  %s1114_s27 = smov 118   ;;  %s1115_s28 = smov 123  }
  0x3d   : > { %360 = vrot.lane.b32.xlu1 %v1245_v9, %s1099_s29  ;;  %353 = vrot.lane.b32.xlu0 %v1241_v7, %s1100_s30  ;;  %s1116_s29 = smov 124   ;;  %s1117_s30 = smov 121  }
  0x41   : > { %374 = vrot.lane.b32.xlu1 %v1245_v9, %s1101_s4  ;;  %367 = vrot.lane.b32.xlu0 %v1241_v7, %s1102_s5  ;;  %s1118_s4 = smov 122   ;;  %s1119_s5 = smov 126  }
  0x45   : > { %332 = vrot.lane.b32.xlu1 %v1245_v9, %s1103_s6  ;;  %325 = vrot.lane.b32.xlu0 %v1241_v7, %s1104_s7  ;;  %s1120_s6 = smov 127   ;;  %s1121_s7 = smov 80  }
  0x49   : > { %346 = vrot.lane.b32.xlu1 %v1245_v9, %s1105_s8  ;;  %339 = vrot.lane.b32.xlu0 %v1241_v7, %s1106_s9  ;;  %s1122_s8 = smov 125   ;;  %s1123_s9 = smov 83  }
  0x4d   : > { %304 = vrot.lane.b32.xlu1 %v1245_v9, %s1107_s10  ;;  %297 = vrot.lane.b32.xlu0 %v1241_v7, %s1108_s11  ;;  %s1124_s10 = smov 84   ;;  %s1125_s11 = smov 81  }
  0x51   : > { %318 = vrot.lane.b32.xlu1 %v1245_v9, %s1109_s18  ;;  %311 = vrot.lane.b32.xlu0 %v1241_v7, %s1110_s19  ;;  %s1126_s18 = smov 82   ;;  %s1127_s19 = smov 87  }
  0x55   : > { %276 = vrot.lane.b32.xlu1 %v1245_v9, %s1111_s21  ;;  %269 = vrot.lane.b32.xlu0 %v1241_v7, %s1112_s23  ;;  %s1128_s21 = smov 88   ;;  %s1129_s23 = smov 85  }
  0x59   : > { %290 = vrot.lane.b32.xlu1 %v1245_v9, %s1113_s26  ;;  %283 = vrot.lane.b32.xlu0 %v1241_v7, %s1114_s27  ;;  %s1130_s26 = smov 86   ;;  %s1131_s27 = smov 91  }
  0x5d   : > { %248 = vrot.lane.b32.xlu1 %v1245_v9, %s1115_s28  ;;  %241 = vrot.lane.b32.xlu0 %v1241_v7, %s1116_s29  ;;  %s1132_s28 = smov 92   ;;  %s1133_s29 = smov 89  }
  0x61   : > { %262 = vrot.lane.b32.xlu1 %v1245_v9, %s1117_s30  ;;  %255 = vrot.lane.b32.xlu0 %v1241_v7, %s1118_s4  ;;  %s1134_s30 = smov 90   ;;  %s1135_s4 = smov 95  }
  0x65   : > { %227 = vrot.lane.b32.xlu1 %v1241_v7, %s1119_s5  ;;  %213 = vrot.lane.b32.xlu0 %v1245_v9, %s1120_s6  ;;  %s1136_s5 = smov 96   ;;  %s1137_s6 = smov 93  }
  0x69   : > { %549 = vrot.lane.b32.xlu1 %v1241_v7, %s1121_s7  ;;  %234 = vrot.lane.b32.xlu0 %v1245_v9, %s1122_s8  ;;  %s1138_s7 = smov 94  }
  0x6d   : > { %528 = vrot.lane.b32.xlu1 %v1245_v9, %s1123_s9  ;;  %521 = vrot.lane.b32.xlu0 %v1241_v7, %s1124_s10  ;;  %s188_s10 = sand.u32 1, %s1070_s13  }
  0x71   : > { %542 = vrot.lane.b32.xlu1 %v1245_v9, %s1125_s11  ;;  %535 = vrot.lane.b32.xlu0 %v1241_v7, %s1126_s18  ;;  %s823_s11 = sshll.u32 %s188_s10, 3  ;;  %s843_s18 = sshll.u32 %s1078_s15, 7 }
  0x75   : > { %500 = vrot.lane.b32.xlu1 %v1245_v9, %s1127_s19  ;;  %493 = vrot.lane.b32.xlu0 %v1241_v7, %s1128_s21  ;;  %s190_s19 = scalar_lea.vmem [#allocation6], %s823_s11 }
  0x76   : > { %s734_s21 = sshll.u32 %s190_s19, 4  ;;  %s1323_s21 = int_to_ptr.vmem [resolvable:$true] %s734_s21 }
  0x77   : > { %s1006_s15 = scalar_lea.vmem %s1323_s21, 128 }
  0x78   : > { %p1007_p10 = scmp.ne.s32.totalorder %s1323_s21, %s1006_s15 }
  0x79   : > { %514 = vrot.lane.b32.xlu1 %v1245_v9, %s1129_s23  ;;  %507 = vrot.lane.b32.xlu0 %v1241_v7, %s1130_s26 }
  0x7a   : > { %p1008_p11 = pnand %p1007_p10, %p1200_p4 }
  0x7c   : > { %p1009_p13 = pneg %p1008_p11 }
  0x7d   : > { %472 = vrot.lane.b32.xlu1 %v1245_v9, %s1131_s27  ;;  %465 = vrot.lane.b32.xlu0 %v1241_v7, %s1132_s28  ;;  %s1321_s27 = scalar_lea.hbm %s1370_s3, %s843_s18  ;;  %s720_s28 = scalar_lea.sflag [#allocation5], %s188_s10 }
  0x81   : > { %486 = vrot.lane.b32.xlu1 %v1245_v9, %s1133_s29  ;;  %479 = vrot.lane.b32.xlu0 %v1241_v7, %s1134_s30  ;;  %s1139_s29 = smov [#allocation6]  }
  0x82   : > { %s1010_s30 = sshll.u32 %s1139_s29, 4  ;;  %s1011_s30 = int_to_ptr.vmem [resolvable:$false] %s1010_s30 }
  0x83   : > { %p1013_p0 = scmp.lt.s32.totalorder %s1323_s21, %s1011_s30 }
  0x85   : > { %444 = vrot.lane.b32.xlu1 %v1245_v9, %s1135_s4  ;;  %437 = vrot.lane.b32.xlu0 %v1241_v7, %s1136_s5  ;;  %s1012_s4 = scalar_lea.vmem %s1011_s30, 256 }
  0x86   : > { %p1014_p1 = scmp.lt.s32.totalorder %s1012_s4, %s1006_s15 }
  0x88   : > { %p1015_p2 = por %p1014_p1, %p1013_p0 }
  0x89   : > { %458 = vrot.lane.b32.xlu1 %v1245_v9, %s1137_s6  ;;  %451 = vrot.lane.b32.xlu0 %v1241_v7, %s1138_s7 }
  0x8a   : > { %p1016_p3 = pnand %p1015_p2, %p1009_p13 }
  0x8d   : > { %585 = vperm.xlu0 %963, %v582_v13  }
  0x9f   : > { %v424_v14 = vpop.permute.xlu1 %423  ;;  %v410_v15 = vpop.permute.xlu0 %409 }
  0xa0   : > { %v425_v16 = vrot.slane %v424_v14, 4  ;;  %v411_v17 = vrot.slane %v410_v15, 4 }
  0xa2   : > { %v427_v18 = vsel %vm426_vm1, %v424_v14, %v425_v16  ;;  %v413_v19 = vsel %vm412_vm2, %v410_v15, %v411_v17  ;;  %vm307_vm1 = vcmask 941056   ;;  %vm300_vm2 = vcmask 949248  }
  0xa3   : > { %429 = vst [vmem:[#allocation2 + $0x3c] sm:$0x3] %v427_v18  ;;  %415 = vst [vmem:[#allocation2 + $0x38] sm:$0x3] %v413_v19  ;;  %v382_v20 = vpop.permute.xlu0 %381  ;;  %v431_v21 = vpop.permute.xlu1 %430 }
  0xa4   : > { %v383_v22 = vrot.slane %v382_v20, 4  ;;  %v432_v23 = vrot.slane %v431_v21, 4 }
  0xa6   : > { %v385_v24 = vsel %vm384_vm3, %v382_v20, %v383_v22  ;;  %v434_v25 = vsel %vm433_vm4, %v431_v21, %v432_v23  ;;  %vm321_vm3 = vcmask 924672   ;;  %vm314_vm4 = vcmask 932864  }
  0xa7   : > { %387 = vst [vmem:[#allocation2 + $0x30] sm:$0x3] %v385_v24  ;;  %436 = vst [vmem:[#allocation2 + $0x3c] sm:$0xc] %v434_v25  ;;  %v396_v26 = vpop.permute.xlu0 %395  ;;  %v389_v27 = vpop.permute.xlu1 %388 }
  0xa8   : > { %v397_v28 = vrot.slane %v396_v26, 4  ;;  %v390_v29 = vrot.slane %v389_v27, 4 }
  0xaa   : > { %v399_v30 = vsel %vm398_vm5, %v396_v26, %v397_v28  ;;  %v392_v31 = vsel %vm391_vm6, %v389_v27, %v390_v29  ;;  %vm279_vm5 = vcmask 973824   ;;  %vm272_vm6 = vcmask 982016  }
  0xab   : > { %401 = vst [vmem:[#allocation2 + $0x34] sm:$0x3] %v399_v30  ;;  %394 = vst [vmem:[#allocation2 + $0x30] sm:$0xc] %v392_v31  ;;  %v403_v32 = vpop.permute.xlu1 %402  ;;  %v417_v33 = vpop.permute.xlu0 %416 }
  0xac   : > { %v404_v34 = vrot.slane %v403_v32, 4  ;;  %v418_v35 = vrot.slane %v417_v33, 4 }
  0xae   : > { %v406_v36 = vsel %vm405_vm7, %v403_v32, %v404_v34  ;;  %v420_v37 = vsel %vm419_vm8, %v417_v33, %v418_v35  ;;  %vm293_vm7 = vcmask 957440   ;;  %vm286_vm8 = vcmask 965632  }
  0xaf   : > { %408 = vst [vmem:[#allocation2 + $0x34] sm:$0xc] %v406_v36  ;;  %422 = vst [vmem:[#allocation2 + $0x38] sm:$0xc] %v420_v37  ;;  %v361_v38 = vpop.permute.xlu1 %360  ;;  %v354_v39 = vpop.permute.xlu0 %353 }
  0xb0   : > { %v362_v40 = vrot.slane %v361_v38, 4  ;;  %v355_v41 = vrot.slane %v354_v39, 4 }
  0xb2   : > { %v364_v42 = vsel %vm363_vm9, %v361_v38, %v362_v40  ;;  %v357_v43 = vsel %vm356_vm10, %v354_v39, %v355_v41  ;;  %vm251_vm9 = vcmask 1006592   ;;  %vm244_vm10 = vcmask 1014784  }
  0xb3   : > { %366 = vst [vmem:[#allocation2 + $0x28] sm:$0xc] %v364_v42  ;;  %359 = vst [vmem:[#allocation2 + $0x28] sm:$0x3] %v357_v43  ;;  %v375_v44 = vpop.permute.xlu1 %374  ;;  %v368_v45 = vpop.permute.xlu0 %367 }
  0xb4   : > { %v376_v46 = vrot.slane %v375_v44, 4  ;;  %v369_v47 = vrot.slane %v368_v45, 4 }
  0xb6   : > { %v378_v48 = vsel %vm377_vm11, %v375_v44, %v376_v46  ;;  %v371_v49 = vsel %vm370_vm12, %v368_v45, %v369_v47  ;;  %v965_v50 = vld [vmem:[#allocation2 + $0x38] sm:$0xff]   ;;  %v966_v57 = vld [vmem:[#allocation2 + $0x30] sm:$0xff]   ;;  %vm265_vm11 = vcmask 990208   ;;  %vm258_vm12 = vcmask 998400  }
  0xb7   : > { %380 = vst [vmem:[#allocation2 + $0x2c] sm:$0xc] %v378_v48  ;;  %373 = vst [vmem:[#allocation2 + $0x2c] sm:$0x3] %v371_v49  ;;  %v333_v51 = vpop.permute.xlu1 %332  ;;  %v326_v52 = vpop.permute.xlu0 %325  ;;  %678 = vmatpush1.bf16.msra.mxu0 %v965_v50 }
  0xb8   : > { %v334_v53 = vrot.slane %v333_v51, 4  ;;  %v327_v54 = vrot.slane %v326_v52, 4  ;;  %679 = vmatprep.subr.bf16.mxu0 %v1096_v10 }
  0xba   : > { %v336_v55 = vsel %vm335_vm13, %v333_v51, %v334_v53  ;;  %v329_v56 = vsel %vm328_vm14, %v326_v52, %v327_v54  ;;  %vm230_vm13 = vcmask 1031168   ;;  %vm216_vm14 = vcmask 1039360  }
  0xbb   : > { %338 = vst [vmem:[#allocation2 + $0x20] sm:$0xc] %v336_v55  ;;  %331 = vst [vmem:[#allocation2 + $0x20] sm:$0x3] %v329_v56  ;;  %v347_v58 = vpop.permute.xlu1 %346  ;;  %v340_v59 = vpop.permute.xlu0 %339  ;;  %680 = vmatpush1.bf16.msra.mxu0 %v966_v57 }
  0xbc   : > { %v348_v60 = vrot.slane %v347_v58, 4  ;;  %v341_v61 = vrot.slane %v340_v59, 4  ;;  %681 = vmatprep.subr.bf16.mxu0 %v1096_v10 }
  0xbe   : > { %v350_v62 = vsel %vm349_vm15, %v347_v58, %v348_v60  ;;  %v343_v63 = vsel %vm342_vm0, %v340_v59, %v341_v61  ;;  %v967_v0 = vld [vmem:[#allocation2 + $0x28] sm:$0xff]   ;;  %vm552_vm15 = vcmask 654336   ;;  %vm237_vm0 = vcmask 1022976  }
  0xbf   : > { %352 = vst [vmem:[#allocation2 + $0x24] sm:$0xc] %v350_v62  ;;  %345 = vst [vmem:[#allocation2 + $0x24] sm:$0x3] %v343_v63  ;;  %v305_v1 = vpop.permute.xlu1 %304  ;;  %v298_v2 = vpop.permute.xlu0 %297  ;;  %682 = vmatpush1.bf16.msra.mxu0 %v967_v0 }
  0xc0   : > { %v306_v3 = vrot.slane %v305_v1, 4  ;;  %v299_v4 = vrot.slane %v298_v2, 4  ;;  %683 = vmatprep.subr.bf16.mxu0 %v1096_v10 }
  0xc2   : > { %v308_v5 = vsel %vm307_vm1, %v305_v1, %v306_v3  ;;  %v301_v6 = vsel %vm300_vm2, %v298_v2, %v299_v4  ;;  %vm531_vm1 = vcmask 678912   ;;  %vm524_vm2 = vcmask 687104  }
  0xc3   : > { %310 = vst [vmem:[#allocation2 + $0x18] sm:$0xc] %v308_v5  ;;  %303 = vst [vmem:[#allocation2 + $0x18] sm:$0x3] %v301_v6  ;;  %v319_v7 = vpop.permute.xlu1 %318  ;;  %v312_v8 = vpop.permute.xlu0 %311 }
  0xc4   : > { %v320_v9 = vrot.slane %v319_v7, 4  ;;  %v313_v12 = vrot.slane %v312_v8, 4 }
  0xc6   : > { %v322_v13 = vsel %vm321_vm3, %v319_v7, %v320_v9  ;;  %v315_v14 = vsel %vm314_vm4, %v312_v8, %v313_v12  ;;  %v968_v15 = vld [vmem:[#allocation2 + $0x20] sm:$0xff]   ;;  %vm545_vm3 = vcmask 662528   ;;  %vm538_vm4 = vcmask 670720  }
  0xc7   : > { %324 = vst [vmem:[#allocation2 + $0x1c] sm:$0xc] %v322_v13  ;;  %317 = vst [vmem:[#allocation2 + $0x1c] sm:$0x3] %v315_v14  ;;  %v277_v16 = vpop.permute.xlu1 %276  ;;  %v270_v17 = vpop.permute.xlu0 %269  ;;  %684 = vmatpush1.bf16.msra.mxu0 %v968_v15 }
  0xc8   : > { %v278_v18 = vrot.slane %v277_v16, 4  ;;  %v271_v19 = vrot.slane %v270_v17, 4  ;;  %685 = vmatprep.subr.bf16.mxu0 %v1096_v10 }
  0xca   : > { %v280_v20 = vsel %vm279_vm5, %v277_v16, %v278_v18  ;;  %v273_v21 = vsel %vm272_vm6, %v270_v17, %v271_v19  ;;  %vm503_vm5 = vcmask 711680   ;;  %vm496_vm6 = vcmask 719872  }
  0xcb   : > { %282 = vst [vmem:[#allocation2 + $0x10] sm:$0xc] %v280_v20  ;;  %275 = vst [vmem:[#allocation2 + $0x10] sm:$0x3] %v273_v21  ;;  %v291_v22 = vpop.permute.xlu1 %290  ;;  %v284_v23 = vpop.permute.xlu0 %283 }
  0xcc   : > { %v292_v24 = vrot.slane %v291_v22, 4  ;;  %v285_v25 = vrot.slane %v284_v23, 4 }
  0xce   : > { %v294_v26 = vsel %vm293_vm7, %v291_v22, %v292_v24  ;;  %v287_v27 = vsel %vm286_vm8, %v284_v23, %v285_v25  ;;  %v969_v28 = vld [vmem:[#allocation2 + $0x18] sm:$0xff]   ;;  %vm673_vm7 = vcmask 1041408   ;;  %vm517_vm8 = vcmask 695296  }
  0xcf   : > { %296 = vst [vmem:[#allocation2 + $0x14] sm:$0xc] %v294_v26  ;;  %289 = vst [vmem:[#allocation2 + $0x14] sm:$0x3] %v287_v27  ;;  %v249_v29 = vpop.permute.xlu1 %248  ;;  %v242_v30 = vpop.permute.xlu0 %241  ;;  %686 = vmatpush1.bf16.msra.mxu0 %v969_v28 }
  0xd0   : > { %v250_v31 = vrot.slane %v249_v29, 4  ;;  %v243_v32 = vrot.slane %v242_v30, 4  ;;  %687 = vmatprep.subr.bf16.mxu0 %v1096_v10 }
  0xd2   : > { %v252_v33 = vsel %vm251_vm9, %v249_v29, %v250_v31  ;;  %v245_v34 = vsel %vm244_vm10, %v242_v30, %v243_v32  ;;  %vm510_vm9 = vcmask 703488   ;;  %vm475_vm10 = vcmask 744448  }
  0xd3   : > { %254 = vst [vmem:[#allocation2 + $0x8] sm:$0xc] %v252_v33  ;;  %247 = vst [vmem:[#allocation2 + $0x8] sm:$0x3] %v245_v34  ;;  %v263_v35 = vpop.permute.xlu1 %262  ;;  %v256_v36 = vpop.permute.xlu0 %255 }
  0xd4   : > { %v264_v37 = vrot.slane %v263_v35, 4  ;;  %v257_v38 = vrot.slane %v256_v36, 4 }
  0xd6   : > { %v266_v39 = vsel %vm265_vm11, %v263_v35, %v264_v37  ;;  %v259_v40 = vsel %vm258_vm12, %v256_v36, %v257_v38  ;;  %v970_v41 = vld [vmem:[#allocation2 + $0x10] sm:$0xff]   ;;  %vm468_vm11 = vcmask 752640   ;;  %vm489_vm12 = vcmask 728064  }
  0xd7   : > { %268 = vst [vmem:[#allocation2 + $0xc] sm:$0xc] %v266_v39  ;;  %261 = vst [vmem:[#allocation2 + $0xc] sm:$0x3] %v259_v40  ;;  %v228_v42 = vpop.permute.xlu1 %227  ;;  %v214_v43 = vpop.permute.xlu0 %213  ;;  %688 = vmatpush1.bf16.msra.mxu0 %v970_v41 }
  0xd8   : > { %v229_v44 = vrot.slane %v228_v42, 4  ;;  %v215_v45 = vrot.slane %v214_v43, 4  ;;  %689 = vmatprep.subr.bf16.mxu0 %v1096_v10 }
  0xda   : > { %v231_v46 = vsel %vm230_vm13, %v228_v42, %v229_v44  ;;  %v217_v47 = vsel %vm216_vm14, %v214_v43, %v215_v45  ;;  %vm482_vm13 = vcmask 736256   ;;  %vm447_vm14 = vcmask 777216  }
  0xdb   : > { %233 = vst [vmem:[#allocation2 + $0x4] sm:$0x3] %v231_v46  ;;  %219 = vst [vmem:[#allocation2] sm:$0xc] %v217_v47  ;;  %v550_v48 = vpop.permute.xlu1 %549  ;;  %v235_v49 = vpop.permute.xlu0 %234 }
  0xdc   : > { %v551_v50 = vrot.slane %v550_v48, 4  ;;  %v236_v51 = vrot.slane %v235_v49, 4 }
  0xde   : > { %v553_v52 = vsel %vm552_vm15, %v550_v48, %v551_v50  ;;  %v238_v53 = vsel %vm237_vm0, %v235_v49, %v236_v51  ;;  %v971_v54 = vld [vmem:[#allocation2 + $0x8] sm:$0xff]   ;;  %vm440_vm15 = vcmask 785408   ;;  %vm461_vm0 = vcmask 760832  }
  0xdf   : > { %555 = vst [vmem:[#allocation2 + $0x60] sm:$0x3] %v553_v52  ;;  %240 = vst [vmem:[#allocation2 + $0x4] sm:$0xc] %v238_v53  ;;  %v529_v55 = vpop.permute.xlu1 %528  ;;  %v522_v56 = vpop.permute.xlu0 %521  ;;  %690 = vmatpush1.bf16.msra.mxu0 %v971_v54  ;;  %v826_v48 = vcombine.low %v1293_v11, %v1293_v11 }
  0xe0   : > { %v530_v57 = vrot.slane %v529_v55, 4  ;;  %v523_v58 = vrot.slane %v522_v56, 4  ;;  %691 = vmatprep.subr.bf16.mxu0 %v1096_v10 }
  0xe2   : > { %v532_v59 = vsel %vm531_vm1, %v529_v55, %v530_v57  ;;  %v525_v60 = vsel %vm524_vm2, %v522_v56, %v523_v58  ;;  %vm454_vm1 = vcmask 769024  }
  0xe3   : > { %534 = vst [vmem:[#allocation2 + $0x58] sm:$0xc] %v532_v59  ;;  %527 = vst [vmem:[#allocation2 + $0x58] sm:$0x3] %v525_v60  ;;  %v543_v61 = vpop.permute.xlu1 %542  ;;  %v536_v62 = vpop.permute.xlu0 %535 }
  0xe4   : > { %v544_v63 = vrot.slane %v543_v61, 4  ;;  %v537_v0 = vrot.slane %v536_v62, 4 }
  0xe6   : > { %v546_v1 = vsel %vm545_vm3, %v543_v61, %v544_v63  ;;  %v539_v2 = vsel %vm538_vm4, %v536_v62, %v537_v0  ;;  %v972_v3 = vld [vmem:[#allocation2] sm:$0xff]  }
  0xe7   : > { %548 = vst [vmem:[#allocation2 + $0x5c] sm:$0xc] %v546_v1  ;;  %541 = vst [vmem:[#allocation2 + $0x5c] sm:$0x3] %v539_v2  ;;  %v501_v4 = vpop.permute.xlu1 %500  ;;  %v494_v5 = vpop.permute.xlu0 %493  ;;  %692 = vmatpush1.bf16.msra.mxu0 %v972_v3 }
  0xe8   : > { %v973_v6 = vld [vmem:[#allocation2 + $0x60] ss:$0 sps:$4 sm:$0x33]   ;;  %v502_v7 = vrot.slane %v501_v4, 4  ;;  %v495_v8 = vrot.slane %v494_v5, 4  ;;  %699 = vmatprep.subr.bf16.mxu0 %v1096_v10 }
  0xe9   : > { %v675_v15 = vsel %vm673_vm7, %v973_v6, 0 }
  0xea   : > { %v504_v9 = vsel %vm503_vm5, %v501_v4, %v502_v7  ;;  %v497_v12 = vsel %vm496_vm6, %v494_v5, %v495_v8 }
  0xeb   : > { %506 = vst [vmem:[#allocation2 + $0x50] sm:$0xc] %v504_v9  ;;  %499 = vst [vmem:[#allocation2 + $0x50] sm:$0x3] %v497_v12  ;;  %v515_v13 = vpop.permute.xlu1 %514  ;;  %v508_v14 = vpop.permute.xlu0 %507  ;;  %700 = vmatpush2.bf16.msra.mxu0 %v675_v15 }
  0xec   : > { %v516_v16 = vrot.slane %v515_v13, 4  ;;  %v509_v17 = vrot.slane %v508_v14, 4  ;;  %701 = vmatprep.subr.bf16.mxu0 %v1096_v10 }
  0xee   : > { %v518_v18 = vsel %vm517_vm8, %v515_v13, %v516_v16  ;;  %v511_v19 = vsel %vm510_vm9, %v508_v14, %v509_v17  ;;  %v974_v20 = vld [vmem:[#allocation2 + $0x58] sm:$0xff]  }
  0xef   : > { %520 = vst [vmem:[#allocation2 + $0x54] sm:$0xc] %v518_v18  ;;  %513 = vst [vmem:[#allocation2 + $0x54] sm:$0x3] %v511_v19  ;;  %v473_v21 = vpop.permute.xlu1 %472  ;;  %v466_v22 = vpop.permute.xlu0 %465  ;;  %702 = vmatpush2.bf16.msra.mxu0 %v974_v20 }
  0xf0   : > { %v474_v23 = vrot.slane %v473_v21, 4  ;;  %v467_v24 = vrot.slane %v466_v22, 4  ;;  %703 = vmatprep.subr.bf16.mxu0 %v1096_v10 }
  0xf2   : > { %v476_v25 = vsel %vm475_vm10, %v473_v21, %v474_v23  ;;  %v469_v26 = vsel %vm468_vm11, %v466_v22, %v467_v24 }
  0xf3   : > { %478 = vst [vmem:[#allocation2 + $0x48] sm:$0xc] %v476_v25  ;;  %471 = vst [vmem:[#allocation2 + $0x48] sm:$0x3] %v469_v26  ;;  %v487_v27 = vpop.permute.xlu1 %486  ;;  %v480_v28 = vpop.permute.xlu0 %479 }
  0xf4   : > { %v488_v29 = vrot.slane %v487_v27, 4  ;;  %v481_v30 = vrot.slane %v480_v28, 4 }
  0xf6   : > { %v490_v31 = vsel %vm489_vm12, %v487_v27, %v488_v29  ;;  %v483_v32 = vsel %vm482_vm13, %v480_v28, %v481_v30  ;;  %v975_v33 = vld [vmem:[#allocation2 + $0x50] sm:$0xff]  }
  0xf7   : > { %492 = vst [vmem:[#allocation2 + $0x4c] sm:$0xc] %v490_v31  ;;  %485 = vst [vmem:[#allocation2 + $0x4c] sm:$0x3] %v483_v32  ;;  %v445_v34 = vpop.permute.xlu1 %444  ;;  %v438_v35 = vpop.permute.xlu0 %437  ;;  %704 = vmatpush2.bf16.msra.mxu0 %v975_v33 }
  0xf8   : > { %v446_v36 = vrot.slane %v445_v34, 4  ;;  %v439_v37 = vrot.slane %v438_v35, 4  ;;  %705 = vmatprep.subr.bf16.mxu0 %v1096_v10 }
  0xfa   : > { %v448_v38 = vsel %vm447_vm14, %v445_v34, %v446_v36  ;;  %v441_v39 = vsel %vm440_vm15, %v438_v35, %v439_v37 }
  0xfb   : > { %450 = vst [vmem:[#allocation2 + $0x40] sm:$0xc] %v448_v38  ;;  %443 = vst [vmem:[#allocation2 + $0x40] sm:$0x3] %v441_v39  ;;  %v459_v40 = vpop.permute.xlu1 %458  ;;  %v452_v41 = vpop.permute.xlu0 %451 }
  0xfc   : > { %v460_v42 = vrot.slane %v459_v40, 4  ;;  %v453_v43 = vrot.slane %v452_v41, 4 }
  0xfe   : > { %v462_v44 = vsel %vm461_vm0, %v459_v40, %v460_v42  ;;  %v455_v45 = vsel %vm454_vm1, %v452_v41, %v453_v43  ;;  %v976_v46 = vld [vmem:[#allocation2 + $0x48] sm:$0xff]  }
  0xff   : > { %464 = vst [vmem:[#allocation2 + $0x44] sm:$0xc] %v462_v44  ;;  %457 = vst [vmem:[#allocation2 + $0x44] sm:$0x3] %v455_v45  ;;  %706 = vmatpush2.bf16.msra.mxu0 %v976_v46 }
 0x100   : > { %707 = vmatprep.subr.bf16.mxu0 %v1096_v10 }
 0x106   : > { %v977_v47 = vld [vmem:[#allocation2 + $0x40] sm:$0xff]  }
 0x107   : > { %708 = vmatpush2.bf16.msra.mxu0 %v977_v47 }
 0x108   : > { %v586_v49 = vpop.permute.xlu0 %585 }
 0x10a   : > { %710 = vmatmul.mubr.bf16.vlgmr.msra.gmra.mxu0 %v826_v48 }
 0x1ca   : > { %v711_v50 = vpop.f32.mrf.mxu0 }
 0x1cb   : > { %v712_v51 = vadd.f32 %v711_v50, %v586_v49 }
 0x1cc   : > { %v713_v52 = vpop.f32.mrf.mxu0 }
 0x1cd   : > { %v717_v53 = vmax.f32 %v712_v51, 0.0 }
 0x1ce   : > { %v714_v10 = vpop.f32.mrf.mxu0 }
 0x1cf   : > { %718 = vst [vmem:[%s190_s19] sm:$0xff] %v717_v53 }
 0x1d0   : > { %v715_v11 = vpop.f32.mrf.mxu0 }
 0x1d1   : > { %1019 = shalt.err (!%p1016_p3)
}
 0x1d2   : > { %s1020_s5 = scalar_lea.hbm %s1321_s27, 128  ;;  %s1024_s8 = scalar_lea.hbm %s1370_s3, 256 }
 0x1d3   : > { %p1021_p5 = scmp.ne.s32.totalorder %s1321_s27, %s1020_s5  ;;  %p1025_p9 = scmp.lt.s32.totalorder %s1321_s27, %s1370_s3 }
 0x1d4   : > { %p1026_p12 = scmp.lt.s32.totalorder %s1024_s8, %s1020_s5 }
 0x1d5   : > { %p1022_p6 = pnand %p1021_p5, %p1200_p4 }
 0x1d6   : > { %p1027_p10 = por %p1026_p12, %p1025_p9 }
 0x1d7   : > { %p1023_p7 = pneg %p1022_p6 }
 0x1d9   : > { %p1028_p11 = pnand %p1027_p10, %p1023_p7 }
 0x1db   : > { %1031 = shalt.err (!%p1028_p11)
}
 0x1dc   : > { %851 = dma.vmem_to_hbm [thread:$0]  (%p1200_p4), %s1323_s21, 128, %s1321_s27, %s720_s28  }
 0x1dd PF: > { %p863_p13 = scmp.ge.s32.totalorder %s1086_s17, 2  ;;  %s746_s11 = sand.u32 1, %s1066_s12  }
 0x1de   : > { %s747_s18 = scalar_lea.sflag [#allocation5], %s746_s11 }
 0x1df   : > { %p858_p0 = pnand %p863_p13, %p1207_p8 }
 0x1e1   : > { %p859_p1 = pneg %p858_p0 }
 0x1e3   : > { %1061 = dma.done.wait (%p859_p1), %s747_s18, 128  }
 0x1e4   : > { %1063 = vsyncadd (%p859_p1), %s747_s18, 4294967168  ;;  %s17_s17 = sadd.s32 1, %s1086_s17   ;;  %s1375_s12 = smov %s1070_s13 }
 0x1e5   : > { %p14_p2 = scmp.ge.s32.totalorder %s17_s17, 4   ;;  %s1376_s13 = smov %s1074_s14 }
 0x1e6   : > { %s1377_s14 = smov %s1213_s25  ;;  %s1378_s15 = smov %s1082_s16 }
 0x1e7   : > { %s1379_s16 = smov %s1381_s20  ;;  %16 = sbr.rel (!%p14_p2) target bundleno = 5 (0x5), region = 73 }
 0x1ec   :  { %752 = vsyncpa [#allocation4], 1 }
 0x1ed   :  { %754 = vsyncpa [#allocation4 + $0x1], 1 }
 0x1ee   :  { %755 = vsyncpa [#allocation5], 1 }
 0x1ef   :  { %757 = vsyncpa [#allocation5 + $0x1], 1 }

// kernel: tpu_custom_call.1
= control target key start
LH: loop header
LB: loop body
LE: loop exit
PB: predicated region body
PF: predicated region fallthrough
CT: control target
= control target key end

     0   :  { %s2394_s0 = inlined_call_operand.hbm [shape: bf16[2,16,256], index: 0, kind: input, shape index: {}]   ;;  %s2395_s1 = inlined_call_operand.hbm [shape: bf16[8,784], index: 1, kind: input, shape index: {}]   ;;  %s2396_s2 = inlined_call_operand.vmem [shape: f32[8,1], index: 2, kind: input, shape index: {}]   ;;  %s2397_s3 = inlined_call_operand.hbm [shape: f32[2,8,128], index: 3, kind: output, shape index: {}]  }
   0x1   :  { %2400 = sst [smem:[#allocation12_spill]] %s2395_s1 }
   0x2   :  { %8 = vsyncpa [#allocation4], 0 }
   0x3   :  { %10 = vsyncpa [#allocation4 + $0x1], 0 }
   0x4   :  { %11 = vsyncpa [#allocation7], 0 }
   0x5   :  { %12 = vsyncpa [#allocation5], 0 }
   0x6   :  { %14 = vsyncpa [#allocation5 + $0x1], 0  ;;  %s2097_s12 = smov 0   ;;  %s2099_s13 = smov 0  }
   0x7   :  { %s2101_s14 = smov 0   ;;  %s2103_s15 = smov 0  }
   0x8   :  { %s2105_s16 = smov 0   ;;  %s2107_s17 = smov 0  }
   0x9 LB: > { %s1550_s18 = sadd.s32 4294967295, %s2019_s17   ;;  %s1551_s19 = sadd.s32 4294967294, %s2019_s17   ;;  %s2019_s17 = sphi %s2107_s17, %s20_s17   ;;  %s2015_s16 = sphi %s2105_s16, %s2418_s16   ;;  %s2011_s15 = sphi %s2103_s15, %s2417_s15   ;;  %s2007_s14 = sphi %s2101_s14, %s2416_s14   ;;  %s2003_s13 = sphi %s2099_s13, %s2415_s13   ;;  %s1999_s12 = sphi %s2097_s12, %s2414_s12  }
   0xa   : > { %s39_s20 = sadd.s32 1, %s2007_s14  ;;  %p46_p0 = scmp.ne.s32.totalorder %s2007_s14, %s2003_s13 }
   0xb   : > { %p47_p1 = scmp.eq.s32.totalorder %s2019_s17, 0  ;;  %p52_p2 = scmp.ne.s32.totalorder %s2003_s13, %s1999_s12 }
   0xc   : > { %p2135_p3 = scmp.eq.s32.totalorder %s1550_s18, 0  ;;  %p120_p4 = scmp.eq.s32.totalorder %s1550_s18, 1 }
   0xd   : > { %p2139_p5 = por %p47_p1, %p46_p0  ;;  %p126_p6 = scmp.eq.s32.totalorder %s1551_s19, 1 }
   0xe   : > { %p2145_p7 = por %p2135_p3, %p52_p2  ;;  %p2149_p8 = por %p120_p4, %p46_p0 }
   0xf   : > { %p2153_p9 = por %p126_p6, %p52_p2  ;;  %p1552_p10 = scmp.ge.s32.totalorder %s2019_s17, 1 }
  0x10   : > { %s2403_s23 = scalar_select %p2145_p7, 1, 0 }
  0x11   : > { %s2404_s24 = scalar_select %p2149_p8, 1, 0 }
  0x12   : > { %s2405_s25 = scalar_select %p2153_p9, 1, 0 }
  0x13   : > { %p133_p11 = scmp.lt.s32.totalorder %s2019_s17, 3  ;;  %s2021_s27 = smov [#allocation6]  }
  0x14   : > { %s146_s28 = sshll.u32 %s2021_s27, 4  ;;  %p1719_p1 = scmp.lt.s32.totalorder %s2019_s17, 2  ;;  %s147_s28 = int_to_ptr.vmem [resolvable:$true] %s146_s28 }
  0x15   : > { %p2160_p13 = pnand %p1552_p10, %p133_p11  ;;  %s32_s4 = sadd.s32 1, %s2015_s16 }
  0x16   : > { %p2169_p4 = pnand %p1719_p1, %p2139_p5  ;;  %p34_p6 = scmp.ge.s32.totalorder %s32_s4, 2 }
  0x17   : > { %p1706_p0 = pneg %p2160_p13  ;;  %s160_s5 = sand.u32 1, %s2007_s14  }
  0x18   : > { %s1892_s6 = scalar_lea.vmem %s147_s28, 448  ;;  %p1900_p8 = scmp.lt.s32.totalorder %s147_s28, %s147_s28 }
  0x19   : > { %p2175_p2 = pnand %p1706_p0, %p2135_p3  ;;  %p1893_p11 = scmp.ne.s32.totalorder %s147_s28, %s1892_s6 }
  0x1a   : > { %p1901_p5 = scmp.lt.s32.totalorder %s1892_s6, %s1892_s6 }
  0x1b   : > { %p1883_p10 = pneg %p2175_p2 }
  0x1c   : > { %p1902_p1 = por %p1901_p5, %p1900_p8 }
  0x1d   : > { %p1895_p12 = pnand %p1893_p11, %p1883_p10 }
  0x1f   : > { %p1896_p9 = pneg %p1895_p12 }
  0x21   : > { %p1903_p7 = pnand %p1902_p1, %p1896_p9 }
  0x23   : > { %1906 = shalt.err (!%p1903_p7)
}
  0x24   : > { %s2409_s1 = sld [smem:[#allocation12_spill]]  ;;  %s2420_s4 = smov (%p34_p6, %s32_s4), 0 }
  0x25   : > { %s1555_s9 = sshll.u32 %s160_s5, 4  ;;  %s36_s10 = ssub.s32 %s2015_s16, %s2420_s4 }
  0x26   : > { %p37_p12 = scmp.eq.s32.totalorder %s36_s10, 0  ;;  %s1623_s11 = sshll.u32 %s2015_s16, 8 }
  0x27   : > { %s170_s22 = scalar_lea.hbm %s2394_s0, %s1623_s11  ;;  %s164_s27 = scalar_lea.vmem [#allocation3], %s1555_s9 }
  0x28   : > { %s171_s30 = sshll.u32 %s164_s27, 4  ;;  %s161_s7 = scalar_lea.sflag [#allocation4], %s160_s5  ;;  %s172_s30 = int_to_ptr.vmem [resolvable:$true] %s171_s30 }
  0x29   : > { %s2199_s6 = scalar_select %p37_p12, %s2007_s14, %s39_s20  }
  0x2a   : > { %1709 = dma.hbm_to_vmem [thread:$0]  (!%p2175_p2), %s2409_s1, 448, %s147_s28, [#allocation7]  }
  0x2b   : > { %p1909_p7 = pneg %p2169_p4  ;;  %s1920_s28 = scalar_lea.vmem %s172_s30, 256 }
  0x2c   : > { %p1921_p8 = scmp.ne.s32.totalorder %s172_s30, %s1920_s28  ;;  %s2022_s8 = smov [#allocation3]  }
  0x2d   : > { %s1925_s10 = sshll.u32 %s2022_s8, 4  ;;  %s1926_s10 = int_to_ptr.vmem [resolvable:$false] %s1925_s10 }
  0x2e   : > { %p1923_p9 = pnand %p1921_p8, %p1909_p7  ;;  %s1927_s1 = scalar_lea.vmem %s1926_s10, 512 }
  0x2f   : > { %p1928_p2 = scmp.lt.s32.totalorder %s172_s30, %s1926_s10  ;;  %p1929_p6 = scmp.lt.s32.totalorder %s1927_s1, %s1920_s28 }
  0x30   : > { %p1924_p0 = pneg %p1923_p9 }
  0x31   : > { %p1930_p10 = por %p1929_p6, %p1928_p2 }
  0x33   : > { %p1931_p11 = pnand %p1930_p10, %p1924_p0 }
  0x35   : > { %1934 = shalt.err (!%p1931_p11)
}
  0x36   : > { %s2023_s9 = smov 128   ;;  %s2024_s20 = smov 8  }
  0x37   : > { %1713 = dma.hbm_to_vmem [thread:$0]  (!%p2169_p4), %s170_s22, 256, %s172_s30, %s161_s7, %s2023_s9, %s2023_s9, %s2024_s20  }
  0x38   : > { %183 = sbr.rel (%p2160_p13) target bundleno = 594 (0x252), region = 32  ;;  %s2208_s5 = sand.u32 (!%p2160_p13), 1, %s2003_s13  }
  0x39   : > { %s1559_s11 = sshll.u32 (!%p2160_p13), %s2208_s5, 4  ;;  %s186_s18 = scalar_lea.sflag (!%p2160_p13), [#allocation4], %s2208_s5 }
  0x3a   : > { %s189_s1 = scalar_lea.vmem (!%p2160_p13), [#allocation3], %s1559_s11  ;;  %p2410_p5 = scmp.ne.s32.totalorder (!%p2160_p13), %s2403_s23, 0 }
  0x3d   : > { %1986 = dma.done.wait (%p2410_p5), %s186_s18, 256  }
  0x3e   : > { %1988 = vsyncadd (%p2410_p5), %s186_s18, 4294967040 }
  0x3f   : > { %1990 = dma.done.wait (%p2135_p3), [#allocation7], 448  }
  0x40   : > { %1992 = vsyncadd (%p2135_p3), [#allocation7], 4294966848  ;;  %v2220_v0 = vld [vmem:[%s189_s1] sm:$0xff]  ;;  %v2222_v1 = vld [vmem:[%s189_s1 + $0x8] sm:$0xff]  ;;  %s2025_s26 = smov 121   ;;  %s2026_s29 = smov 113  }
  0x41   : > { %306 = vrot.lane.b32.xlu1 %v2220_v0, %s2025_s26  ;;  %224 = vst [vmem:[#allocation2] sm:$0xf] %v2220_v0  ;;  %410 = vrot.lane.b32.xlu0 %v2220_v0, %s2026_s29  ;;  %225 = vst [vmem:[#allocation2 + $0x4] sm:$0xf] %v2222_v1  ;;  %s2027_s21 = smov 114   ;;  %s2028_s23 = smov 122  }
  0x42   : > { %s2029_s19 = smov 115   ;;  %s2030_s22 = smov 123   ;;  %v2262_v2 = vld [vmem:[#allocation6] sm:$0xff]  ;;  %vm312_vm0 = vcmask 990208   ;;  %vm416_vm1 = vcmask 924672   ;;  %vm403_vm2 = vcmask 932864  }
  0x43   : > { %s2031_s27 = smov 116   ;;  %s2032_s30 = smov 124   ;;  %v1563_v3 = vcombine.high %v2262_v2, %v2262_v2  ;;  %vm299_vm3 = vcmask 998400   ;;  %vm390_vm4 = vcmask 941056   ;;  %vm286_vm5 = vcmask 1006592  }
  0x44   : > { %s2033_s7 = smov 117   ;;  %s2034_s28 = smov 125   ;;  %vm377_vm6 = vcmask 949248   ;;  %vm273_vm7 = vcmask 1014784   ;;  %vm364_vm8 = vcmask 957440   ;;  %vm260_vm9 = vcmask 1022976  }
  0x45   : > { %308 = vrot.lane.b32.xlu1 %v2222_v1, %s2025_s26  ;;  %412 = vrot.lane.b32.xlu0 %v2222_v1, %s2026_s29  ;;  %s2035_s8 = smov 118   ;;  %s2036_s10 = smov 126   ;;  %vm351_vm10 = vcmask 965632   ;;  %vm247_vm11 = vcmask 1031168   ;;  %vm338_vm12 = vcmask 973824   ;;  %vm234_vm13 = vcmask 1039360  }
  0x46   : > { %s2037_s9 = smov 119   ;;  %s2038_s20 = smov 127   ;;  %1314 = vmatprep.mubr.bf16.mxu0 %v1563_v3  ;;  %vm325_vm14 = vcmask 982016   ;;  %vm624_vm15 = vcmask 793600  }
  0x47   : > { %s2039_s11 = smov 120   ;;  %s2040_s18 = smov 97  }
  0x48   : > { %s2041_s1 = smov 105   ;;  %s2042_s26 = smov 81  }
  0x49   : > { %399 = vrot.lane.b32.xlu1 %v2222_v1, %s2027_s21  ;;  %397 = vrot.lane.b32.xlu0 %v2220_v0, %s2027_s21  ;;  %s2043_s29 = smov 89   ;;  %s2044_s21 = smov 98  }
  0x4a   : > { %p2411_p13 = scmp.ne.s32.totalorder %s2404_s24, 0 }
  0x4d   : > { %295 = vrot.lane.b32.xlu1 %v2222_v1, %s2028_s23  ;;  %293 = vrot.lane.b32.xlu0 %v2220_v0, %s2028_s23  ;;  %s2045_s23 = smov 106  }
  0x51   : > { %386 = vrot.lane.b32.xlu1 %v2222_v1, %s2029_s19  ;;  %384 = vrot.lane.b32.xlu0 %v2220_v0, %s2029_s19  ;;  %s2046_s19 = smov 82  }
  0x55   : > { %282 = vrot.lane.b32.xlu1 %v2222_v1, %s2030_s22  ;;  %280 = vrot.lane.b32.xlu0 %v2220_v0, %s2030_s22  ;;  %s2047_s22 = smov 90  }
  0x59   : > { %373 = vrot.lane.b32.xlu1 %v2222_v1, %s2031_s27  ;;  %371 = vrot.lane.b32.xlu0 %v2220_v0, %s2031_s27  ;;  %s2048_s27 = smov 99  }
  0x5d   : > { %269 = vrot.lane.b32.xlu1 %v2222_v1, %s2032_s30  ;;  %267 = vrot.lane.b32.xlu0 %v2220_v0, %s2032_s30  ;;  %s2049_s30 = smov 107  }
  0x61   : > { %360 = vrot.lane.b32.xlu1 %v2222_v1, %s2033_s7  ;;  %358 = vrot.lane.b32.xlu0 %v2220_v0, %s2033_s7  ;;  %s2050_s7 = smov 83  }
  0x65   : > { %256 = vrot.lane.b32.xlu1 %v2222_v1, %s2034_s28  ;;  %254 = vrot.lane.b32.xlu0 %v2220_v0, %s2034_s28  ;;  %s2051_s28 = smov 91  }
  0x69   : > { %347 = vrot.lane.b32.xlu1 %v2222_v1, %s2035_s8  ;;  %345 = vrot.lane.b32.xlu0 %v2220_v0, %s2035_s8  ;;  %s2052_s8 = smov 100  }
  0x6d   : > { %243 = vrot.lane.b32.xlu1 %v2222_v1, %s2036_s10  ;;  %241 = vrot.lane.b32.xlu0 %v2220_v0, %s2036_s10  ;;  %s2053_s10 = smov 108  }
  0x71   : > { %334 = vrot.lane.b32.xlu1 %v2222_v1, %s2037_s9  ;;  %332 = vrot.lane.b32.xlu0 %v2220_v0, %s2037_s9  ;;  %s2054_s9 = smov 84  }
  0x75   : > { %230 = vrot.lane.b32.xlu1 %v2222_v1, %s2038_s20  ;;  %228 = vrot.lane.b32.xlu0 %v2220_v0, %s2038_s20  ;;  %s2055_s20 = smov 92  }
  0x79   : > { %321 = vrot.lane.b32.xlu1 %v2222_v1, %s2039_s11  ;;  %319 = vrot.lane.b32.xlu0 %v2220_v0, %s2039_s11  ;;  %s2056_s11 = smov 101  }
  0x7d   : > { %620 = vrot.lane.b32.xlu1 %v2222_v1, %s2040_s18  ;;  %618 = vrot.lane.b32.xlu0 %v2220_v0, %s2040_s18  ;;  %s2057_s18 = smov 109  }
  0x81   : > { %516 = vrot.lane.b32.xlu1 %v2222_v1, %s2041_s1  ;;  %514 = vrot.lane.b32.xlu0 %v2220_v0, %s2041_s1  ;;  %s2058_s1 = smov 85  }
  0x85   : > { %828 = vrot.lane.b32.xlu1 %v2222_v1, %s2042_s26  ;;  %826 = vrot.lane.b32.xlu0 %v2220_v0, %s2042_s26  ;;  %s2059_s26 = smov 93  }
  0x89   : > { %724 = vrot.lane.b32.xlu1 %v2222_v1, %s2043_s29  ;;  %722 = vrot.lane.b32.xlu0 %v2220_v0, %s2043_s29  ;;  %s2060_s29 = smov 102  }
  0x8d   : > { %607 = vrot.lane.b32.xlu1 %v2222_v1, %s2044_s21  ;;  %605 = vrot.lane.b32.xlu0 %v2220_v0, %s2044_s21  ;;  %s2061_s21 = smov 110  }
  0x91   : > { %503 = vrot.lane.b32.xlu1 %v2222_v1, %s2045_s23  ;;  %501 = vrot.lane.b32.xlu0 %v2220_v0, %s2045_s23  ;;  %s2062_s23 = smov 86  }
  0x95   : > { %815 = vrot.lane.b32.xlu1 %v2222_v1, %s2046_s19  ;;  %813 = vrot.lane.b32.xlu0 %v2220_v0, %s2046_s19  ;;  %s2063_s19 = smov 94  }
  0x99   : > { %711 = vrot.lane.b32.xlu1 %v2222_v1, %s2047_s22  ;;  %709 = vrot.lane.b32.xlu0 %v2220_v0, %s2047_s22  ;;  %s2064_s22 = smov 103  }
  0x9d   : > { %594 = vrot.lane.b32.xlu1 %v2222_v1, %s2048_s27  ;;  %592 = vrot.lane.b32.xlu0 %v2220_v0, %s2048_s27  ;;  %s2065_s27 = smov 111  }
  0xa1   : > { %490 = vrot.lane.b32.xlu1 %v2222_v1, %s2049_s30  ;;  %488 = vrot.lane.b32.xlu0 %v2220_v0, %s2049_s30  ;;  %s2066_s30 = smov 87  }
  0xa5   : > { %802 = vrot.lane.b32.xlu1 %v2222_v1, %s2050_s7  ;;  %800 = vrot.lane.b32.xlu0 %v2220_v0, %s2050_s7  ;;  %s2067_s7 = smov 95  }
  0xa9   : > { %698 = vrot.lane.b32.xlu1 %v2222_v1, %s2051_s28  ;;  %696 = vrot.lane.b32.xlu0 %v2220_v0, %s2051_s28  ;;  %s2068_s28 = smov 104  }
  0xad   : > { %581 = vrot.lane.b32.xlu1 %v2222_v1, %s2052_s8  ;;  %579 = vrot.lane.b32.xlu0 %v2220_v0, %s2052_s8  ;;  %s2069_s8 = smov 112  }
  0xb1   : > { %477 = vrot.lane.b32.xlu1 %v2222_v1, %s2053_s10  ;;  %475 = vrot.lane.b32.xlu0 %v2220_v0, %s2053_s10  ;;  %s2070_s10 = smov 88  }
  0xb3   : > { %v307_v4 = vpop.permute.xlu1 %306  ;;  %v411_v5 = vpop.permute.xlu0 %410 }
  0xb4   : > { %v310_v6 = vrot.slane %v307_v4, 4  ;;  %v414_v7 = vrot.slane %v411_v5, 4 }
  0xb5   : > { %789 = vrot.lane.b32.xlu1 %v2222_v1, %s2054_s9  ;;  %787 = vrot.lane.b32.xlu0 %v2220_v0, %s2054_s9  ;;  %s2071_s9 = smov 96  }
  0xb6   : > { %v313_v8 = vsel %vm312_vm0, %v307_v4, %v310_v6  ;;  %v417_v9 = vsel %vm416_vm1, %v411_v5, %v414_v7 }
  0xb7   : > { %317 = vst [vmem:[#allocation2 + $0x38] sm:$0xf] %v313_v8  ;;  %421 = vst [vmem:[#allocation2 + $0x78] sm:$0xf] %v417_v9  ;;  %v309_v10 = vpop.permute.xlu1 %308  ;;  %v413_v11 = vpop.permute.xlu0 %412 }
  0xb8   : > { %v311_v12 = vrot.slane %v309_v10, 4  ;;  %v415_v13 = vrot.slane %v413_v11, 4 }
  0xb9   : > { %685 = vrot.lane.b32.xlu1 %v2222_v1, %s2055_s20  ;;  %683 = vrot.lane.b32.xlu0 %v2220_v0, %s2055_s20  ;;  %s2072_s20 = smov 80  }
  0xba   : > { %v314_v14 = vsel %vm312_vm0, %v309_v10, %v311_v12  ;;  %v418_v15 = vsel %vm416_vm1, %v413_v11, %v415_v13  ;;  %vm520_vm0 = vcmask 859136   ;;  %vm832_vm1 = vcmask 662528  }
  0xbb   : > { %318 = vst [vmem:[#allocation2 + $0x3c] sm:$0xf] %v314_v14  ;;  %422 = vst [vmem:[#allocation2 + $0x7c] sm:$0xf] %v418_v15  ;;  %v400_v16 = vpop.permute.xlu1 %399  ;;  %v398_v17 = vpop.permute.xlu0 %397 }
  0xbc   : > { %v402_v18 = vrot.slane %v400_v16, 4  ;;  %v401_v19 = vrot.slane %v398_v17, 4 }
  0xbd   : > { %568 = vrot.lane.b32.xlu1 %v2222_v1, %s2056_s11  ;;  %566 = vrot.lane.b32.xlu0 %v2220_v0, %s2056_s11 }
  0xbe   : > { %v405_v20 = vsel %vm403_vm2, %v400_v16, %v402_v18  ;;  %v404_v21 = vsel %vm403_vm2, %v398_v17, %v401_v19  ;;  %vm728_vm2 = vcmask 728064  }
  0xbf   : > { %409 = vst [vmem:[#allocation2 + $0x74] sm:$0xf] %v405_v20  ;;  %408 = vst [vmem:[#allocation2 + $0x70] sm:$0xf] %v404_v21  ;;  %v296_v22 = vpop.permute.xlu1 %295  ;;  %v294_v23 = vpop.permute.xlu0 %293 }
  0xc0   : > { %v298_v24 = vrot.slane %v296_v22, 4  ;;  %v297_v25 = vrot.slane %v294_v23, 4 }
  0xc1   : > { %464 = vrot.lane.b32.xlu1 %v2222_v1, %s2057_s18  ;;  %462 = vrot.lane.b32.xlu0 %v2220_v0, %s2057_s18 }
  0xc2   : > { %v301_v26 = vsel %vm299_vm3, %v296_v22, %v298_v24  ;;  %v300_v27 = vsel %vm299_vm3, %v294_v23, %v297_v25  ;;  %v1825_v28 = vld [vmem:[#allocation2 + $0x78] sm:$0xff]   ;;  %vm611_vm3 = vcmask 801792  }
  0xc3   : > { %305 = vst [vmem:[#allocation2 + $0x34] sm:$0xf] %v301_v26  ;;  %304 = vst [vmem:[#allocation2 + $0x30] sm:$0xf] %v300_v27  ;;  %v387_v29 = vpop.permute.xlu1 %386  ;;  %v385_v30 = vpop.permute.xlu0 %384  ;;  %v1826_v31 = vld [vmem:[#allocation2 + $0x38] sm:$0xff]   ;;  %1624 = vmatprep.subr.bf16.mxu0 %v1825_v28 }
  0xc4   : > { %v389_v32 = vrot.slane %v387_v29, 4  ;;  %v388_v33 = vrot.slane %v385_v30, 4  ;;  %1625 = vmatpush3.bf16.msra.mxu0 %v1826_v31 }
  0xc5   : > { %776 = vrot.lane.b32.xlu1 %v2222_v1, %s2058_s1  ;;  %774 = vrot.lane.b32.xlu0 %v2220_v0, %s2058_s1  ;;  %s1561_s1 = sshll.u32 %s2208_s5, 3 }
  0xc6   : > { %v392_v34 = vsel %vm390_vm4, %v387_v29, %v389_v32  ;;  %v391_v35 = vsel %vm390_vm4, %v385_v30, %v388_v33  ;;  %v1827_v36 = vld [vmem:[#allocation2 + $0x70] sm:$0xff]   ;;  %vm507_vm4 = vcmask 867328  }
  0xc7   : > { %396 = vst [vmem:[#allocation2 + $0x6c] sm:$0xf] %v392_v34  ;;  %395 = vst [vmem:[#allocation2 + $0x68] sm:$0xf] %v391_v35  ;;  %v283_v37 = vpop.permute.xlu1 %282  ;;  %v281_v38 = vpop.permute.xlu0 %280  ;;  %1626 = vmatprep.subr.bf16.mxu0 %v1827_v36 }
  0xc8   : > { %v285_v39 = vrot.slane %v283_v37, 4  ;;  %v284_v40 = vrot.slane %v281_v38, 4 }
  0xc9   : > { %672 = vrot.lane.b32.xlu1 %v2222_v1, %s2059_s26  ;;  %670 = vrot.lane.b32.xlu0 %v2220_v0, %s2059_s26  ;;  %s1620_s26 = sshll.u32 %s2011_s15, 7  ;;  %s2076_s15 = smov [#allocation8]  }
  0xca   : > { %v288_v41 = vsel %vm286_vm5, %v283_v37, %v285_v39  ;;  %v287_v42 = vsel %vm286_vm5, %v281_v38, %v284_v40  ;;  %v1828_v43 = vld [vmem:[#allocation2 + $0x30] sm:$0xff]   ;;  %vm819_vm5 = vcmask 670720  }
  0xcb   : > { %292 = vst [vmem:[#allocation2 + $0x2c] sm:$0xf] %v288_v41  ;;  %291 = vst [vmem:[#allocation2 + $0x28] sm:$0xf] %v287_v42  ;;  %v374_v44 = vpop.permute.xlu1 %373  ;;  %v372_v45 = vpop.permute.xlu0 %371  ;;  %1627 = vmatpush3.bf16.msra.mxu0 %v1828_v43 }
  0xcc   : > { %v376_v46 = vrot.slane %v374_v44, 4  ;;  %v375_v47 = vrot.slane %v372_v45, 4 }
  0xcd   : > { %555 = vrot.lane.b32.xlu1 %v2222_v1, %s2060_s29  ;;  %553 = vrot.lane.b32.xlu0 %v2220_v0, %s2060_s29  ;;  %s215_s29 = scalar_lea.vmem [#allocation8], %s1561_s1 }
  0xce   : > { %v379_v48 = vsel %vm377_vm6, %v374_v44, %v376_v46  ;;  %v378_v49 = vsel %vm377_vm6, %v372_v45, %v375_v47  ;;  %v1829_v50 = vld [vmem:[#allocation2 + $0x68] sm:$0xff]   ;;  %vm715_vm6 = vcmask 736256  }
  0xcf   : > { %383 = vst [vmem:[#allocation2 + $0x64] sm:$0xf] %v379_v48  ;;  %382 = vst [vmem:[#allocation2 + $0x60] sm:$0xf] %v378_v49  ;;  %v270_v51 = vpop.permute.xlu1 %269  ;;  %v268_v52 = vpop.permute.xlu0 %267  ;;  %1628 = vmatprep.subr.bf16.mxu0 %v1829_v50  ;;  %v2322_v50 = vld [vmem:[#allocation6 + $0x8] sm:$0xff] }
  0xd0   : > { %v272_v53 = vrot.slane %v270_v51, 4  ;;  %v271_v54 = vrot.slane %v268_v52, 4 }
  0xd1   : > { %451 = vrot.lane.b32.xlu1 %v2222_v1, %s2061_s21  ;;  %449 = vrot.lane.b32.xlu0 %v2220_v0, %s2061_s21  ;;  %s1459_s21 = sshll.u32 %s215_s29, 4  ;;  %s1460_s21 = int_to_ptr.vmem [resolvable:$true] %s1459_s21 }
  0xd2   : > { %v275_v55 = vsel %vm273_vm7, %v270_v51, %v272_v53  ;;  %v274_v56 = vsel %vm273_vm7, %v268_v52, %v271_v54  ;;  %v1830_v57 = vld [vmem:[#allocation2 + $0x28] sm:$0xff]   ;;  %v1565_v51 = vcombine.high %v2322_v50, %v2322_v50  ;;  %vm598_vm7 = vcmask 809984  }
  0xd3   : > { %279 = vst [vmem:[#allocation2 + $0x24] sm:$0xf] %v275_v55  ;;  %278 = vst [vmem:[#allocation2 + $0x20] sm:$0xf] %v274_v56  ;;  %v361_v58 = vpop.permute.xlu1 %360  ;;  %v359_v59 = vpop.permute.xlu0 %358  ;;  %1629 = vmatpush3.bf16.msra.mxu0 %v1830_v57 }
  0xd4   : > { %v363_v60 = vrot.slane %v361_v58, 4  ;;  %v362_v61 = vrot.slane %v359_v59, 4  ;;  %1354 = vmatprep.mubr.bf16.mxu1 %v1565_v51 }
  0xd5   : > { %763 = vrot.lane.b32.xlu1 %v2222_v1, %s2062_s23  ;;  %761 = vrot.lane.b32.xlu0 %v2220_v0, %s2062_s23 }
  0xd6   : > { %v366_v62 = vsel %vm364_vm8, %v361_v58, %v363_v60  ;;  %v365_v63 = vsel %vm364_vm8, %v359_v59, %v362_v61  ;;  %v1831_v3 = vld [vmem:[#allocation2 + $0x60] sm:$0xff]   ;;  %vm494_vm8 = vcmask 875520  }
  0xd7   : > { %370 = vst [vmem:[#allocation2 + $0x5c] sm:$0xf] %v366_v62  ;;  %369 = vst [vmem:[#allocation2 + $0x58] sm:$0xf] %v365_v63  ;;  %v257_v4 = vpop.permute.xlu1 %256  ;;  %v255_v5 = vpop.permute.xlu0 %254  ;;  %1630 = vmatprep.subr.bf16.mxu0 %v1831_v3  ;;  %v1842_v59 = vld [vmem:[#allocation2] sm:$0xff]  }
  0xd8   : > { %v259_v6 = vrot.slane %v257_v4, 4  ;;  %v258_v7 = vrot.slane %v255_v5, 4 }
  0xd9   : > { %659 = vrot.lane.b32.xlu1 %v2222_v1, %s2063_s19  ;;  %657 = vrot.lane.b32.xlu0 %v2220_v0, %s2063_s19 }
  0xda   : > { %v262_v8 = vsel %vm260_vm9, %v257_v4, %v259_v6  ;;  %v261_v9 = vsel %vm260_vm9, %v255_v5, %v258_v7  ;;  %v1832_v10 = vld [vmem:[#allocation2 + $0x20] sm:$0xff]   ;;  %v2330_v6 = vld [vmem:[#allocation6 + $0x10] sm:$0xff]  ;;  %vm806_vm9 = vcmask 678912  }
  0xdb   : > { %266 = vst [vmem:[#allocation2 + $0x1c] sm:$0xf] %v262_v8  ;;  %265 = vst [vmem:[#allocation2 + $0x18] sm:$0xf] %v261_v9  ;;  %v348_v11 = vpop.permute.xlu1 %347  ;;  %v346_v12 = vpop.permute.xlu0 %345  ;;  %1631 = vmatpush3.bf16.msra.mxu0 %v1832_v10  ;;  %v1562_v10 = vcombine.low %v2262_v2, %v2262_v2 }
  0xdc   : > { %v350_v13 = vrot.slane %v348_v11, 4  ;;  %v349_v14 = vrot.slane %v346_v12, 4 }
  0xdd   : > { %542 = vrot.lane.b32.xlu1 %v2222_v1, %s2064_s22  ;;  %540 = vrot.lane.b32.xlu0 %v2220_v0, %s2064_s22  ;;  %s2352_s22 = scalar_lea.hbm %s2397_s3, %s1620_s26 }
  0xde   : > { %v353_v15 = vsel %vm351_vm10, %v348_v11, %v350_v13  ;;  %v352_v16 = vsel %vm351_vm10, %v346_v12, %v349_v14  ;;  %v1833_v17 = vld [vmem:[#allocation2 + $0x58] sm:$0xff]   ;;  %v1567_v13 = vcombine.high %v2330_v6, %v2330_v6  ;;  %vm702_vm10 = vcmask 744448  }
  0xdf   : > { %357 = vst [vmem:[#allocation2 + $0x54] sm:$0xf] %v353_v15  ;;  %356 = vst [vmem:[#allocation2 + $0x50] sm:$0xf] %v352_v16  ;;  %v244_v18 = vpop.permute.xlu1 %243  ;;  %v242_v19 = vpop.permute.xlu0 %241  ;;  %1632 = vmatprep.subr.bf16.mxu0 %v1833_v17 }
  0xe0   : > { %v246_v20 = vrot.slane %v244_v18, 4  ;;  %v245_v21 = vrot.slane %v242_v19, 4 }
  0xe1   : > { %438 = vrot.lane.b32.xlu1 %v2222_v1, %s2065_s27  ;;  %436 = vrot.lane.b32.xlu0 %v2220_v0, %s2065_s27  ;;  %s1445_s27 = scalar_lea.sflag [#allocation5], %s2208_s5 }
  0xe2   : > { %v249_v22 = vsel %vm247_vm11, %v244_v18, %v246_v20  ;;  %v248_v23 = vsel %vm247_vm11, %v242_v19, %v245_v21  ;;  %v1834_v24 = vld [vmem:[#allocation2 + $0x18] sm:$0xff]   ;;  %v954_v20 = vld [vmem:[%s2396_s2] sm:$0xff]  ;;  %vm585_vm11 = vcmask 818176  }
  0xe3   : > { %253 = vst [vmem:[#allocation2 + $0x14] sm:$0xf] %v249_v22  ;;  %252 = vst [vmem:[#allocation2 + $0x10] sm:$0xf] %v248_v23  ;;  %v335_v25 = vpop.permute.xlu1 %334  ;;  %v333_v26 = vpop.permute.xlu0 %332  ;;  %1633 = vmatpush3.bf16.msra.mxu0 %v1834_v24 }
  0xe4   : > { %v337_v27 = vrot.slane %v335_v25, 4  ;;  %v336_v28 = vrot.slane %v333_v26, 4 }
  0xe5   : > { %750 = vrot.lane.b32.xlu1 %v2222_v1, %s2066_s30  ;;  %748 = vrot.lane.b32.xlu0 %v2220_v0, %s2066_s30  ;;  %s1935_s30 = scalar_lea.vmem %s1460_s21, 128 }
  0xe6   : > { %v340_v29 = vsel %vm338_vm12, %v335_v25, %v337_v27  ;;  %v339_v30 = vsel %vm338_vm12, %v333_v26, %v336_v28  ;;  %v1835_v31 = vld [vmem:[#allocation2 + $0x50] sm:$0xff]   ;;  %vm481_vm12 = vcmask 883712   ;;  %p1936_p3 = scmp.ne.s32.totalorder %s1460_s21, %s1935_s30 }
  0xe7   : > { %344 = vst [vmem:[#allocation2 + $0x4c] sm:$0xf] %v340_v29  ;;  %343 = vst [vmem:[#allocation2 + $0x48] sm:$0xf] %v339_v30  ;;  %v231_v32 = vpop.permute.xlu1 %230  ;;  %v229_v33 = vpop.permute.xlu0 %228  ;;  %1634 = vmatprep.subr.bf16.mxu0 %v1835_v31 }
  0xe8   : > { %v233_v34 = vrot.slane %v231_v32, 4  ;;  %v232_v35 = vrot.slane %v229_v33, 4  ;;  %p1937_p4 = pnand %p1936_p3, %p2411_p13 }
  0xe9   : > { %646 = vrot.lane.b32.xlu1 %v2222_v1, %s2067_s7  ;;  %644 = vrot.lane.b32.xlu0 %v2220_v0, %s2067_s7  ;;  %s1939_s7 = sshll.u32 %s2076_s15, 4  ;;  %s1940_s7 = int_to_ptr.vmem [resolvable:$false] %s1939_s7 }
  0xea   : > { %v236_v36 = vsel %vm234_vm13, %v231_v32, %v233_v34  ;;  %v235_v37 = vsel %vm234_vm13, %v229_v33, %v232_v35  ;;  %v1836_v38 = vld [vmem:[#allocation2 + $0x10] sm:$0xff]   ;;  %vm793_vm13 = vcmask 687104   ;;  %p1938_p1 = pneg %p1937_p4  ;;  %p1942_p12 = scmp.lt.s32.totalorder %s1460_s21, %s1940_s7 }
  0xeb   : > { %240 = vst [vmem:[#allocation2 + $0xc] sm:$0xf] %v236_v36  ;;  %239 = vst [vmem:[#allocation2 + $0x8] sm:$0xf] %v235_v37  ;;  %v322_v39 = vpop.permute.xlu1 %321  ;;  %v320_v40 = vpop.permute.xlu0 %319  ;;  %1635 = vmatpush3.bf16.msra.mxu0 %v1836_v38 }
  0xec   : > { %v324_v41 = vrot.slane %v322_v39, 4  ;;  %v323_v42 = vrot.slane %v320_v40, 4 }
  0xed   : > { %529 = vrot.lane.b32.xlu1 %v2222_v1, %s2068_s28  ;;  %527 = vrot.lane.b32.xlu0 %v2220_v0, %s2068_s28  ;;  %s1941_s28 = scalar_lea.vmem %s1940_s7, 256 }
  0xee   : > { %v327_v43 = vsel %vm325_vm14, %v322_v39, %v324_v41  ;;  %v326_v44 = vsel %vm325_vm14, %v320_v40, %v323_v42  ;;  %v1837_v45 = vld [vmem:[#allocation2 + $0x48] sm:$0xff]   ;;  %vm689_vm14 = vcmask 752640   ;;  %p1943_p7 = scmp.lt.s32.totalorder %s1941_s28, %s1935_s30 }
  0xef   : > { %331 = vst [vmem:[#allocation2 + $0x44] sm:$0xf] %v327_v43  ;;  %330 = vst [vmem:[#allocation2 + $0x40] sm:$0xf] %v326_v44  ;;  %v621_v46 = vpop.permute.xlu1 %620  ;;  %v619_v47 = vpop.permute.xlu0 %618  ;;  %1636 = vmatprep.subr.bf16.mxu0 %v1837_v45 }
  0xf0   : > { %v623_v48 = vrot.slane %v621_v46, 4  ;;  %v622_v49 = vrot.slane %v619_v47, 4  ;;  %p1944_p8 = por %p1943_p7, %p1942_p12 }
  0xf1   : > { %425 = vrot.lane.b32.xlu1 %v2222_v1, %s2069_s8  ;;  %423 = vrot.lane.b32.xlu0 %v2220_v0, %s2069_s8 }
  0xf2   : > { %v626_v52 = vsel %vm624_vm15, %v621_v46, %v623_v48  ;;  %v625_v53 = vsel %vm624_vm15, %v619_v47, %v622_v49  ;;  %v1838_v54 = vld [vmem:[#allocation2 + $0x8] sm:$0xff]   ;;  %vm572_vm15 = vcmask 826368   ;;  %p1945_p9 = pnand %p1944_p8, %p1938_p1 }
  0xf3   : > { %630 = vst [vmem:[#allocation2 + $0xfc] sm:$0xf] %v626_v52  ;;  %629 = vst [vmem:[#allocation2 + $0xf8] sm:$0xf] %v625_v53  ;;  %v517_v55 = vpop.permute.xlu1 %516  ;;  %v515_v56 = vpop.permute.xlu0 %514  ;;  %1637 = vmatpush3.bf16.msra.mxu0 %v1838_v54 }
  0xf4   : > { %v519_v57 = vrot.slane %v517_v55, 4  ;;  %v518_v58 = vrot.slane %v515_v56, 4 }
  0xf5   : > { %737 = vrot.lane.b32.xlu1 %v2222_v1, %s2070_s10  ;;  %735 = vrot.lane.b32.xlu0 %v2220_v0, %s2070_s10 }
  0xf6   : > { %v522_v60 = vsel %vm520_vm0, %v517_v55, %v519_v57  ;;  %v521_v61 = vsel %vm520_vm0, %v515_v56, %v518_v58  ;;  %v1839_v62 = vld [vmem:[#allocation2 + $0x40] sm:$0xff]   ;;  %vm468_vm0 = vcmask 891904  }
  0xf7   : > { %526 = vst [vmem:[#allocation2 + $0xbc] sm:$0xf] %v522_v60  ;;  %525 = vst [vmem:[#allocation2 + $0xb8] sm:$0xf] %v521_v61  ;;  %v829_v63 = vpop.permute.xlu1 %828  ;;  %v827_v3 = vpop.permute.xlu0 %826  ;;  %1638 = vmatprep.subr.bf16.mxu0 %v1839_v62 }
  0xf8   : > { %v831_v4 = vrot.slane %v829_v63, 4  ;;  %v830_v5 = vrot.slane %v827_v3, 4  ;;  %1639 = vmatpush3.bf16.msra.mxu0 %v1842_v59 }
  0xf9   : > { %633 = vrot.lane.b32.xlu1 %v2222_v1, %s2071_s9  ;;  %631 = vrot.lane.b32.xlu0 %v2220_v0, %s2071_s9 }
  0xfa   : > { %v834_v7 = vsel %vm832_vm1, %v829_v63, %v831_v4  ;;  %v833_v8 = vsel %vm832_vm1, %v827_v3, %v830_v5  ;;  %v1840_v9 = vld [vmem:[#allocation2 + $0xf8] sm:$0xff]   ;;  %vm780_vm1 = vcmask 695296  }
  0xfb   : > { %838 = vst [vmem:[#allocation2 + $0x17c] sm:$0xf] %v834_v7  ;;  %837 = vst [vmem:[#allocation2 + $0x178] sm:$0xf] %v833_v8  ;;  %v725_v11 = vpop.permute.xlu1 %724  ;;  %v723_v12 = vpop.permute.xlu0 %722  ;;  %1646 = vmatprep.subr.bf16.mxu1 %v1840_v9  ;;  %1315 = vmatmul.mubr.bf16.vlgmr.msra.gmra.mxu0 %v1562_v10 }
  0xfc   : > { %v727_v14 = vrot.slane %v725_v11, 4  ;;  %v726_v15 = vrot.slane %v723_v12, 4  ;;  %1394 = vmatprep.mubr.bf16.mxu0 %v1567_v13 }
  0xfd   : > { %841 = vrot.lane.b32.xlu1 %v2222_v1, %s2072_s20  ;;  %839 = vrot.lane.b32.xlu0 %v2220_v0, %s2072_s20  ;;  %v2073_v1 = vmov 0  }
  0xfe   : > { %v730_v16 = vsel %vm728_vm2, %v725_v11, %v727_v14  ;;  %v729_v17 = vsel %vm728_vm2, %v723_v12, %v726_v15  ;;  %v1841_v18 = vld [vmem:[#allocation2 + $0xb8] sm:$0xff]   ;;  %1824 = vset.pattern.permute.xlu0 %v2073_v1  ;;  %vm676_vm2 = vcmask 760832  }
  0xff   : > { %734 = vst [vmem:[#allocation2 + $0x13c] sm:$0xf] %v730_v16  ;;  %733 = vst [vmem:[#allocation2 + $0x138] sm:$0xf] %v729_v17  ;;  %v608_v2 = vpop.permute.xlu1 %607  ;;  %v606_v19 = vpop.permute.xlu0 %605  ;;  %1647 = vmatpush3.bf16.msra.mxu1 %v1841_v18 }
 0x100   : > { %v610_v21 = vrot.slane %v608_v2, 4  ;;  %v609_v22 = vrot.slane %v606_v19, 4 }
 0x101   : > { %957 = vperm.xlu0 %1824, %v954_v20  }
 0x102   : > { %v613_v0 = vsel %vm611_vm3, %v608_v2, %v610_v21  ;;  %v612_v23 = vsel %vm611_vm3, %v606_v19, %v609_v22  ;;  %v1843_v24 = vld [vmem:[#allocation2 + $0x178] sm:$0xff]   ;;  %vm559_vm3 = vcmask 834560  }
 0x103   : > { %617 = vst [vmem:[#allocation2 + $0xf4] sm:$0xf] %v613_v0  ;;  %616 = vst [vmem:[#allocation2 + $0xf0] sm:$0xf] %v612_v23  ;;  %v504_v25 = vpop.permute.xlu1 %503  ;;  %v502_v26 = vpop.permute.xlu0 %501  ;;  %1668 = vmatprep.subr.bf16.mxu0 %v1843_v24 }
 0x104   : > { %v506_v27 = vrot.slane %v504_v25, 4  ;;  %v505_v28 = vrot.slane %v502_v26, 4 }
 0x106   : > { %v509_v29 = vsel %vm507_vm4, %v504_v25, %v506_v27  ;;  %v508_v30 = vsel %vm507_vm4, %v502_v26, %v505_v28  ;;  %v1846_v31 = vld [vmem:[#allocation2 + $0x138] sm:$0xff]   ;;  %vm455_vm4 = vcmask 900096  }
 0x107   : > { %513 = vst [vmem:[#allocation2 + $0xb4] sm:$0xf] %v509_v29  ;;  %512 = vst [vmem:[#allocation2 + $0xb0] sm:$0xf] %v508_v30  ;;  %v816_v32 = vpop.permute.xlu1 %815  ;;  %v814_v33 = vpop.permute.xlu0 %813  ;;  %1669 = vmatpush3.bf16.msra.mxu0 %v1846_v31 }
 0x108   : > { %v818_v34 = vrot.slane %v816_v32, 4  ;;  %v817_v35 = vrot.slane %v814_v33, 4 }
 0x10a   : > { %v821_v36 = vsel %vm819_vm5, %v816_v32, %v818_v34  ;;  %v820_v37 = vsel %vm819_vm5, %v814_v33, %v817_v35  ;;  %v1847_v38 = vld [vmem:[#allocation2 + $0xf0] sm:$0xff]   ;;  %vm767_vm5 = vcmask 703488  }
 0x10b   : > { %825 = vst [vmem:[#allocation2 + $0x174] sm:$0xf] %v821_v36  ;;  %824 = vst [vmem:[#allocation2 + $0x170] sm:$0xf] %v820_v37  ;;  %v712_v39 = vpop.permute.xlu1 %711  ;;  %v710_v40 = vpop.permute.xlu0 %709  ;;  %1648 = vmatprep.subr.bf16.mxu1 %v1847_v38 }
 0x10c   : > { %v714_v41 = vrot.slane %v712_v39, 4  ;;  %v713_v42 = vrot.slane %v710_v40, 4 }
 0x10e   : > { %v717_v43 = vsel %vm715_vm6, %v712_v39, %v714_v41  ;;  %v716_v44 = vsel %vm715_vm6, %v710_v40, %v713_v42  ;;  %v1848_v45 = vld [vmem:[#allocation2 + $0xb0] sm:$0xff]   ;;  %vm663_vm6 = vcmask 769024  }
 0x10f   : > { %721 = vst [vmem:[#allocation2 + $0x134] sm:$0xf] %v717_v43  ;;  %720 = vst [vmem:[#allocation2 + $0x130] sm:$0xf] %v716_v44  ;;  %v595_v46 = vpop.permute.xlu1 %594  ;;  %v593_v47 = vpop.permute.xlu0 %592  ;;  %1649 = vmatpush3.bf16.msra.mxu1 %v1848_v45 }
 0x110   : > { %v597_v48 = vrot.slane %v595_v46, 4  ;;  %v596_v49 = vrot.slane %v593_v47, 4 }
 0x112   : > { %v600_v51 = vsel %vm598_vm7, %v595_v46, %v597_v48  ;;  %v599_v52 = vsel %vm598_vm7, %v593_v47, %v596_v49  ;;  %v1849_v53 = vld [vmem:[#allocation2 + $0x170] sm:$0xff]   ;;  %vm546_vm7 = vcmask 842752  }
 0x113   : > { %604 = vst [vmem:[#allocation2 + $0xec] sm:$0xf] %v600_v51  ;;  %603 = vst [vmem:[#allocation2 + $0xe8] sm:$0xf] %v599_v52  ;;  %v491_v54 = vpop.permute.xlu1 %490  ;;  %v489_v55 = vpop.permute.xlu0 %488  ;;  %1670 = vmatprep.subr.bf16.mxu0 %v1849_v53 }
 0x114   : > { %v493_v56 = vrot.slane %v491_v54, 4  ;;  %v492_v57 = vrot.slane %v489_v55, 4 }
 0x116   : > { %v496_v58 = vsel %vm494_vm8, %v491_v54, %v493_v56  ;;  %v495_v59 = vsel %vm494_vm8, %v489_v55, %v492_v57  ;;  %v1850_v60 = vld [vmem:[#allocation2 + $0x130] sm:$0xff]   ;;  %vm442_vm8 = vcmask 908288  }
 0x117   : > { %500 = vst [vmem:[#allocation2 + $0xac] sm:$0xf] %v496_v58  ;;  %499 = vst [vmem:[#allocation2 + $0xa8] sm:$0xf] %v495_v59  ;;  %v803_v61 = vpop.permute.xlu1 %802  ;;  %v801_v62 = vpop.permute.xlu0 %800  ;;  %1671 = vmatpush3.bf16.msra.mxu0 %v1850_v60 }
 0x118   : > { %v805_v63 = vrot.slane %v803_v61, 4  ;;  %v804_v3 = vrot.slane %v801_v62, 4 }
 0x11a   : > { %v808_v4 = vsel %vm806_vm9, %v803_v61, %v805_v63  ;;  %v807_v5 = vsel %vm806_vm9, %v801_v62, %v804_v3  ;;  %v1851_v7 = vld [vmem:[#allocation2 + $0xe8] sm:$0xff]   ;;  %vm754_vm9 = vcmask 711680  }
 0x11b   : > { %812 = vst [vmem:[#allocation2 + $0x16c] sm:$0xf] %v808_v4  ;;  %811 = vst [vmem:[#allocation2 + $0x168] sm:$0xf] %v807_v5  ;;  %v699_v8 = vpop.permute.xlu1 %698  ;;  %v697_v9 = vpop.permute.xlu0 %696  ;;  %1650 = vmatprep.subr.bf16.mxu1 %v1851_v7 }
 0x11c   : > { %v701_v10 = vrot.slane %v699_v8, 4  ;;  %v700_v11 = vrot.slane %v697_v9, 4 }
 0x11e   : > { %v704_v12 = vsel %vm702_vm10, %v699_v8, %v701_v10  ;;  %v703_v13 = vsel %vm702_vm10, %v697_v9, %v700_v11  ;;  %v1852_v14 = vld [vmem:[#allocation2 + $0xa8] sm:$0xff]   ;;  %vm650_vm10 = vcmask 777216  }
 0x11f   : > { %708 = vst [vmem:[#allocation2 + $0x12c] sm:$0xf] %v704_v12  ;;  %707 = vst [vmem:[#allocation2 + $0x128] sm:$0xf] %v703_v13  ;;  %v582_v15 = vpop.permute.xlu1 %581  ;;  %v580_v16 = vpop.permute.xlu0 %579  ;;  %1651 = vmatpush3.bf16.msra.mxu1 %v1852_v14 }
 0x120   : > { %v584_v17 = vrot.slane %v582_v15, 4  ;;  %v583_v18 = vrot.slane %v580_v16, 4 }
 0x122   : > { %v587_v2 = vsel %vm585_vm11, %v582_v15, %v584_v17  ;;  %v586_v19 = vsel %vm585_vm11, %v580_v16, %v583_v18  ;;  %v1853_v20 = vld [vmem:[#allocation2 + $0x168] sm:$0xff]   ;;  %vm533_vm11 = vcmask 850944  }
 0x123   : > { %591 = vst [vmem:[#allocation2 + $0xe4] sm:$0xf] %v587_v2  ;;  %590 = vst [vmem:[#allocation2 + $0xe0] sm:$0xf] %v586_v19  ;;  %v478_v21 = vpop.permute.xlu1 %477  ;;  %v476_v22 = vpop.permute.xlu0 %475  ;;  %1672 = vmatprep.subr.bf16.mxu0 %v1853_v20 }
 0x124   : > { %v480_v1 = vrot.slane %v478_v21, 4  ;;  %v479_v0 = vrot.slane %v476_v22, 4 }
 0x126   : > { %v483_v23 = vsel %vm481_vm12, %v478_v21, %v480_v1  ;;  %v482_v24 = vsel %vm481_vm12, %v476_v22, %v479_v0  ;;  %v1854_v25 = vld [vmem:[#allocation2 + $0x128] sm:$0xff]   ;;  %vm429_vm12 = vcmask 916480  }
 0x127   : > { %487 = vst [vmem:[#allocation2 + $0xa4] sm:$0xf] %v483_v23  ;;  %486 = vst [vmem:[#allocation2 + $0xa0] sm:$0xf] %v482_v24  ;;  %v790_v26 = vpop.permute.xlu1 %789  ;;  %v788_v27 = vpop.permute.xlu0 %787  ;;  %1673 = vmatpush3.bf16.msra.mxu0 %v1854_v25 }
 0x128   : > { %v792_v28 = vrot.slane %v790_v26, 4  ;;  %v791_v29 = vrot.slane %v788_v27, 4 }
 0x12a   : > { %v795_v30 = vsel %vm793_vm13, %v790_v26, %v792_v28  ;;  %v794_v31 = vsel %vm793_vm13, %v788_v27, %v791_v29  ;;  %v1855_v32 = vld [vmem:[#allocation2 + $0xe0] sm:$0xff]   ;;  %vm741_vm13 = vcmask 719872  }
 0x12b   : > { %799 = vst [vmem:[#allocation2 + $0x164] sm:$0xf] %v795_v30  ;;  %798 = vst [vmem:[#allocation2 + $0x160] sm:$0xf] %v794_v31  ;;  %v686_v33 = vpop.permute.xlu1 %685  ;;  %v684_v34 = vpop.permute.xlu0 %683  ;;  %1652 = vmatprep.subr.bf16.mxu1 %v1855_v32 }
 0x12c   : > { %v688_v35 = vrot.slane %v686_v33, 4  ;;  %v687_v36 = vrot.slane %v684_v34, 4 }
 0x12e   : > { %v691_v37 = vsel %vm689_vm14, %v686_v33, %v688_v35  ;;  %v690_v38 = vsel %vm689_vm14, %v684_v34, %v687_v36  ;;  %v1856_v39 = vld [vmem:[#allocation2 + $0xa0] sm:$0xff]   ;;  %vm637_vm14 = vcmask 785408  }
 0x12f   : > { %695 = vst [vmem:[#allocation2 + $0x124] sm:$0xf] %v691_v37  ;;  %694 = vst [vmem:[#allocation2 + $0x120] sm:$0xf] %v690_v38  ;;  %v569_v40 = vpop.permute.xlu1 %568  ;;  %v567_v41 = vpop.permute.xlu0 %566  ;;  %1653 = vmatpush3.bf16.msra.mxu1 %v1856_v39 }
 0x130   : > { %v571_v42 = vrot.slane %v569_v40, 4  ;;  %v570_v43 = vrot.slane %v567_v41, 4 }
 0x132   : > { %v574_v44 = vsel %vm572_vm15, %v569_v40, %v571_v42  ;;  %v573_v45 = vsel %vm572_vm15, %v567_v41, %v570_v43  ;;  %v1857_v46 = vld [vmem:[#allocation2 + $0x160] sm:$0xff]   ;;  %vm845_vm15 = vcmask 654336  }
 0x133   : > { %578 = vst [vmem:[#allocation2 + $0xdc] sm:$0xf] %v574_v44  ;;  %577 = vst [vmem:[#allocation2 + $0xd8] sm:$0xf] %v573_v45  ;;  %v465_v47 = vpop.permute.xlu1 %464  ;;  %v463_v48 = vpop.permute.xlu0 %462  ;;  %1674 = vmatprep.subr.bf16.mxu0 %v1857_v46 }
 0x134   : > { %v467_v49 = vrot.slane %v465_v47, 4  ;;  %v466_v51 = vrot.slane %v463_v48, 4 }
 0x136   : > { %v470_v52 = vsel %vm468_vm0, %v465_v47, %v467_v49  ;;  %v469_v53 = vsel %vm468_vm0, %v463_v48, %v466_v51  ;;  %v1858_v54 = vld [vmem:[#allocation2 + $0x120] sm:$0xff]   ;;  %vm2075_vm0 = vmmov 0  }
 0x137   : > { %474 = vst [vmem:[#allocation2 + $0x9c] sm:$0xf] %v470_v52  ;;  %473 = vst [vmem:[#allocation2 + $0x98] sm:$0xf] %v469_v53  ;;  %v777_v55 = vpop.permute.xlu1 %776  ;;  %v775_v56 = vpop.permute.xlu0 %774  ;;  %1675 = vmatpush3.bf16.msra.mxu0 %v1858_v54 }
 0x138   : > { %v779_v57 = vrot.slane %v777_v55, 4  ;;  %v778_v58 = vrot.slane %v775_v56, 4 }
 0x13a   : > { %v782_v59 = vsel %vm780_vm1, %v777_v55, %v779_v57  ;;  %v781_v60 = vsel %vm780_vm1, %v775_v56, %v778_v58  ;;  %v1859_v61 = vld [vmem:[#allocation2 + $0xd8] sm:$0xff]   ;;  %vm1278_vm1 = vcmask 130048  }
 0x13b   : > { %786 = vst [vmem:[#allocation2 + $0x15c] sm:$0xf] %v782_v59  ;;  %785 = vst [vmem:[#allocation2 + $0x158] sm:$0xf] %v781_v60  ;;  %v673_v62 = vpop.permute.xlu1 %672  ;;  %v671_v63 = vpop.permute.xlu0 %670  ;;  %1654 = vmatprep.subr.bf16.mxu1 %v1859_v61 }
 0x13c   : > { %v675_v3 = vrot.slane %v673_v62, 4  ;;  %v674_v4 = vrot.slane %v671_v63, 4 }
 0x13e   : > { %v678_v5 = vsel %vm676_vm2, %v673_v62, %v675_v3  ;;  %v677_v7 = vsel %vm676_vm2, %v671_v63, %v674_v4  ;;  %v1860_v8 = vld [vmem:[#allocation2 + $0x98] sm:$0xff]  }
 0x13f   : > { %682 = vst [vmem:[#allocation2 + $0x11c] sm:$0xf] %v678_v5  ;;  %681 = vst [vmem:[#allocation2 + $0x118] sm:$0xf] %v677_v7  ;;  %v556_v9 = vpop.permute.xlu1 %555  ;;  %v554_v10 = vpop.permute.xlu0 %553  ;;  %1655 = vmatpush3.bf16.msra.mxu1 %v1860_v8 }
 0x140   : > { %v558_v11 = vrot.slane %v556_v9, 4  ;;  %v557_v12 = vrot.slane %v554_v10, 4 }
 0x142   : > { %v561_v13 = vsel %vm559_vm3, %v556_v9, %v558_v11  ;;  %v560_v14 = vsel %vm559_vm3, %v554_v10, %v557_v12  ;;  %v1861_v15 = vld [vmem:[#allocation2 + $0x158] sm:$0xff]  }
 0x143   : > { %565 = vst [vmem:[#allocation2 + $0xd4] sm:$0xf] %v561_v13  ;;  %564 = vst [vmem:[#allocation2 + $0xd0] sm:$0xf] %v560_v14  ;;  %v452_v16 = vpop.permute.xlu1 %451  ;;  %v450_v17 = vpop.permute.xlu0 %449  ;;  %1676 = vmatprep.subr.bf16.mxu0 %v1861_v15 }
 0x144   : > { %v454_v18 = vrot.slane %v452_v16, 4  ;;  %v453_v2 = vrot.slane %v450_v17, 4 }
 0x146   : > { %v457_v19 = vsel %vm455_vm4, %v452_v16, %v454_v18  ;;  %v456_v20 = vsel %vm455_vm4, %v450_v17, %v453_v2  ;;  %v1862_v21 = vld [vmem:[#allocation2 + $0x118] sm:$0xff]  }
 0x147   : > { %461 = vst [vmem:[#allocation2 + $0x94] sm:$0xf] %v457_v19  ;;  %460 = vst [vmem:[#allocation2 + $0x90] sm:$0xf] %v456_v20  ;;  %v764_v22 = vpop.permute.xlu1 %763  ;;  %v762_v1 = vpop.permute.xlu0 %761  ;;  %1677 = vmatpush3.bf16.msra.mxu0 %v1862_v21 }
 0x148   : > { %v766_v0 = vrot.slane %v764_v22, 4  ;;  %v765_v23 = vrot.slane %v762_v1, 4 }
 0x14a   : > { %v769_v24 = vsel %vm767_vm5, %v764_v22, %v766_v0  ;;  %v768_v25 = vsel %vm767_vm5, %v762_v1, %v765_v23  ;;  %v1863_v26 = vld [vmem:[#allocation2 + $0xd0] sm:$0xff]  }
 0x14b   : > { %773 = vst [vmem:[#allocation2 + $0x154] sm:$0xf] %v769_v24  ;;  %772 = vst [vmem:[#allocation2 + $0x150] sm:$0xf] %v768_v25  ;;  %v660_v27 = vpop.permute.xlu1 %659  ;;  %v658_v28 = vpop.permute.xlu0 %657  ;;  %1656 = vmatprep.subr.bf16.mxu1 %v1863_v26 }
 0x14c   : > { %v662_v29 = vrot.slane %v660_v27, 4  ;;  %v661_v30 = vrot.slane %v658_v28, 4 }
 0x14e   : > { %v665_v31 = vsel %vm663_vm6, %v660_v27, %v662_v29  ;;  %v664_v32 = vsel %vm663_vm6, %v658_v28, %v661_v30  ;;  %v1864_v33 = vld [vmem:[#allocation2 + $0x90] sm:$0xff]   ;;  %v1564_v30 = vcombine.low %v2322_v50, %v2322_v50 }
 0x14f   : > { %669 = vst [vmem:[#allocation2 + $0x114] sm:$0xf] %v665_v31  ;;  %668 = vst [vmem:[#allocation2 + $0x110] sm:$0xf] %v664_v32  ;;  %v543_v34 = vpop.permute.xlu1 %542  ;;  %v541_v35 = vpop.permute.xlu0 %540  ;;  %1657 = vmatpush3.bf16.msra.mxu1 %v1864_v33  ;;  %v2074_v33 = vmov 0.0  }
 0x150   : > { %v545_v36 = vrot.slane %v543_v34, 4  ;;  %v544_v37 = vrot.slane %v541_v35, 4 }
 0x152   : > { %v548_v38 = vsel %vm546_vm7, %v543_v34, %v545_v36  ;;  %v547_v39 = vsel %vm546_vm7, %v541_v35, %v544_v37  ;;  %v1865_v40 = vld [vmem:[#allocation2 + $0x150] sm:$0xff]  }
 0x153   : > { %552 = vst [vmem:[#allocation2 + $0xcc] sm:$0xf] %v548_v38  ;;  %551 = vst [vmem:[#allocation2 + $0xc8] sm:$0xf] %v547_v39  ;;  %v439_v41 = vpop.permute.xlu1 %438  ;;  %v437_v42 = vpop.permute.xlu0 %436  ;;  %1678 = vmatprep.subr.bf16.mxu0 %v1865_v40  ;;  %v1566_v38 = vcombine.low %v2330_v6, %v2330_v6  ;;  %v1880_v39 = vld [vmem:[#allocation6 + $0x18] ss:$0 sps:$4 sm:$0xff]  }
 0x154   : > { %v441_v43 = vrot.slane %v439_v41, 4  ;;  %v440_v44 = vrot.slane %v437_v42, 4 }
 0x156   : > { %v444_v45 = vsel %vm442_vm8, %v439_v41, %v441_v43  ;;  %v443_v46 = vsel %vm442_vm8, %v437_v42, %v440_v44  ;;  %v1866_v47 = vld [vmem:[#allocation2 + $0x110] sm:$0xff]  }
 0x157   : > { %448 = vst [vmem:[#allocation2 + $0x8c] sm:$0xf] %v444_v45  ;;  %447 = vst [vmem:[#allocation2 + $0x88] sm:$0xf] %v443_v46  ;;  %v751_v48 = vpop.permute.xlu1 %750  ;;  %v749_v49 = vpop.permute.xlu0 %748  ;;  %1679 = vmatpush3.bf16.msra.mxu0 %v1866_v47 }
 0x158   : > { %v753_v51 = vrot.slane %v751_v48, 4  ;;  %v752_v52 = vrot.slane %v749_v49, 4 }
 0x15a   : > { %v756_v53 = vsel %vm754_vm9, %v751_v48, %v753_v51  ;;  %v755_v54 = vsel %vm754_vm9, %v749_v49, %v752_v52  ;;  %v1867_v55 = vld [vmem:[#allocation2 + $0xc8] sm:$0xff]  }
 0x15b   : > { %760 = vst [vmem:[#allocation2 + $0x14c] sm:$0xf] %v756_v53  ;;  %759 = vst [vmem:[#allocation2 + $0x148] sm:$0xf] %v755_v54  ;;  %v647_v56 = vpop.permute.xlu1 %646  ;;  %v645_v57 = vpop.permute.xlu0 %644  ;;  %1658 = vmatprep.subr.bf16.mxu1 %v1867_v55 }
 0x15c   : > { %v649_v58 = vrot.slane %v647_v56, 4  ;;  %v648_v59 = vrot.slane %v645_v57, 4 }
 0x15e   : > { %v652_v60 = vsel %vm650_vm10, %v647_v56, %v649_v58  ;;  %v651_v61 = vsel %vm650_vm10, %v645_v57, %v648_v59  ;;  %v1868_v62 = vld [vmem:[#allocation2 + $0x88] sm:$0xff]  }
 0x15f   : > { %656 = vst [vmem:[#allocation2 + $0x10c] sm:$0xf] %v652_v60  ;;  %655 = vst [vmem:[#allocation2 + $0x108] sm:$0xf] %v651_v61  ;;  %v530_v63 = vpop.permute.xlu1 %529  ;;  %v528_v3 = vpop.permute.xlu0 %527  ;;  %1659 = vmatpush3.bf16.msra.mxu1 %v1868_v62 }
 0x160   : > { %v532_v4 = vrot.slane %v530_v63, 4  ;;  %v531_v5 = vrot.slane %v528_v3, 4 }
 0x162   : > { %v535_v7 = vsel %vm533_vm11, %v530_v63, %v532_v4  ;;  %v534_v8 = vsel %vm533_vm11, %v528_v3, %v531_v5  ;;  %v1869_v9 = vld [vmem:[#allocation2 + $0x148] sm:$0xff]  }
 0x163   : > { %539 = vst [vmem:[#allocation2 + $0xc4] sm:$0xf] %v535_v7  ;;  %538 = vst [vmem:[#allocation2 + $0xc0] sm:$0xf] %v534_v8  ;;  %v426_v10 = vpop.permute.xlu1 %425  ;;  %v424_v11 = vpop.permute.xlu0 %423  ;;  %1680 = vmatprep.subr.bf16.mxu0 %v1869_v9 }
 0x164   : > { %v428_v12 = vrot.slane %v426_v10, 4  ;;  %v427_v13 = vrot.slane %v424_v11, 4 }
 0x166   : > { %v431_v14 = vsel %vm429_vm12, %v426_v10, %v428_v12  ;;  %v430_v15 = vsel %vm429_vm12, %v424_v11, %v427_v13  ;;  %v1870_v16 = vld [vmem:[#allocation2 + $0x108] sm:$0xff]  }
 0x167   : > { %435 = vst [vmem:[#allocation2 + $0x84] sm:$0xf] %v431_v14  ;;  %434 = vst [vmem:[#allocation2 + $0x80] sm:$0xf] %v430_v15  ;;  %v738_v17 = vpop.permute.xlu1 %737  ;;  %v736_v18 = vpop.permute.xlu0 %735  ;;  %1681 = vmatpush3.bf16.msra.mxu0 %v1870_v16 }
 0x168   : > { %v740_v2 = vrot.slane %v738_v17, 4  ;;  %v739_v19 = vrot.slane %v736_v18, 4 }
 0x16a   : > { %v743_v20 = vsel %vm741_vm13, %v738_v17, %v740_v2  ;;  %v742_v21 = vsel %vm741_vm13, %v736_v18, %v739_v19  ;;  %v1871_v22 = vld [vmem:[#allocation2 + $0xc0] sm:$0xff]  }
 0x16b   : > { %747 = vst [vmem:[#allocation2 + $0x144] sm:$0xf] %v743_v20  ;;  %746 = vst [vmem:[#allocation2 + $0x140] sm:$0xf] %v742_v21  ;;  %v634_v1 = vpop.permute.xlu1 %633  ;;  %v632_v0 = vpop.permute.xlu0 %631  ;;  %1660 = vmatprep.subr.bf16.mxu1 %v1871_v22 }
 0x16c   : > { %v636_v23 = vrot.slane %v634_v1, 4  ;;  %v635_v24 = vrot.slane %v632_v0, 4 }
 0x16e   : > { %v639_v25 = vsel %vm637_vm14, %v634_v1, %v636_v23  ;;  %v638_v26 = vsel %vm637_vm14, %v632_v0, %v635_v24  ;;  %v1872_v27 = vld [vmem:[#allocation2 + $0x80] sm:$0xff]  }
 0x16f   : > { %643 = vst [vmem:[#allocation2 + $0x104] sm:$0xf] %v639_v25  ;;  %642 = vst [vmem:[#allocation2 + $0x100] sm:$0xf] %v638_v26  ;;  %v842_v28 = vpop.permute.xlu1 %841  ;;  %v840_v29 = vpop.permute.xlu0 %839  ;;  %1661 = vmatpush3.bf16.msra.mxu1 %v1872_v27 }
 0x170   : > { %v844_v31 = vrot.slane %v842_v28, 4  ;;  %v843_v32 = vrot.slane %v840_v29, 4  ;;  %1692 = vmatprep.subr.bf16.mxu1 %v2074_v33 }
 0x172   : > { %v847_v34 = vsel %vm845_vm15, %v842_v28, %v844_v31  ;;  %v846_v35 = vsel %vm845_vm15, %v840_v29, %v843_v32  ;;  %v1875_v36 = vld [vmem:[#allocation2 + $0x140] sm:$0xff]   ;;  %1355 = vmatmul.mubr.bf16.vlgmr.msra.gmra.mxu1 %v1564_v30 }
 0x173   : > { %851 = vst [vmem:[#allocation2 + $0x184] sm:$0xf] %v847_v34  ;;  %850 = vst [vmem:[#allocation2 + $0x180] sm:$0xf] %v846_v35  ;;  %1682 = vmatprep.subr.bf16.mxu0 %v1875_v36  ;;  %1694 = vmatprep.mubr.msk.bf16.mxu1 %vm2075_vm0, %v2074_v33 }
 0x176   : > { %v1876_v37 = vld [vmem:[#allocation2 + $0x100] sm:$0xff]  }
 0x177   : > { %1683 = vmatpush3.bf16.msra.mxu0 %v1876_v37 }
 0x17a   : > { %v1879_v50 = vld [vmem:[#allocation2 + $0x180] sm:$0xff]   ;;  %1395 = vmatmul.mubr.bf16.vlgmr.msra.gmra.mxu0 %v1566_v38 }
 0x17b   : > { %1693 = vmatpush3.bf16.msra.mxu1 %v1879_v50 }
 0x17c   : > { %v958_v48 = vpop.permute.xlu0 %957 }
 0x17e   : > { %1695 = vmatmul.mubr.msk.bf16.vlgmr.msra.gmra.mxu1 %vm1278_vm1, %v1880_v39 }
 0x1bb   : > { %v1640_v40 = vpop.f32.mrf.mxu0 }
 0x1bd   : > { %v1641_v41 = vpop.f32.mrf.mxu0 }
 0x1be   : > { %v1642_v42 = vadd.f32 %v1641_v41, %v1640_v40 }
 0x1bf   : > { %v1643_v43 = vpop.f32.mrf.mxu0 }
 0x1c0   : > { %v1317_v52 = vadd.f32 %v1642_v42, %v958_v48 }
 0x1c1   : > { %v1644_v44 = vpop.f32.mrf.mxu0 }
 0x232   : > { %v1662_v45 = vpop.f32.mrf.mxu1 }
 0x234   : > { %v1663_v46 = vpop.f32.mrf.mxu1 }
 0x235   : > { %v1664_v6 = vadd.f32 %v1663_v46, %v1662_v45 }
 0x236   : > { %v1665_v47 = vpop.f32.mrf.mxu1 }
 0x237   : > { %v1357_v54 = vadd.f32 %v1664_v6, %v1317_v52 }
 0x238   : > { %v1666_v49 = vpop.f32.mrf.mxu1 }
 0x23a   : > { %v1684_v51 = vpop.f32.mrf.mxu0 }
 0x23c   : > { %v1685_v53 = vpop.f32.mrf.mxu0 }
 0x23d   : > { %v1686_v55 = vadd.f32 %v1685_v53, %v1684_v51 }
 0x23e   : > { %v1687_v56 = vpop.f32.mrf.mxu0  ;;  %v1436_v57 = vpop.f32.mrf.mxu1 }
 0x23f   : > { %v1397_v58 = vadd.f32 %v1686_v55, %v1357_v54 }
 0x240   : > { %v1688_v59 = vpop.f32.mrf.mxu0  ;;  %v1696_v60 = vpop.f32.mrf.mxu1 }
 0x241   : > { %v1437_v61 = vadd.f32 %v1436_v57, %v1397_v58 }
 0x242   : > { %v1439_v62 = vpop.f32.mrf.mxu1 }
 0x243   : > { %v1442_v63 = vmax.f32 %v1437_v61, 0.0 }
 0x244   : > { %v1697_v3 = vpop.f32.mrf.mxu1 }
 0x245   : > { %1443 = vst [vmem:[%s215_s29] sm:$0xff] %v1442_v63 }
 0x246   : > { %1948 = shalt.err (!%p1945_p9)
}
 0x247   : > { %s1949_s8 = scalar_lea.hbm %s2352_s22, 128  ;;  %s1953_s9 = scalar_lea.hbm %s2397_s3, 256 }
 0x248   : > { %p1950_p0 = scmp.ne.s32.totalorder %s2352_s22, %s1949_s8  ;;  %p1954_p10 = scmp.lt.s32.totalorder %s2352_s22, %s2397_s3 }
 0x249   : > { %p1955_p11 = scmp.lt.s32.totalorder %s1953_s9, %s1949_s8 }
 0x24a   : > { %p1951_p2 = pnand %p1950_p0, %p2411_p13 }
 0x24b   : > { %p1956_p5 = por %p1955_p11, %p1954_p10 }
 0x24c   : > { %p1952_p6 = pneg %p1951_p2 }
 0x24e   : > { %p1957_p3 = pnand %p1956_p5, %p1952_p6 }
 0x250   : > { %1960 = shalt.err (!%p1957_p3)
}
 0x251   : > { %1704 = dma.vmem_to_hbm [thread:$0]  (%p2411_p13), %s1460_s21, 128, %s2352_s22, %s1445_s27  }
 0x252 PF: > { %s1471_s18 = sand.u32 1, %s1999_s12   ;;  %p2412_p4 = scmp.ne.s32.totalorder %s2405_s25, 0 }
 0x253   : > { %p2413_p1 = scmp.ge.s32.totalorder %s2019_s17, 2  ;;  %s1472_s1 = scalar_lea.sflag [#allocation5], %s1471_s18 }
 0x255   : > { %p1715_p12 = pnand %p2413_p1, %p2412_p4 }
 0x257   : > { %p1716_p7 = pneg %p1715_p12 }
 0x259   : > { %1994 = dma.done.wait (%p1716_p7), %s1472_s1, 128  }
 0x25a   : > { %1996 = vsyncadd (%p1716_p7), %s1472_s1, 4294967168  ;;  %s20_s17 = sadd.s32 1, %s2019_s17   ;;  %s2414_s12 = smov %s2003_s13 }
 0x25b   : > { %p17_p8 = scmp.ge.s32.totalorder %s20_s17, 4   ;;  %s2415_s13 = smov %s2007_s14 }
 0x25c   : > { %s2416_s14 = smov %s2199_s6  ;;  %s2417_s15 = smov %s2015_s16 }
 0x25d   : > { %s2418_s16 = smov %s2420_s4  ;;  %19 = sbr.rel (!%p17_p8) target bundleno = 9 (0x9), region = 82 }
 0x262   :  { %1477 = vsyncpa [#allocation4], 1 }
 0x263   :  { %1479 = vsyncpa [#allocation4 + $0x1], 1 }
 0x264   :  { %1480 = vsyncpa [#allocation7], 1 }
 0x265   :  { %1481 = vsyncpa [#allocation5], 1 }
 0x266   :  { %1483 = vsyncpa [#allocation5 + $0x1], 1 }

</bundles_post_ra>
